<compile_context>
chip_gen: v5e
topology: v5e:2x2
jax: 0.10.0
libtpu: 0.0.40
codegen_flags: <defaults>
</compile_context>

<pallas_src>
import jax
import jax.numpy as jnp
from jax.experimental import pallas as pl
from jax.experimental.pallas import tpu as pltpu

# logical (PyTorch) sizes
D_IN = 784
D_H = 400
D_Z = 20

# lane-padded sizes used inside the kernel
D_H_P = 512          # 400 -> 4*128
D_Z_P = 128          # 20  -> 1*128
TB_MAX = 512         # max batch rows per grid step


def vae_kernel(
    x_ref, eps_ref,
    w1_ref, b1_ref,
    wh_ref, bh_ref,          # fused [mu | logvar] head: (D_H_P, 2*D_Z_P)
    w3_ref, b3_ref,
    w4_ref, b4_ref,
    recon_ref, head_ref,
):
    x = x_ref[...].astype(jnp.bfloat16)               # (TB, 784), cast in-kernel

    # ---- encode ----
    h1 = jnp.dot(x, w1_ref[...], preferred_element_type=jnp.float32) + b1_ref[...]
    h1 = jnp.maximum(h1, 0.0)                         # relu, f32

    head = jnp.dot(h1.astype(jnp.bfloat16), wh_ref[...],
                   preferred_element_type=jnp.float32) + bh_ref[...]
    mu = head[:, :D_Z_P]                              # (TB, 128), lane-aligned split
    logvar = head[:, D_Z_P:]                          # (TB, 128)

    # ---- reparameterize ----
    std = jnp.exp(0.5 * logvar)
    z = mu + eps_ref[...].astype(jnp.float32) * std   # pad cols stay 0 (eps/mu pads = 0)

    # ---- decode ----
    h3 = jnp.dot(z.astype(jnp.bfloat16), w3_ref[...],
                 preferred_element_type=jnp.float32) + b3_ref[...]
    h3 = jnp.maximum(h3, 0.0)
    logits = jnp.dot(h3.astype(jnp.bfloat16), w4_ref[...],
                     preferred_element_type=jnp.float32) + b4_ref[...]
    # sigmoid(x) = 0.5*tanh(0.5*x) + 0.5  -> single EUP transcendental per element
    recon = 0.5 * jnp.tanh(0.5 * logits) + 0.5

    recon_ref[...] = recon.astype(recon_ref.dtype)    # bf16 writeback
    head_ref[...] = head                              # f32 [mu | logvar]


def _round_up(x, m):
    return (x + m - 1) // m * m


def prepare_params(params):
    """Zero-pad hidden/latent dims to lane multiples, fuse mu/logvar heads, bf16 weights."""
    bf = jnp.bfloat16

    def padw(w, shape):
        return jnp.pad(w, [(0, s - d) for d, s in zip(w.shape, shape)]).astype(bf)

    def padb(b, n):
        return jnp.pad(b, ((0, 0), (0, n - b.shape[1]))).astype(jnp.float32)

    w1 = padw(params["w1"], (D_IN, D_H_P))            # (784, 512)
    b1 = padb(params["b1"], D_H_P)
    wh = jnp.concatenate([padw(params["w21"], (D_H_P, D_Z_P)),
                          padw(params["w22"], (D_H_P, D_Z_P))], axis=1)   # (512, 256)
    bh = jnp.concatenate([padb(params["b21"], D_Z_P),
                          padb(params["b22"], D_Z_P)], axis=1)            # (1, 256)
    w3 = padw(params["w3"], (D_Z_P, D_H_P))           # (128, 512)
    b3 = padb(params["b3"], D_H_P)
    w4 = padw(params["w4"], (D_H_P, D_IN))            # (512, 784)
    b4 = params["b4"].astype(jnp.float32)             # (1, 784)
    return (w1, b1, wh, bh, w3, b3, w4, b4)


@jax.jit
def vae_forward(x, eps, params):
    """x: (B,1,28,28) f32. Returns (recon (B,784) bf16, mu (B,20) f32, logvar (B,20) f32)."""
    B = x.shape[0]
    x_flat = x.reshape(-1, D_IN)                      # x.view(-1, 784), stays f32

    # Batch tile: as big as possible (amortizes ~0.35us/step pipeline overhead)
    # but never bigger than the 16-row-aligned batch; for small batches the
    # single block equals the full array so all (8,128) constraints are trivially
    # satisfied.  NOTE(v7x): with >= 2 grid steps the "parallel" batch axis feeds
    # both TensorCores.
    tb = min(TB_MAX, _round_up(B, 16))
    bp = _round_up(B, tb)
    n_blocks = bp // tb

    if bp != B:                                       # only copies when padding is needed
        x_flat = jnp.pad(x_flat, ((0, bp - B), (0, 0)))

    # eps is tiny: pad to one 128-lane tile (zeros in pad cols) and cast to bf16.
    eps_p = jnp.pad(eps.astype(jnp.bfloat16), ((0, bp - B), (0, D_Z_P - D_Z)))

    w1, b1, wh, bh, w3, b3, w4, b4 = prepare_params(params)

    def row_spec(cols):
        return pl.BlockSpec((tb, cols), lambda i: (i, 0))

    def resident(arr):
        return pl.BlockSpec(arr.shape, lambda i: (0, 0))

    in_specs = [
        row_spec(D_IN),              # x   (f32, logical width 784)
        row_spec(D_Z_P),             # eps (bf16)
        resident(w1), resident(b1),
        resident(wh), resident(bh),
        resident(w3), resident(b3),
        resident(w4), resident(b4),
    ]
    out_specs = [
        row_spec(D_IN),              # recon (bf16, logical width 784)
        row_spec(2 * D_Z_P),         # fused [mu | logvar] head (f32)
    ]
    out_shapes = (
        jax.ShapeDtypeStruct((bp, D_IN), jnp.bfloat16),
        jax.ShapeDtypeStruct((bp, 2 * D_Z_P), jnp.float32),
    )

    # advisory cost hint for the XLA scheduler
    mac = D_IN * D_H_P + D_H_P * (2 * D_Z_P) + D_Z_P * D_H_P + D_H_P * D_IN
    weight_bytes = 2 * mac + 4 * (2 * D_H_P + 2 * D_Z_P + D_IN)
    cost = pl.CostEstimate(
        flops=2 * bp * mac,
        transcendentals=bp * (D_Z_P + D_IN),
        bytes_accessed=bp * (4 * D_IN + 2 * D_Z_P)        # x (f32) + eps (bf16) in
                       + bp * (2 * D_IN + 8 * D_Z_P)      # recon (bf16) + head (f32) out
                       + weight_bytes,
    )

    recon_p, head_p = pl.pallas_call(
        vae_kernel,
        out_shape=out_shapes,
        grid_spec=pltpu.PrefetchScalarGridSpec(
            num_scalar_prefetch=0,
            grid=(n_blocks,),
            in_specs=in_specs,
            out_specs=out_specs,
        ),
        compiler_params=pltpu.CompilerParams(
            dimension_semantics=("parallel",),
            vmem_limit_bytes=32 * 1024 * 1024,
        ),
        cost_estimate=cost,
    )(x_flat, eps_p, w1, b1, wh, bh, w3, b3, w4, b4)

    recon = recon_p[:B] if bp != B else recon_p
    mu = head_p[:B, :D_Z]
    logvar = head_p[:B, D_Z_P:D_Z_P + D_Z]
    return recon, mu, logvar


def init_params(key):
    """Deterministic init matching PyTorch Linear shapes.

    PyTorch stores weight as (out, in); we keep the (in, out) transpose so the
    kernel computes x @ W_T + b. Biases stored as (1, out) for broadcasting.
    """
    def linear(key, d_in, d_out):
        kw, kb = jax.random.split(key)
        bound = 1.0 / jnp.sqrt(d_in)
        w_t = jax.random.uniform(kw, (d_in, d_out), jnp.float32, -bound, bound)
        b = jax.random.uniform(kb, (1, d_out), jnp.float32, -bound, bound)
        return w_t, b

    k1, k21, k22, k3, k4 = jax.random.split(key, 5)
    w1, b1 = linear(k1, D_IN, D_H)
    w21, b21 = linear(k21, D_H, D_Z)
    w22, b22 = linear(k22, D_H, D_Z)
    w3, b3 = linear(k3, D_Z, D_H)
    w4, b4 = linear(k4, D_H, D_IN)
    return dict(w1=w1, b1=b1, w21=w21, b21=b21, w22=w22, b22=b22,
                w3=w3, b3=b3, w4=w4, b4=b4)


def vae_reference(x, eps, params):
    """Pure-JAX reference with the same bf16-input / f32-accumulate matmuls."""
    def mm(a, w):
        return jnp.dot(a.astype(jnp.bfloat16), w.astype(jnp.bfloat16),
                       preferred_element_type=jnp.float32)

    x_flat = x.reshape(-1, D_IN)
    h1 = jax.nn.relu(mm(x_flat, params["w1"]) + params["b1"])
    mu = mm(h1, params["w21"]) + params["b21"]
    logvar = mm(h1, params["w22"]) + params["b22"]
    std = jnp.exp(0.5 * logvar)
    z = mu + eps.astype(jnp.bfloat16).astype(jnp.float32) * std
    h3 = jax.nn.relu(mm(z, params["w3"]) + params["b3"])
    recon = jax.nn.sigmoid(mm(h3, params["w4"]) + params["b4"])
    return recon, mu, logvar


if __name__ == "__main__":
    key = jax.random.PRNGKey(0)
    k_params, k_x, k_eps = jax.random.split(key, 3)

    B = 2
    params = init_params(k_params)
    x = jax.random.normal(k_x, (B, 1, 28, 28), jnp.float32)   # NCHW, flattened to 784
    eps = jax.random.normal(k_eps, (B, D_Z), jnp.float32)      # reparameterization noise

    recon, mu, logvar = jax.block_until_ready(vae_forward(x, eps, params))

    # sanity check against pure-JAX reference (bf16 matmul inputs everywhere;
    # recon is stored as bf16 by the kernel -> bf16-level tolerance)
    r_ref, mu_ref, lv_ref = vae_reference(x, eps, params)
    assert recon.shape == (B, D_IN) and mu.shape == (B, D_Z) and logvar.shape == (B, D_Z)
    assert jnp.allclose(mu, mu_ref, atol=1e-2, rtol=1e-2)
    assert jnp.allclose(logvar, lv_ref, atol=1e-2, rtol=1e-2)
    assert jnp.allclose(recon.astype(jnp.float32), r_ref, atol=2e-2, rtol=2e-2)

    print("KERNEL_OK")
</pallas_src>

<mosaic_0001>
module attributes {stable_mosaic.version = 11 : i64} {
  func.func @vae_kernel(%arg0: i32, %arg1: memref<16x784xf32, #tpu.memory_space<vmem>>, %arg2: memref<16x128xbf16, #tpu.memory_space<vmem>>, %arg3: memref<784x512xbf16, #tpu.memory_space<vmem>>, %arg4: memref<1x512xf32, #tpu.memory_space<vmem>>, %arg5: memref<512x256xbf16, #tpu.memory_space<vmem>>, %arg6: memref<1x256xf32, #tpu.memory_space<vmem>>, %arg7: memref<128x512xbf16, #tpu.memory_space<vmem>>, %arg8: memref<1x512xf32, #tpu.memory_space<vmem>>, %arg9: memref<512x784xbf16, #tpu.memory_space<vmem>>, %arg10: memref<1x784xf32, #tpu.memory_space<vmem>>, %arg11: memref<16x784xbf16, #tpu.memory_space<vmem>>, %arg12: memref<16x256xf32, #tpu.memory_space<vmem>>) attributes {dimension_semantics = [#tpu.dimension_semantics<parallel>], iteration_bounds = array<i64: 1>, scalar_prefetch = 0 : i64, scratch_operands = 0 : i64, tpu.core_type = #tpu.core_type<tc>, window_params = [{transform_indices = @transform_0, window_bounds = array<i64: 16, 784>}, {transform_indices = @transform_1, window_bounds = array<i64: 16, 128>}, {pipeline_mode = #tpu.pipeline_mode<synchronous>, transform_indices = @transform_2, window_bounds = array<i64: 784, 512>}, {pipeline_mode = #tpu.pipeline_mode<synchronous>, transform_indices = @transform_3, window_bounds = array<i64: 1, 512>}, {pipeline_mode = #tpu.pipeline_mode<synchronous>, transform_indices = @transform_4, window_bounds = array<i64: 512, 256>}, {pipeline_mode = #tpu.pipeline_mode<synchronous>, transform_indices = @transform_5, window_bounds = array<i64: 1, 256>}, {pipeline_mode = #tpu.pipeline_mode<synchronous>, transform_indices = @transform_6, window_bounds = array<i64: 128, 512>}, {pipeline_mode = #tpu.pipeline_mode<synchronous>, transform_indices = @transform_7, window_bounds = array<i64: 1, 512>}, {pipeline_mode = #tpu.pipeline_mode<synchronous>, transform_indices = @transform_8, window_bounds = array<i64: 512, 784>}, {pipeline_mode = #tpu.pipeline_mode<synchronous>, transform_indices = @transform_9, window_bounds = array<i64: 1, 784>}, {transform_indices = @transform_10, window_bounds = array<i64: 16, 784>}, {transform_indices = @transform_11, window_bounds = array<i64: 16, 256>}]} {
    %c0 = arith.constant 0 : index
    %c0_0 = arith.constant 0 : index
    %0 = vector.load %arg1[%c0, %c0_0] : memref<16x784xf32, #tpu.memory_space<vmem>>, vector<16x784xf32>
    %1 = arith.truncf %0 : vector<16x784xf32> to vector<16x784xbf16>
    %c0_1 = arith.constant 0 : index
    %c0_2 = arith.constant 0 : index
    %2 = vector.load %arg3[%c0_1, %c0_2] : memref<784x512xbf16, #tpu.memory_space<vmem>>, vector<784x512xbf16>
    %cst = arith.constant dense<0.000000e+00> : vector<16x512xf32>
    %3 = tpu.matmul %1, %2, %cst {dimension_numbers = #tpu.dot_dimension_numbers<[1], [0], [0], [1], [0, 0, 1, 1], [], []>} : vector<16x784xbf16>, vector<784x512xbf16>, vector<16x512xf32> -> vector<16x512xf32>
    %c0_3 = arith.constant 0 : index
    %c0_4 = arith.constant 0 : index
    %4 = vector.load %arg4[%c0_3, %c0_4] : memref<1x512xf32, #tpu.memory_space<vmem>>, vector<1x512xf32>
    %5 = vector.broadcast %4 : vector<1x512xf32> to vector<16x512xf32>
    %6 = arith.addf %3, %5 : vector<16x512xf32>
    %cst_5 = arith.constant 0.000000e+00 : f32
    %7 = vector.broadcast %cst_5 : f32 to vector<16x512xf32>
    %8 = arith.maximumf %6, %7 : vector<16x512xf32>
    %9 = arith.truncf %8 : vector<16x512xf32> to vector<16x512xbf16>
    %c0_6 = arith.constant 0 : index
    %c0_7 = arith.constant 0 : index
    %10 = vector.load %arg5[%c0_6, %c0_7] : memref<512x256xbf16, #tpu.memory_space<vmem>>, vector<512x256xbf16>
    %cst_8 = arith.constant dense<0.000000e+00> : vector<16x256xf32>
    %11 = tpu.matmul %9, %10, %cst_8 {dimension_numbers = #tpu.dot_dimension_numbers<[1], [0], [0], [1], [0, 0, 1, 1], [], []>} : vector<16x512xbf16>, vector<512x256xbf16>, vector<16x256xf32> -> vector<16x256xf32>
    %c0_9 = arith.constant 0 : index
    %c0_10 = arith.constant 0 : index
    %12 = vector.load %arg6[%c0_9, %c0_10] : memref<1x256xf32, #tpu.memory_space<vmem>>, vector<1x256xf32>
    %13 = vector.broadcast %12 : vector<1x256xf32> to vector<16x256xf32>
    %14 = arith.addf %11, %13 : vector<16x256xf32>
    %15 = vector.extract_strided_slice %14 {offsets = [0, 0], sizes = [16, 128], strides = [1, 1]} : vector<16x256xf32> to vector<16x128xf32>
    %16 = vector.extract_strided_slice %14 {offsets = [0, 128], sizes = [16, 128], strides = [1, 1]} : vector<16x256xf32> to vector<16x128xf32>
    %cst_11 = arith.constant 5.000000e-01 : f32
    %17 = vector.broadcast %cst_11 : f32 to vector<16x128xf32>
    %18 = arith.mulf %17, %16 : vector<16x128xf32>
    %19 = math.exp %18 : vector<16x128xf32>
    %c0_12 = arith.constant 0 : index
    %c0_13 = arith.constant 0 : index
    %20 = vector.load %arg2[%c0_12, %c0_13] : memref<16x128xbf16, #tpu.memory_space<vmem>>, vector<16x128xbf16>
    %21 = arith.extf %20 : vector<16x128xbf16> to vector<16x128xf32>
    %22 = arith.mulf %21, %19 : vector<16x128xf32>
    %23 = arith.addf %15, %22 : vector<16x128xf32>
    %24 = arith.truncf %23 : vector<16x128xf32> to vector<16x128xbf16>
    %c0_14 = arith.constant 0 : index
    %c0_15 = arith.constant 0 : index
    %25 = vector.load %arg7[%c0_14, %c0_15] : memref<128x512xbf16, #tpu.memory_space<vmem>>, vector<128x512xbf16>
    %cst_16 = arith.constant dense<0.000000e+00> : vector<16x512xf32>
    %26 = tpu.matmul %24, %25, %cst_16 {dimension_numbers = #tpu.dot_dimension_numbers<[1], [0], [0], [1], [0, 0, 1, 1], [], []>} : vector<16x128xbf16>, vector<128x512xbf16>, vector<16x512xf32> -> vector<16x512xf32>
    %c0_17 = arith.constant 0 : index
    %c0_18 = arith.constant 0 : index
    %27 = vector.load %arg8[%c0_17, %c0_18] : memref<1x512xf32, #tpu.memory_space<vmem>>, vector<1x512xf32>
    %28 = vector.broadcast %27 : vector<1x512xf32> to vector<16x512xf32>
    %29 = arith.addf %26, %28 : vector<16x512xf32>
    %cst_19 = arith.constant 0.000000e+00 : f32
    %30 = vector.broadcast %cst_19 : f32 to vector<16x512xf32>
    %31 = arith.maximumf %29, %30 : vector<16x512xf32>
    %32 = arith.truncf %31 : vector<16x512xf32> to vector<16x512xbf16>
    %c0_20 = arith.constant 0 : index
    %c0_21 = arith.constant 0 : index
    %33 = vector.load %arg9[%c0_20, %c0_21] : memref<512x784xbf16, #tpu.memory_space<vmem>>, vector<512x784xbf16>
    %cst_22 = arith.constant dense<0.000000e+00> : vector<16x784xf32>
    %34 = tpu.matmul %32, %33, %cst_22 {dimension_numbers = #tpu.dot_dimension_numbers<[1], [0], [0], [1], [0, 0, 1, 1], [], []>} : vector<16x512xbf16>, vector<512x784xbf16>, vector<16x784xf32> -> vector<16x784xf32>
    %c0_23 = arith.constant 0 : index
    %c0_24 = arith.constant 0 : index
    %35 = vector.load %arg10[%c0_23, %c0_24] : memref<1x784xf32, #tpu.memory_space<vmem>>, vector<1x784xf32>
    %36 = vector.broadcast %35 : vector<1x784xf32> to vector<16x784xf32>
    %37 = arith.addf %34, %36 : vector<16x784xf32>
    %cst_25 = arith.constant 5.000000e-01 : f32
    %38 = vector.broadcast %cst_25 : f32 to vector<16x784xf32>
    %39 = arith.mulf %38, %37 : vector<16x784xf32>
    %40 = math.tanh %39 : vector<16x784xf32>
    %cst_26 = arith.constant 5.000000e-01 : f32
    %41 = vector.broadcast %cst_26 : f32 to vector<16x784xf32>
    %42 = arith.mulf %41, %40 : vector<16x784xf32>
    %cst_27 = arith.constant 5.000000e-01 : f32
    %43 = vector.broadcast %cst_27 : f32 to vector<16x784xf32>
    %44 = arith.addf %42, %43 : vector<16x784xf32>
    %45 = arith.truncf %44 : vector<16x784xf32> to vector<16x784xbf16>
    %c0_28 = arith.constant 0 : index
    %c0_29 = arith.constant 0 : index
    %46 = vector.load %arg11[%c0_28, %c0_29] : memref<16x784xbf16, #tpu.memory_space<vmem>>, vector<16x784xbf16>
    tpu.vector_store %arg11[%c0_28, %c0_29], %45 {strides = array<i32>} : memref<16x784xbf16, #tpu.memory_space<vmem>>, vector<16x784xbf16>,
    %c0_30 = arith.constant 0 : index
    %c0_31 = arith.constant 0 : index
    %47 = vector.load %arg12[%c0_30, %c0_31] : memref<16x256xf32, #tpu.memory_space<vmem>>, vector<16x256xf32>
    tpu.vector_store %arg12[%c0_30, %c0_31], %14 {strides = array<i32>} : memref<16x256xf32, #tpu.memory_space<vmem>>, vector<16x256xf32>,
    return
  }
  func.func @transform_0(%arg0: i32) -> (i32, i32) {
    %c0_i32 = arith.constant 0 : i32
    %c0_i32_0 = arith.constant 0 : i32
    return %arg0, %c0_i32 : i32, i32
  }
  func.func @transform_1(%arg0: i32) -> (i32, i32) {
    %c0_i32 = arith.constant 0 : i32
    %c0_i32_0 = arith.constant 0 : i32
    return %arg0, %c0_i32 : i32, i32
  }
  func.func @transform_2(%arg0: i32) -> (i32, i32) {
    %c0_i32 = arith.constant 0 : i32
    %c0_i32_0 = arith.constant 0 : i32
    %c0_i32_1 = arith.constant 0 : i32
    return %c0_i32, %c0_i32_0 : i32, i32
  }
  func.func @transform_3(%arg0: i32) -> (i32, i32) {
    %c0_i32 = arith.constant 0 : i32
    %c0_i32_0 = arith.constant 0 : i32
    %c0_i32_1 = arith.constant 0 : i32
    return %c0_i32, %c0_i32_0 : i32, i32
  }
  func.func @transform_4(%arg0: i32) -> (i32, i32) {
    %c0_i32 = arith.constant 0 : i32
    %c0_i32_0 = arith.constant 0 : i32
    %c0_i32_1 = arith.constant 0 : i32
    return %c0_i32, %c0_i32_0 : i32, i32
  }
  func.func @transform_5(%arg0: i32) -> (i32, i32) {
    %c0_i32 = arith.constant 0 : i32
    %c0_i32_0 = arith.constant 0 : i32
    %c0_i32_1 = arith.constant 0 : i32
    return %c0_i32, %c0_i32_0 : i32, i32
  }
  func.func @transform_6(%arg0: i32) -> (i32, i32) {
    %c0_i32 = arith.constant 0 : i32
    %c0_i32_0 = arith.constant 0 : i32
    %c0_i32_1 = arith.constant 0 : i32
    return %c0_i32, %c0_i32_0 : i32, i32
  }
  func.func @transform_7(%arg0: i32) -> (i32, i32) {
    %c0_i32 = arith.constant 0 : i32
    %c0_i32_0 = arith.constant 0 : i32
    %c0_i32_1 = arith.constant 0 : i32
    return %c0_i32, %c0_i32_0 : i32, i32
  }
  func.func @transform_8(%arg0: i32) -> (i32, i32) {
    %c0_i32 = arith.constant 0 : i32
    %c0_i32_0 = arith.constant 0 : i32
    %c0_i32_1 = arith.constant 0 : i32
    return %c0_i32, %c0_i32_0 : i32, i32
  }
  func.func @transform_9(%arg0: i32) -> (i32, i32) {
    %c0_i32 = arith.constant 0 : i32
    %c0_i32_0 = arith.constant 0 : i32
    %c0_i32_1 = arith.constant 0 : i32
    return %c0_i32, %c0_i32_0 : i32, i32
  }
  func.func @transform_10(%arg0: i32) -> (i32, i32) {
    %c0_i32 = arith.constant 0 : i32
    %c0_i32_0 = arith.constant 0 : i32
    return %arg0, %c0_i32 : i32, i32
  }
  func.func @transform_11(%arg0: i32) -> (i32, i32) {
    %c0_i32 = arith.constant 0 : i32
    %c0_i32_0 = arith.constant 0 : i32
    return %arg0, %c0_i32 : i32, i32
  }
}

</mosaic_0001>

<bundles_post_ra>
// kernel: vae_forward.1
= control target key start
LH: loop header
LB: loop body
LE: loop exit
PB: predicated region body
PF: predicated region fallthrough
CT: control target
= control target key end

     0   :  { %vm1245_vm0 = vcmask 130048   ;;  %vm4323_vm1 = vcmask 125952   ;;  %s10336_s2 = inlined_call_operand.vmem [shape: bf16[784,512], index: 2, kind: input, shape index: {}]   ;;  %s10337_s0 = inlined_call_operand.vmem [shape: f32[16,784], index: 0, kind: input, shape index: {}]   ;;  %s10338_s4 = inlined_call_operand.vmem [shape: bf16[512,256], index: 4, kind: input, shape index: {}]   ;;  %s10339_s3 = inlined_call_operand.vmem [shape: f32[1,512], index: 3, kind: input, shape index: {}]   ;;  %s10340_s6 = inlined_call_operand.vmem [shape: bf16[128,512], index: 6, kind: input, shape index: {}]   ;;  %s10341_s5 = inlined_call_operand.vmem [shape: f32[1,256], index: 5, kind: input, shape index: {}]   ;;  %s10342_s11 = inlined_call_operand.vmem [shape: f32[16,256], index: 11, kind: output, shape index: {1}]   ;;  %s10343_s8 = inlined_call_operand.vmem [shape: bf16[512,784], index: 8, kind: input, shape index: {}]   ;;  %s10344_s1 = inlined_call_operand.vmem [shape: bf16[16,128], index: 1, kind: input, shape index: {}]   ;;  %s10345_s7 = inlined_call_operand.vmem [shape: f32[1,512], index: 7, kind: input, shape index: {}]   ;;  %s10346_s9 = inlined_call_operand.vmem [shape: f32[1,784], index: 9, kind: input, shape index: {}]   ;;  %s10347_s10 = inlined_call_operand.vmem [shape: bf16[16,784], index: 10, kind: output, shape index: {0}]  }
   0x1   :  { %v4455_v0 = vld [vmem:[%s10336_s2 + $0xe0] sm:$0xf]  ;;  %v6439_v1 = vld [vmem:[%s10336_s2 + $0xec] sm:$0xf0] }
   0x2   :  { %v4583_v2 = vld [vmem:[%s10336_s2 + $0x1e0] sm:$0xf]  ;;  %v4456_v3 = vor.u32 %v6439_v1, %v4455_v0  ;;  %v6471_v4 = vld [vmem:[%s10336_s2 + $0x1ec] sm:$0xf0] }
   0x3   :  { %v4711_v5 = vld [vmem:[%s10336_s2 + $0x2e0] sm:$0xf]  ;;  %v6503_v6 = vld [vmem:[%s10336_s2 + $0x2ec] sm:$0xf0]  ;;  %v4584_v7 = vor.u32 %v6471_v4, %v4583_v2 }
   0x4   :  { %v4712_v8 = vor.u32 %v6503_v6, %v4711_v5  ;;  %v4839_v9 = vld [vmem:[%s10336_s2 + $0x3e0] sm:$0xf]  ;;  %v6535_v10 = vld [vmem:[%s10336_s2 + $0x3ec] sm:$0xf0]  ;;  %1249 = vmatpush.bf16.msra.mxu0 %v4456_v3 }
   0x5   :  { %v4439_v11 = vld [vmem:[%s10336_s2 + $0xc0] sm:$0xf]  ;;  %v4840_v12 = vor.u32 %v6535_v10, %v4839_v9  ;;  %v6435_v13 = vld [vmem:[%s10336_s2 + $0xcc] sm:$0xf0]  ;;  %1263 = vmatpush.bf16.msra.mxu1 %v4584_v7 }
   0x6   :  { %v4567_v14 = vld [vmem:[%s10336_s2 + $0x1c0] sm:$0xf]  ;;  %v6467_v15 = vld [vmem:[%s10336_s2 + $0x1cc] sm:$0xf0]  ;;  %1277 = vmatpush.bf16.msra.mxu2 %v4712_v8  ;;  %v4440_v16 = vor.u32 %v6435_v13, %v4439_v11 }
   0x7   :  { %v4568_v17 = vor.u32 %v6467_v15, %v4567_v14  ;;  %v4695_v18 = vld [vmem:[%s10336_s2 + $0x2c0] sm:$0xf]  ;;  %v6499_v19 = vld [vmem:[%s10336_s2 + $0x2cc] sm:$0xf0]  ;;  %1291 = vmatpush.bf16.msra.mxu3 %v4840_v12 }
   0x8   :  { %v4823_v20 = vld [vmem:[%s10336_s2 + $0x3c0] sm:$0xf]  ;;  %v4696_v21 = vor.u32 %v6499_v19, %v4695_v18  ;;  %v6531_v22 = vld [vmem:[%s10336_s2 + $0x3cc] sm:$0xf0]  ;;  %1250 = vmatpush.bf16.msra.mxu0 %v4440_v16 }
   0x9   :  { %v4423_v23 = vld [vmem:[%s10336_s2 + $0xa0] sm:$0xf]  ;;  %v6431_v24 = vld [vmem:[%s10336_s2 + $0xac] sm:$0xf0]  ;;  %v4824_v25 = vor.u32 %v6531_v22, %v4823_v20  ;;  %1264 = vmatpush.bf16.msra.mxu1 %v4568_v17 }
   0xa   :  { %v4551_v26 = vld [vmem:[%s10336_s2 + $0x1a0] sm:$0xf]  ;;  %v6463_v27 = vld [vmem:[%s10336_s2 + $0x1ac] sm:$0xf0]  ;;  %v4424_v29 = vor.u32 %v6431_v24, %v4423_v23  ;;  %1278 = vmatpush.bf16.msra.mxu2 %v4696_v21 }
   0xb   :  { %v4679_v28 = vld [vmem:[%s10336_s2 + $0x2a0] sm:$0xf]  ;;  %v6495_v30 = vld [vmem:[%s10336_s2 + $0x2ac] sm:$0xf0]  ;;  %v4552_v33 = vor.u32 %v6463_v27, %v4551_v26  ;;  %1292 = vmatpush.bf16.msra.mxu3 %v4824_v25 }
   0xc   :  { %v4807_v31 = vld [vmem:[%s10336_s2 + $0x3a0] sm:$0xf]  ;;  %v6527_v32 = vld [vmem:[%s10336_s2 + $0x3ac] sm:$0xf0]  ;;  %v4680_v34 = vor.u32 %v6495_v30, %v4679_v28  ;;  %1251 = vmatpush.bf16.msra.mxu0 %v4424_v29 }
   0xd   :  { %v4407_v35 = vld [vmem:[%s10336_s2 + $0x80] sm:$0xf]  ;;  %v6427_v36 = vld [vmem:[%s10336_s2 + $0x8c] sm:$0xf0]  ;;  %v4808_v38 = vor.u32 %v6527_v32, %v4807_v31  ;;  %1265 = vmatpush.bf16.msra.mxu1 %v4552_v33  ;;  %v6437_v32 = vld [vmem:[%s10336_s2 + $0xe4] sm:$0xf] }
   0xe   :  { %v4535_v37 = vld [vmem:[%s10336_s2 + $0x180] sm:$0xf]  ;;  %v6459_v39 = vld [vmem:[%s10336_s2 + $0x18c] sm:$0xf0]  ;;  %v4408_v44 = vor.u32 %v6427_v36, %v4407_v35  ;;  %1279 = vmatpush.bf16.msra.mxu2 %v4680_v34  ;;  %v4457_v33 = vld [vmem:[%s10336_s2 + $0xf0] sm:$0xf0] }
   0xf   :  { %v4663_v40 = vld [vmem:[%s10336_s2 + $0x280] sm:$0xf]  ;;  %v6491_v41 = vld [vmem:[%s10336_s2 + $0x28c] sm:$0xf0]  ;;  %v4536_v45 = vor.u32 %v6459_v39, %v4535_v37  ;;  %1293 = vmatpush.bf16.msra.mxu3 %v4808_v38  ;;  %v47_v36 = vld [vmem:[%s10337_s0 + $0x48] sm:$0xff] }
  0x10   :  { %v4791_v42 = vld [vmem:[%s10336_s2 + $0x380] sm:$0xf]  ;;  %v6523_v43 = vld [vmem:[%s10336_s2 + $0x38c] sm:$0xf0]  ;;  %v4664_v46 = vor.u32 %v6491_v41, %v4663_v40  ;;  %1252 = vmatpush.bf16.msra.mxu0 %v4408_v44  ;;  %v6469_v41 = vld [vmem:[%s10336_s2 + $0x1e4] sm:$0xf] }
  0x11   :  { %v4391_v47 = vld [vmem:[%s10336_s2 + $0x60] sm:$0xf]  ;;  %v6423_v48 = vld [vmem:[%s10336_s2 + $0x6c] sm:$0xf0]  ;;  %v4792_v50 = vor.u32 %v6523_v43, %v4791_v42  ;;  %1266 = vmatpush.bf16.msra.mxu1 %v4536_v45  ;;  %v45_v43 = vld [vmem:[%s10337_s0 + $0x38] sm:$0xff] }
  0x12   :  { %v4519_v49 = vld [vmem:[%s10336_s2 + $0x160] sm:$0xf]  ;;  %v6455_v51 = vld [vmem:[%s10336_s2 + $0x16c] sm:$0xf0]  ;;  %v4392_v56 = vor.u32 %v6423_v48, %v4391_v47  ;;  %1280 = vmatpush.bf16.msra.mxu2 %v4664_v46  ;;  %v4585_v46 = vld [vmem:[%s10336_s2 + $0x1f0] sm:$0xf0] }
  0x13   :  { %v4647_v52 = vld [vmem:[%s10336_s2 + $0x260] sm:$0xf]  ;;  %v6487_v53 = vld [vmem:[%s10336_s2 + $0x26c] sm:$0xf0]  ;;  %v4520_v57 = vor.u32 %v6455_v51, %v4519_v49  ;;  %1294 = vmatpush.bf16.msra.mxu3 %v4792_v50  ;;  %v41_v47 = vld [vmem:[%s10337_s0 + $0x18] sm:$0xff]  ;;  %v4460_v50 = vor.u32 %v6437_v32, %v4457_v33 }
  0x14   :  { %v4775_v54 = vld [vmem:[%s10336_s2 + $0x360] sm:$0xf]  ;;  %v6519_v55 = vld [vmem:[%s10336_s2 + $0x36c] sm:$0xf0]  ;;  %v4648_v58 = vor.u32 %v6487_v53, %v4647_v52  ;;  %1253 = vmatpush.bf16.msra.mxu0 %v4392_v56 }
  0x15   :  { %v4375_v59 = vld [vmem:[%s10336_s2 + $0x40] sm:$0xf]  ;;  %v6419_v60 = vld [vmem:[%s10336_s2 + $0x4c] sm:$0xf0]  ;;  %v4776_v62 = vor.u32 %v6519_v55, %v4775_v54  ;;  %1267 = vmatpush.bf16.msra.mxu1 %v4520_v57  ;;  %v6433_v57 = vld [vmem:[%s10336_s2 + $0xc4] sm:$0xf] }
  0x16   :  { %v4503_v61 = vld [vmem:[%s10336_s2 + $0x140] sm:$0xf]  ;;  %v6451_v63 = vld [vmem:[%s10336_s2 + $0x14c] sm:$0xf0]  ;;  %v4376_v4 = vor.u32 %v6419_v60, %v4375_v59  ;;  %1281 = vmatpush.bf16.msra.mxu2 %v4648_v58  ;;  %v4441_v58 = vld [vmem:[%s10336_s2 + $0xd0] sm:$0xf0] }
  0x17   :  { %v4631_v0 = vld [vmem:[%s10336_s2 + $0x240] sm:$0xf]  ;;  %v6483_v1 = vld [vmem:[%s10336_s2 + $0x24c] sm:$0xf0]  ;;  %v4504_v6 = vor.u32 %v6451_v63, %v4503_v61  ;;  %1295 = vmatpush.bf16.msra.mxu3 %v4776_v62  ;;  %v39_v61 = vld [vmem:[%s10337_s0 + $0x8] sm:$0xff]  ;;  %v4588_v63 = vor.u32 %v6469_v41, %v4585_v46 }
  0x18   :  { %v4759_v2 = vld [vmem:[%s10336_s2 + $0x340] sm:$0xf]  ;;  %v6515_v3 = vld [vmem:[%s10336_s2 + $0x34c] sm:$0xf0]  ;;  %v4632_v7 = vor.u32 %v6483_v1, %v4631_v0  ;;  %1254 = vmatpush.bf16.msra.mxu0 %v4376_v4  ;;  %v6465_v1 = vld [vmem:[%s10336_s2 + $0x1c4] sm:$0xf]  ;;  %v4444_v4 = vor.u32 %v6433_v57, %v4441_v58 }
  0x19   :  { %v4359_v5 = vld [vmem:[%s10336_s2 + $0x20] sm:$0xf]  ;;  %v6415_v8 = vld [vmem:[%s10336_s2 + $0x2c] sm:$0xf0]  ;;  %v4760_v11 = vor.u32 %v6515_v3, %v4759_v2  ;;  %1268 = vmatpush.bf16.msra.mxu1 %v4504_v6  ;;  %v4569_v2 = vld [vmem:[%s10336_s2 + $0x1d0] sm:$0xf0] }
  0x1a   :  { %v4487_v9 = vld [vmem:[%s10336_s2 + $0x120] sm:$0xf]  ;;  %v6447_v10 = vld [vmem:[%s10336_s2 + $0x12c] sm:$0xf0]  ;;  %v4360_v18 = vor.u32 %v6415_v8, %v4359_v5  ;;  %1282 = vmatpush.bf16.msra.mxu2 %v4632_v7  ;;  %v4521_v41 = vld [vmem:[%s10336_s2 + $0x170] sm:$0xf0] }
  0x1b   :  { %v4615_v12 = vld [vmem:[%s10336_s2 + $0x220] sm:$0xf]  ;;  %v6479_v13 = vld [vmem:[%s10336_s2 + $0x22c] sm:$0xf0]  ;;  %v4488_v23 = vor.u32 %v6447_v10, %v4487_v9  ;;  %1296 = vmatpush.bf16.msra.mxu3 %v4760_v11  ;;  %v6429_v10 = vld [vmem:[%s10336_s2 + $0xa4] sm:$0xf] }
  0x1c   :  { %v4743_v14 = vld [vmem:[%s10336_s2 + $0x320] sm:$0xf]  ;;  %v6511_v15 = vld [vmem:[%s10336_s2 + $0x32c] sm:$0xf0]  ;;  %v4616_v24 = vor.u32 %v6479_v13, %v4615_v12  ;;  %1255 = vmatpush.bf16.msra.mxu0 %v4360_v18  ;;  %v4425_v11 = vld [vmem:[%s10336_s2 + $0xb0] sm:$0xf0]  ;;  %v4572_v12 = vor.u32 %v6465_v1, %v4569_v2 }
  0x1d   :  { %v4343_v16 = vld [vmem:[%s10336_s2] sm:$0xf]  ;;  %v6411_v17 = vld [vmem:[%s10336_s2 + $0xc] sm:$0xf0]  ;;  %v4744_v28 = vor.u32 %v6511_v15, %v4743_v14  ;;  %1269 = vmatpush.bf16.msra.mxu1 %v4488_v23  ;;  %v6461_v14 = vld [vmem:[%s10336_s2 + $0x1a4] sm:$0xf] }
  0x1e   :  { %v4471_v19 = vld [vmem:[%s10336_s2 + $0x100] sm:$0xf]  ;;  %v6443_v20 = vld [vmem:[%s10336_s2 + $0x10c] sm:$0xf0]  ;;  %v4344_v35 = vor.u32 %v6411_v17, %v4343_v16  ;;  %1283 = vmatpush.bf16.msra.mxu2 %v4616_v24  ;;  %v4553_v15 = vld [vmem:[%s10336_s2 + $0x1b0] sm:$0xf0]  ;;  %v4428_v17 = vor.u32 %v6429_v10, %v4425_v11 }
  0x1f   :  { %v4599_v21 = vld [vmem:[%s10336_s2 + $0x200] sm:$0xf]  ;;  %v6475_v22 = vld [vmem:[%s10336_s2 + $0x20c] sm:$0xf0]  ;;  %v4472_v39 = vor.u32 %v6443_v20, %v4471_v19  ;;  %1297 = vmatpush.bf16.msra.mxu3 %v4744_v28  ;;  %v4409_v23 = vld [vmem:[%s10336_s2 + $0x90] sm:$0xf0]  ;;  %v4556_v24 = vor.u32 %v6461_v14, %v4553_v15 }
  0x20   :  { %v4727_v25 = vld [vmem:[%s10336_s2 + $0x300] sm:$0xf]  ;;  %v6507_v26 = vld [vmem:[%s10336_s2 + $0x30c] sm:$0xf0]  ;;  %v4600_v40 = vor.u32 %v6475_v22, %v4599_v21  ;;  %1256 = vmatpush.bf16.msra.mxu0 %v4344_v35  ;;  %v6425_v22 = vld [vmem:[%s10336_s2 + $0x84] sm:$0xf] }
  0x21   :  { %v4967_v27 = vld [vmem:[%s10336_s2 + $0x4e0] sm:$0xf]  ;;  %v6567_v29 = vld [vmem:[%s10336_s2 + $0x4ec] sm:$0xf0]  ;;  %v4728_v44 = vor.u32 %v6507_v26, %v4727_v25  ;;  %1270 = vmatpush.bf16.msra.mxu1 %v4472_v39  ;;  %v6457_v26 = vld [vmem:[%s10336_s2 + $0x184] sm:$0xf] }
  0x22   :  { %v5095_v30 = vld [vmem:[%s10336_s2 + $0x5e0] sm:$0xf]  ;;  %v6599_v31 = vld [vmem:[%s10336_s2 + $0x5ec] sm:$0xf0]  ;;  %v4968_v45 = vor.u32 %v6567_v29, %v4967_v27  ;;  %1284 = vmatpush.bf16.msra.mxu2 %v4600_v40  ;;  %v4537_v27 = vld [vmem:[%s10336_s2 + $0x190] sm:$0xf0]  ;;  %v4412_v29 = vor.u32 %v6425_v22, %v4409_v23 }
  0x23   :  { %v40_v34 = vld [vmem:[%s10337_s0 + $0x10] sm:$0xff]  ;;  %v5111_v37 = vld [vmem:[%s10336_s2 + $0x600] sm:$0xf]  ;;  %v5096_v49 = vor.u32 %v6599_v31, %v5095_v30  ;;  %1298 = vmatpush.bf16.msra.mxu3 %v4728_v44  ;;  %v6453_v40 = vld [vmem:[%s10336_s2 + $0x164] sm:$0xf] }
  0x24   :  { %v6603_v38 = vld [vmem:[%s10336_s2 + $0x60c] sm:$0xf0]  ;;  %v38_v42 = vld [vmem:[%s10337_s0] sm:$0xff]  ;;  %v7270_v54 = vpack.c.bf16 %v47_v36, %v40_v34  ;;  %1305 = vmatpush.bf16.msrb.mxu0 %v4968_v45  ;;  %v4393_v35 = vld [vmem:[%s10336_s2 + $0x70] sm:$0xf0] }
  0x25   :  { %v48_v48 = vld [vmem:[%s10337_s0 + $0x50] sm:$0xff]  ;;  %v4951_v51 = vld [vmem:[%s10336_s2 + $0x4c0] sm:$0xf]  ;;  %v7272_v55 = vpack.c.bf16 %v45_v43, %v38_v42  ;;  %v5112_v59 = vor.u32 %v6603_v38, %v5111_v37  ;;  %1319 = vmatpush.bf16.msrb.mxu1 %v5096_v49  ;;  %v6421_v34 = vld [vmem:[%s10336_s2 + $0x64] sm:$0xf]  ;;  %v4540_v38 = vor.u32 %v6457_v26, %v4537_v27 }
  0x26   :  { %v6563_v52 = vld [vmem:[%s10336_s2 + $0x4cc] sm:$0xf0]  ;;  %v5079_v53 = vld [vmem:[%s10336_s2 + $0x5c0] sm:$0xf]  ;;  %v7283_v60 = vpack.c.bf16 %v48_v48, %v41_v47  ;;  %1285 = vmatmul.bf16.vlgmr.msra.gmra.mxu2 %v7270_v54  ;;  %v51_v37 = vld [vmem:[%s10337_s0 + $0x68] sm:$0xff]  ;;  %v4396_v43 = vor.u32 %v6421_v34, %v4393_v35 }
  0x27   :  { %v6595_v56 = vld [vmem:[%s10336_s2 + $0x5cc] sm:$0xf0]  ;;  %v46_v62 = vld [vmem:[%s10337_s0 + $0x40] sm:$0xff]  ;;  %v4952_v0 = vor.u32 %v6563_v52, %v4951_v51  ;;  %1347 = vmatpush.bf16.msrb.mxu3 %v4460_v50  ;;  %1257 = vmatmul.bf16.vlgmr.msra.gmra.mxu0 %v7272_v55  ;;  %v4377_v49 = vld [vmem:[%s10336_s2 + $0x50] sm:$0xf0]  ;;  %v4524_v51 = vor.u32 %v6453_v40, %v4521_v41 }
  0x28   :  { %v5080_v3 = vor.u32 %v6595_v56, %v5079_v53  ;;  %v4935_v5 = vld [vmem:[%s10336_s2 + $0x4a0] sm:$0xf]  ;;  %v6559_v6 = vld [vmem:[%s10336_s2 + $0x4ac] sm:$0xf0]  ;;  %v7308_v8 = vpack.c.bf16 %v46_v62, %v39_v61  ;;  %1340 = vmatpush.bf16.msrb.mxu2 %v5112_v59  ;;  %1299 = vmatmul.bf16.vlgmr.msra.gmra.mxu3 %v7283_v60  ;;  %v6417_v48 = vld [vmem:[%s10336_s2 + $0x44] sm:$0xf] }
  0x29   :  { %v5063_v7 = vld [vmem:[%s10336_s2 + $0x5a0] sm:$0xf]  ;;  %v6591_v9 = vld [vmem:[%s10336_s2 + $0x5ac] sm:$0xf0]  ;;  %1306 = vmatpush.bf16.msrb.mxu0 %v4952_v0  ;;  %v4936_v13 = vor.u32 %v6559_v6, %v4935_v5  ;;  %v6449_v53 = vld [vmem:[%s10336_s2 + $0x144] sm:$0xf]  ;;  %v4380_v58 = vor.u32 %v6417_v48, %v4377_v49 }
  0x2a   :  { %1320 = vmatpush.bf16.msrb.mxu1 %v5080_v3  ;;  %v5064_v16 = vor.u32 %v6591_v9, %v5063_v7  ;;  %v4919_v18 = vld [vmem:[%s10336_s2 + $0x480] sm:$0xf]  ;;  %v6555_v19 = vld [vmem:[%s10336_s2 + $0x48c] sm:$0xf0]  ;;  %v4505_v56 = vld [vmem:[%s10336_s2 + $0x150] sm:$0xf0] }
  0x2b   :  { %1348 = vmatpush.bf16.msrb.mxu3 %v4444_v4  ;;  %v5047_v20 = vld [vmem:[%s10336_s2 + $0x580] sm:$0xf]  ;;  %1271 = vmatmul.bf16.vlgmr.msra.gmra.mxu1 %v7308_v8  ;;  %v6587_v21 = vld [vmem:[%s10336_s2 + $0x58c] sm:$0xf0]  ;;  %v4920_v25 = vor.u32 %v6555_v19, %v4919_v18  ;;  %v6413_v0 = vld [vmem:[%s10336_s2 + $0x24] sm:$0xf]  ;;  %v4508_v4 = vor.u32 %v6449_v53, %v4505_v56 }
  0x2c   :  { %1361 = vmatpush.bf16.msra.mxu2 %v4588_v63  ;;  %v5048_v28 = vor.u32 %v6587_v21, %v5047_v20  ;;  %v4903_v30 = vld [vmem:[%s10336_s2 + $0x460] sm:$0xf]  ;;  %v6551_v31 = vld [vmem:[%s10336_s2 + $0x46c] sm:$0xf0]  ;;  %v4361_v1 = vld [vmem:[%s10336_s2 + $0x30] sm:$0xf0] }
  0x2d   :  { %1307 = vmatpush.bf16.msrb.mxu0 %v4936_v13  ;;  %v5031_v32 = vld [vmem:[%s10336_s2 + $0x560] sm:$0xf]  ;;  %v6583_v33 = vld [vmem:[%s10336_s2 + $0x56c] sm:$0xf0]  ;;  %v4904_v39 = vor.u32 %v6551_v31, %v4903_v30  ;;  %v6445_v2 = vld [vmem:[%s10336_s2 + $0x124] sm:$0xf]  ;;  %v4364_v11 = vor.u32 %v6413_v0, %v4361_v1 }
  0x2e   :  { %1321 = vmatpush.bf16.msrb.mxu1 %v5064_v16  ;;  %v44_v36 = vld [vmem:[%s10337_s0 + $0x30] sm:$0xff]  ;;  %v5032_v42 = vor.u32 %v6583_v33, %v5031_v32  ;;  %v4887_v44 = vld [vmem:[%s10336_s2 + $0x440] sm:$0xf]  ;;  %v6409_v13 = vld [vmem:[%s10336_s2 + $0x4] sm:$0xf] }
  0x2f   :  { %1349 = vmatpush.bf16.msrb.mxu3 %v4428_v17  ;;  %v6547_v45 = vld [vmem:[%s10336_s2 + $0x44c] sm:$0xf0]  ;;  %v5015_v46 = vld [vmem:[%s10336_s2 + $0x540] sm:$0xf]  ;;  %v7399_v50 = vpack.c.bf16 %v51_v37, %v44_v36  ;;  %v4489_v3 = vld [vmem:[%s10336_s2 + $0x130] sm:$0xf0] }
  0x30   :  { %1362 = vmatpush.bf16.msra.mxu2 %v4572_v12  ;;  %v6579_v47 = vld [vmem:[%s10336_s2 + $0x54c] sm:$0xf0]  ;;  %v4888_v52 = vor.u32 %v6547_v45, %v4887_v44  ;;  %v4871_v59 = vld [vmem:[%s10336_s2 + $0x420] sm:$0xf]  ;;  %v4345_v14 = vld [vmem:[%s10336_s2 + $0x10] sm:$0xf0]  ;;  %v4492_v21 = vor.u32 %v6445_v2, %v4489_v3 }
  0x31   :  { %1308 = vmatpush.bf16.msrb.mxu0 %v4920_v25  ;;  %v5016_v57 = vor.u32 %v6579_v47, %v5015_v46  ;;  %v6543_v61 = vld [vmem:[%s10336_s2 + $0x42c] sm:$0xf0]  ;;  %v4999_v62 = vld [vmem:[%s10336_s2 + $0x520] sm:$0xf]  ;;  %v6501_v15 = vld [vmem:[%s10336_s2 + $0x2e4] sm:$0xf]  ;;  %v4348_v27 = vor.u32 %v6409_v13, %v4345_v14 }
  0x32   :  { %1322 = vmatpush.bf16.msrb.mxu1 %v5048_v28  ;;  %v6575_v63 = vld [vmem:[%s10336_s2 + $0x52c] sm:$0xf0]  ;;  %v4872_v5 = vor.u32 %v6543_v61, %v4871_v59  ;;  %v4855_v6 = vld [vmem:[%s10336_s2 + $0x400] sm:$0xf]  ;;  %v4713_v16 = vld [vmem:[%s10336_s2 + $0x2f0] sm:$0xf0] }
  0x33   :  { %1350 = vmatpush.bf16.msrb.mxu3 %v4412_v29  ;;  %v6539_v7 = vld [vmem:[%s10336_s2 + $0x40c] sm:$0xf0]  ;;  %v4983_v9 = vld [vmem:[%s10336_s2 + $0x500] sm:$0xf]  ;;  %v5000_v10 = vor.u32 %v6575_v63, %v4999_v62  ;;  %v6533_v17 = vld [vmem:[%s10336_s2 + $0x3e4] sm:$0xf]  ;;  %v4716_v31 = vor.u32 %v6501_v15, %v4713_v16 }
  0x34   :  { %1363 = vmatpush.bf16.msra.mxu2 %v4556_v24  ;;  %v6571_v12 = vld [vmem:[%s10336_s2 + $0x50c] sm:$0xf0]  ;;  %v4841_v18 = vld [vmem:[%s10336_s2 + $0x3f0] sm:$0xf0]  ;;  %v6565_v19 = vld [vmem:[%s10336_s2 + $0x4e4] sm:$0xf]  ;;  %v4856_v22 = vor.u32 %v6539_v7, %v4855_v6 }
  0x35   :  { %1309 = vmatpush.bf16.msrb.mxu0 %v4904_v39  ;;  %v4969_v20 = vld [vmem:[%s10336_s2 + $0x4f0] sm:$0xf0]  ;;  %v42_v23 = vld [vmem:[%s10337_s0 + $0x20] sm:$0xff]  ;;  %v49_v24 = vld [vmem:[%s10337_s0 + $0x58] sm:$0xff]  ;;  %v4984_v26 = vor.u32 %v6571_v12, %v4983_v9  ;;  %v4844_v32 = vor.u32 %v6533_v17, %v4841_v18 }
  0x36   :  { %1323 = vmatpush.bf16.msrb.mxu1 %v5032_v42  ;;  %5125 = vmatmul.msk.bf16.vlgmr.msrb.gmra.mxu2 %vm1245_vm0, %v7399_v50  ;;  %v6441_v25 = vld [vmem:[%s10336_s2 + $0x104] sm:$0xf]  ;;  %v4473_v28 = vld [vmem:[%s10336_s2 + $0x110] sm:$0xf0]  ;;  %v43_v29 = vld [vmem:[%s10337_s0 + $0x28] sm:$0xff]  ;;  %v4972_v36 = vor.u32 %v6565_v19, %v4969_v20  ;;  %v7496_v37 = vpack.c.bf16 %v49_v24, %v42_v23 }
  0x37   :  { %1351 = vmatpush.bf16.msrb.mxu3 %v4396_v43  ;;  %v50_v30 = vld [vmem:[%s10337_s0 + $0x60] sm:$0xff]  ;;  %v5097_v34 = vld [vmem:[%s10336_s2 + $0x5f0] sm:$0xf0]  ;;  %v4476_v41 = vor.u32 %v6441_v25, %v4473_v28 }
  0x38   :  { %1364 = vmatpush.bf16.msra.mxu2 %v4540_v38  ;;  %v6597_v33 = vld [vmem:[%s10336_s2 + $0x5e4] sm:$0xf]  ;;  %v4697_v38 = vld [vmem:[%s10336_s2 + $0x2d0] sm:$0xf0]  ;;  %v7507_v42 = vpack.c.bf16 %v50_v30, %v43_v29 }
  0x39   :  { %1310 = vmatpush.bf16.msrb.mxu0 %v4888_v52  ;;  %v6497_v35 = vld [vmem:[%s10336_s2 + $0x2c4] sm:$0xf]  ;;  %v4825_v40 = vld [vmem:[%s10336_s2 + $0x3d0] sm:$0xf0]  ;;  %v5100_v45 = vor.u32 %v6597_v33, %v5097_v34 }
  0x3a   :  { %1324 = vmatpush.bf16.msrb.mxu1 %v5016_v57  ;;  %v6529_v39 = vld [vmem:[%s10336_s2 + $0x3c4] sm:$0xf]  ;;  %v4953_v44 = vld [vmem:[%s10336_s2 + $0x4d0] sm:$0xf0]  ;;  %v4700_v46 = vor.u32 %v6497_v35, %v4697_v38 }
  0x3b   :  { %1352 = vmatpush.bf16.msrb.mxu3 %v4380_v58  ;;  %v6561_v43 = vld [vmem:[%s10336_s2 + $0x4c4] sm:$0xf]  ;;  %v4828_v47 = vor.u32 %v6529_v39, %v4825_v40  ;;  %v5081_v49 = vld [vmem:[%s10336_s2 + $0x5d0] sm:$0xf0] }
  0x3c   :  { %1365 = vmatpush.bf16.msra.mxu2 %v4524_v51  ;;  %v6593_v48 = vld [vmem:[%s10336_s2 + $0x5c4] sm:$0xf]  ;;  %v4956_v52 = vor.u32 %v6561_v43, %v4953_v44  ;;  %v4681_v53 = vld [vmem:[%s10336_s2 + $0x2b0] sm:$0xf0] }
  0x3d   :  { %1311 = vmatpush.bf16.msrb.mxu0 %v4872_v5  ;;  %v6493_v51 = vld [vmem:[%s10336_s2 + $0x2a4] sm:$0xf]  ;;  %v4809_v57 = vld [vmem:[%s10336_s2 + $0x3b0] sm:$0xf0]  ;;  %v5084_v61 = vor.u32 %v6593_v48, %v5081_v49 }
  0x3e   :  { %1325 = vmatpush.bf16.msrb.mxu1 %v5000_v10  ;;  %v6525_v56 = vld [vmem:[%s10336_s2 + $0x3a4] sm:$0xf]  ;;  %v4937_v59 = vld [vmem:[%s10336_s2 + $0x4b0] sm:$0xf0]  ;;  %v4684_v62 = vor.u32 %v6493_v51, %v4681_v53 }
  0x3f   :  { %1353 = vmatpush.bf16.msrb.mxu3 %v4364_v11  ;;  %v6557_v58 = vld [vmem:[%s10336_s2 + $0x4a4] sm:$0xf]  ;;  %v4812_v63 = vor.u32 %v6525_v56, %v4809_v57  ;;  %v5065_v1 = vld [vmem:[%s10336_s2 + $0x5b0] sm:$0xf0] }
  0x40   :  { %1366 = vmatpush.bf16.msra.mxu2 %v4508_v4  ;;  %v6589_v0 = vld [vmem:[%s10336_s2 + $0x5a4] sm:$0xf]  ;;  %v4940_v3 = vor.u32 %v6557_v58, %v4937_v59  ;;  %v4665_v4 = vld [vmem:[%s10336_s2 + $0x290] sm:$0xf0] }
  0x41   :  { %1312 = vmatpush.bf16.msrb.mxu0 %v4856_v22  ;;  %v6489_v2 = vld [vmem:[%s10336_s2 + $0x284] sm:$0xf]  ;;  %v4793_v6 = vld [vmem:[%s10336_s2 + $0x390] sm:$0xf0]  ;;  %v5068_v10 = vor.u32 %v6589_v0, %v5065_v1  ;;  %v4463_v0 = vld [vmem:[%s10336_s2 + $0xe8] sm:$0xf] }
  0x42   :  { %1326 = vmatpush.bf16.msrb.mxu1 %v4984_v26  ;;  %v6521_v5 = vld [vmem:[%s10336_s2 + $0x384] sm:$0xf]  ;;  %v4921_v9 = vld [vmem:[%s10336_s2 + $0x490] sm:$0xf0]  ;;  %v4668_v11 = vor.u32 %v6489_v2, %v4665_v4  ;;  %v6440_v1 = vld [vmem:[%s10336_s2 + $0xf4] sm:$0xf0] }
  0x43   :  { %1354 = vmatpush.bf16.msrb.mxu3 %v4348_v27  ;;  %v6553_v7 = vld [vmem:[%s10336_s2 + $0x484] sm:$0xf]  ;;  %v4796_v12 = vor.u32 %v6521_v5, %v4793_v6  ;;  %v5049_v14 = vld [vmem:[%s10336_s2 + $0x590] sm:$0xf0]  ;;  %v4719_v5 = vld [vmem:[%s10336_s2 + $0x2e8] sm:$0xf] }
  0x44   :  { %1367 = vmatpush.bf16.msra.mxu2 %v4492_v21  ;;  %1313 = vmatmul.bf16.vlgmr.msrb.gmra.mxu0 %v7496_v37  ;;  %v6585_v13 = vld [vmem:[%s10336_s2 + $0x584] sm:$0xf]  ;;  %v4924_v16 = vor.u32 %v6553_v7, %v4921_v9  ;;  %v4649_v17 = vld [vmem:[%s10336_s2 + $0x270] sm:$0xf0]  ;;  %v6504_v6 = vld [vmem:[%s10336_s2 + $0x2f4] sm:$0xf0] }
  0x45   :  { %1375 = vmatpush.bf16.msra.mxu0 %v4716_v31  ;;  %1327 = vmatmul.bf16.vlgmr.msrb.gmra.mxu1 %v7507_v42  ;;  %v6485_v15 = vld [vmem:[%s10336_s2 + $0x264] sm:$0xf]  ;;  %v4777_v19 = vld [vmem:[%s10336_s2 + $0x370] sm:$0xf0]  ;;  %v5052_v22 = vor.u32 %v6585_v13, %v5049_v14  ;;  %v4464_v13 = vor.u32 %v6440_v1, %v4463_v0  ;;  %v4847_v14 = vld [vmem:[%s10336_s2 + $0x3e8] sm:$0xf] }
  0x46   :  { %1389 = vmatpush.bf16.msra.mxu1 %v4844_v32  ;;  %1355 = vmatmul.bf16.vlgmr.msrb.gmra.mxu3 %v7272_v55  ;;  %v6517_v18 = vld [vmem:[%s10336_s2 + $0x364] sm:$0xf]  ;;  %v4905_v21 = vld [vmem:[%s10336_s2 + $0x470] sm:$0xf0]  ;;  %v4652_v23 = vor.u32 %v6485_v15, %v4649_v17  ;;  %v6536_v15 = vld [vmem:[%s10336_s2 + $0x3f4] sm:$0xf0] }
  0x47   :  { %1403 = vmatpush.bf16.msra.mxu3 %v4972_v36  ;;  %v6549_v20 = vld [vmem:[%s10336_s2 + $0x464] sm:$0xf]  ;;  %v4780_v24 = vor.u32 %v6517_v18, %v4777_v19  ;;  %v5033_v26 = vld [vmem:[%s10336_s2 + $0x570] sm:$0xf0]  ;;  %v4591_v17 = vld [vmem:[%s10336_s2 + $0x1e8] sm:$0xf]  ;;  %v4720_v19 = vor.u32 %v6504_v6, %v4719_v5 }
  0x48   :  { %1368 = vmatpush.bf16.msra.mxu2 %v4476_v41  ;;  %v6581_v25 = vld [vmem:[%s10336_s2 + $0x564] sm:$0xf]  ;;  %v4908_v28 = vor.u32 %v6549_v20, %v4905_v21  ;;  %v4633_v29 = vld [vmem:[%s10336_s2 + $0x250] sm:$0xf0]  ;;  %v6472_v18 = vld [vmem:[%s10336_s2 + $0x1f4] sm:$0xf0] }
  0x49   :  { %1376 = vmatpush.bf16.msra.mxu0 %v4700_v46  ;;  %v6481_v27 = vld [vmem:[%s10336_s2 + $0x244] sm:$0xf]  ;;  %v4761_v31 = vld [vmem:[%s10336_s2 + $0x350] sm:$0xf0]  ;;  %v5036_v34 = vor.u32 %v6581_v25, %v5033_v26  ;;  %v4447_v21 = vld [vmem:[%s10336_s2 + $0xc8] sm:$0xf]  ;;  %v4592_v26 = vor.u32 %v6472_v18, %v4591_v17 }
  0x4a   :  { %1390 = vmatpush.bf16.msra.mxu1 %v4828_v47  ;;  %v6513_v30 = vld [vmem:[%s10336_s2 + $0x344] sm:$0xf]  ;;  %v4889_v33 = vld [vmem:[%s10336_s2 + $0x450] sm:$0xf0]  ;;  %v4636_v35 = vor.u32 %v6481_v27, %v4633_v29  ;;  %v6500_v25 = vld [vmem:[%s10336_s2 + $0x2d4] sm:$0xf0] }
  0x4b   :  { %1404 = vmatpush.bf16.msra.mxu3 %v4956_v52  ;;  %1369 = vmatmul.bf16.vlgmr.msra.gmra.mxu2 %v7308_v8  ;;  %v6545_v32 = vld [vmem:[%s10336_s2 + $0x444] sm:$0xf]  ;;  %v4764_v36 = vor.u32 %v6513_v30, %v4761_v31  ;;  %v5017_v39 = vld [vmem:[%s10336_s2 + $0x550] sm:$0xf0]  ;;  %v4831_v27 = vld [vmem:[%s10336_s2 + $0x3c8] sm:$0xf] }
  0x4c   :  { %1417 = vmatpush.bf16.msrb.mxu2 %v5100_v45  ;;  %v6577_v38 = vld [vmem:[%s10336_s2 + $0x544] sm:$0xf]  ;;  %v4892_v41 = vor.u32 %v6545_v32, %v4889_v33  ;;  %v4617_v43 = vld [vmem:[%s10336_s2 + $0x230] sm:$0xf0]  ;;  %v4575_v30 = vld [vmem:[%s10336_s2 + $0x1c8] sm:$0xf] }
  0x4d   :  { %1377 = vmatpush.bf16.msra.mxu0 %v4684_v62  ;;  %v6477_v40 = vld [vmem:[%s10336_s2 + $0x224] sm:$0xf]  ;;  %v4745_v45 = vld [vmem:[%s10336_s2 + $0x330] sm:$0xf0]  ;;  %v5020_v48 = vor.u32 %v6577_v38, %v5017_v39  ;;  %v6468_v31 = vld [vmem:[%s10336_s2 + $0x1d4] sm:$0xf0] }
  0x4e   :  { %1391 = vmatpush.bf16.msra.mxu1 %v4812_v63  ;;  %v6509_v44 = vld [vmem:[%s10336_s2 + $0x324] sm:$0xf]  ;;  %v4873_v47 = vld [vmem:[%s10336_s2 + $0x430] sm:$0xf0]  ;;  %v4620_v52 = vor.u32 %v6477_v40, %v4617_v43  ;;  %v4431_v33 = vld [vmem:[%s10336_s2 + $0xa8] sm:$0xf]  ;;  %v4576_v39 = vor.u32 %v6468_v31, %v4575_v30 }
  0x4f   :  { %1405 = vmatpush.bf16.msra.mxu3 %v4940_v3  ;;  %v6541_v46 = vld [vmem:[%s10336_s2 + $0x424] sm:$0xf]  ;;  %v5001_v51 = vld [vmem:[%s10336_s2 + $0x530] sm:$0xf0]  ;;  %v4748_v53 = vor.u32 %v6509_v44, %v4745_v45  ;;  %v6496_v38 = vld [vmem:[%s10336_s2 + $0x2b4] sm:$0xf0] }
  0x50   :  { %1418 = vmatpush.bf16.msrb.mxu2 %v5084_v61  ;;  %v6573_v49 = vld [vmem:[%s10336_s2 + $0x524] sm:$0xf]  ;;  %v4601_v57 = vld [vmem:[%s10336_s2 + $0x210] sm:$0xf0]  ;;  %v4876_v59 = vor.u32 %v6541_v46, %v4873_v47  ;;  %v4815_v40 = vld [vmem:[%s10336_s2 + $0x3a8] sm:$0xf] }
  0x51   :  { %1378 = vmatpush.bf16.msra.mxu0 %v4668_v11  ;;  %v6473_v56 = vld [vmem:[%s10336_s2 + $0x204] sm:$0xf]  ;;  %v4729_v61 = vld [vmem:[%s10336_s2 + $0x310] sm:$0xf0]  ;;  %v5004_v3 = vor.u32 %v6573_v49, %v5001_v51  ;;  %v4559_v44 = vld [vmem:[%s10336_s2 + $0x1a8] sm:$0xf] }
  0x52   :  { %1392 = vmatpush.bf16.msra.mxu1 %v4796_v12  ;;  %v6505_v58 = vld [vmem:[%s10336_s2 + $0x304] sm:$0xf]  ;;  %v4857_v63 = vld [vmem:[%s10336_s2 + $0x410] sm:$0xf0]  ;;  %v4604_v7 = vor.u32 %v6473_v56, %v4601_v57  ;;  %v6464_v45 = vld [vmem:[%s10336_s2 + $0x1b4] sm:$0xf0] }
  0x53   :  { %1406 = vmatpush.bf16.msra.mxu3 %v4924_v16  ;;  %v6537_v62 = vld [vmem:[%s10336_s2 + $0x404] sm:$0xf]  ;;  %v5113_v4 = vld [vmem:[%s10336_s2 + $0x610] sm:$0xf0]  ;;  %v4732_v9 = vor.u32 %v6505_v58, %v4729_v61  ;;  %v4415_v47 = vld [vmem:[%s10336_s2 + $0x88] sm:$0xf] }
  0x54   :  { %1419 = vmatpush.bf16.msrb.mxu2 %v5068_v10  ;;  %v6601_v2 = vld [vmem:[%s10336_s2 + $0x604] sm:$0xf]  ;;  %v4985_v11 = vld [vmem:[%s10336_s2 + $0x510] sm:$0xf0]  ;;  %v4860_v12 = vor.u32 %v6537_v62, %v4857_v63  ;;  %v4671_v51 = vld [vmem:[%s10336_s2 + $0x288] sm:$0xf] }
  0x55   :  { %1379 = vmatpush.bf16.msra.mxu0 %v4652_v23  ;;  %v6569_v10 = vld [vmem:[%s10336_s2 + $0x504] sm:$0xf]  ;;  %v5116_v16 = vor.u32 %v6601_v2, %v5113_v4  ;;  %v4848_v23 = vor.u32 %v6536_v15, %v4847_v14  ;;  %v4799_v56 = vld [vmem:[%s10336_s2 + $0x388] sm:$0xf]  ;;  %v6524_v57 = vld [vmem:[%s10336_s2 + $0x394] sm:$0xf0] }
  0x56   :  { %1393 = vmatpush.bf16.msra.mxu1 %v4780_v24  ;;  %v4988_v20 = vor.u32 %v6569_v10, %v4985_v11  ;;  %v4703_v24 = vld [vmem:[%s10336_s2 + $0x2c8] sm:$0xf]  ;;  %v6460_v61 = vld [vmem:[%s10336_s2 + $0x194] sm:$0xf0]  ;;  %v4800_v1 = vor.u32 %v6524_v57, %v4799_v56  ;;  %v6438_v56 = vld [vmem:[%s10336_s2 + $0xec] sm:$0xf] }
  0x57   :  { %1407 = vmatpush.bf16.msra.mxu3 %v4908_v28  ;;  %v6532_v28 = vld [vmem:[%s10336_s2 + $0x3d4] sm:$0xf0]  ;;  %v4704_v32 = vor.u32 %v6500_v25, %v4703_v24  ;;  %v4399_v63 = vld [vmem:[%s10336_s2 + $0x68] sm:$0xf]  ;;  %v4465_v57 = vld [vmem:[%s10336_s2 + $0xf8] sm:$0xf0] }
  0x58   :  { %1420 = vmatpush.bf16.msrb.mxu2 %v5052_v22  ;;  %v6436_v22 = vld [vmem:[%s10336_s2 + $0xd4] sm:$0xf0]  ;;  %v4655_v2 = vld [vmem:[%s10336_s2 + $0x268] sm:$0xf] }
  0x59   :  { %1380 = vmatpush.bf16.msra.mxu0 %v4636_v35  ;;  %v4448_v29 = vor.u32 %v6436_v22, %v4447_v21  ;;  %v4832_v35 = vor.u32 %v6532_v28, %v4831_v27  ;;  %v6424_v0 = vld [vmem:[%s10336_s2 + $0x74] sm:$0xf0]  ;;  %v4783_v5 = vld [vmem:[%s10336_s2 + $0x368] sm:$0xf] }
  0x5a   :  { %1394 = vmatpush.bf16.msra.mxu1 %v4764_v36  ;;  %v4687_v36 = vld [vmem:[%s10336_s2 + $0x2a8] sm:$0xf]  ;;  %v6520_v6 = vld [vmem:[%s10336_s2 + $0x374] sm:$0xf0] }
  0x5b   :  { %1408 = vmatpush.bf16.msra.mxu3 %v4892_v41  ;;  %v6528_v41 = vld [vmem:[%s10336_s2 + $0x3b4] sm:$0xf0]  ;;  %v4688_v46 = vor.u32 %v6496_v38, %v4687_v36  ;;  %v4784_v14 = vor.u32 %v6520_v6, %v4783_v5  ;;  %v4639_v15 = vld [vmem:[%s10336_s2 + $0x248] sm:$0xf]  ;;  %v4468_v6 = vor.u32 %v6438_v56, %v4465_v57 }
  0x5c   :  { %1421 = vmatpush.bf16.msrb.mxu2 %v5036_v34  ;;  %v6432_v34 = vld [vmem:[%s10336_s2 + $0xb4] sm:$0xf0]  ;;  %v4816_v49 = vor.u32 %v6528_v41, %v4815_v40  ;;  %v4767_v18 = vld [vmem:[%s10336_s2 + $0x348] sm:$0xf] }
  0x5d   :  { %1381 = vmatpush.bf16.msra.mxu0 %v4620_v52  ;;  %v4432_v43 = vor.u32 %v6432_v34, %v4431_v33  ;;  %v6492_v52 = vld [vmem:[%s10336_s2 + $0x294] sm:$0xf0]  ;;  %v4511_v21 = vld [vmem:[%s10336_s2 + $0x148] sm:$0xf] }
  0x5e   :  { %1395 = vmatpush.bf16.msra.mxu1 %v4748_v53  ;;  %v4560_v53 = vor.u32 %v6464_v45, %v4559_v44  ;;  %v4672_v62 = vor.u32 %v6492_v52, %v4671_v51  ;;  %v6456_v10 = vld [vmem:[%s10336_s2 + $0x174] sm:$0xf0]  ;;  %v4367_v24 = vld [vmem:[%s10336_s2 + $0x28] sm:$0xf] }
  0x5f   :  { %1409 = vmatpush.bf16.msra.mxu3 %v4876_v59  ;;  %v4543_v59 = vld [vmem:[%s10336_s2 + $0x188] sm:$0xf]  ;;  %v6452_v22 = vld [vmem:[%s10336_s2 + $0x154] sm:$0xf0] }
  0x60   :  { %1422 = vmatpush.bf16.msrb.mxu2 %v5020_v48  ;;  %v6428_v48 = vld [vmem:[%s10336_s2 + $0x94] sm:$0xf0]  ;;  %v4544_v4 = vor.u32 %v6460_v61, %v4543_v59  ;;  %v4623_v27 = vld [vmem:[%s10336_s2 + $0x228] sm:$0xf] }
  0x61   :  { %1382 = vmatpush.bf16.msra.mxu0 %v4604_v7  ;;  %v4416_v58 = vor.u32 %v6428_v48, %v4415_v47  ;;  %v4400_v7 = vor.u32 %v6424_v0, %v4399_v63  ;;  %v6416_v25 = vld [vmem:[%s10336_s2 + $0x34] sm:$0xf0]  ;;  %v4751_v30 = vld [vmem:[%s10336_s2 + $0x328] sm:$0xf] }
  0x62   :  { %1396 = vmatpush.bf16.msra.mxu1 %v4732_v9  ;;  %v4527_v9 = vld [vmem:[%s10336_s2 + $0x168] sm:$0xf]  ;;  %v6480_v28 = vld [vmem:[%s10336_s2 + $0x234] sm:$0xf0] }
  0x63   :  { %1410 = vmatpush.bf16.msra.mxu3 %v4860_v12  ;;  %v4383_v12 = vld [vmem:[%s10336_s2 + $0x48] sm:$0xf]  ;;  %v4528_v17 = vor.u32 %v6456_v10, %v4527_v9  ;;  %v6512_v31 = vld [vmem:[%s10336_s2 + $0x334] sm:$0xf0]  ;;  %v4624_v36 = vor.u32 %v6480_v28, %v4623_v27  ;;  %v6434_v9 = vld [vmem:[%s10336_s2 + $0xcc] sm:$0xf] }
  0x64   :  { %1423 = vmatpush.bf16.msrb.mxu2 %v5004_v3  ;;  %1383 = vmatmul.bf16.vlgmr.msra.gmra.mxu0 %v7270_v54  ;;  %v6488_v3 = vld [vmem:[%s10336_s2 + $0x274] sm:$0xf0]  ;;  %v4495_v33 = vld [vmem:[%s10336_s2 + $0x128] sm:$0xf]  ;;  %v4752_v41 = vor.u32 %v6512_v31, %v4751_v30  ;;  %v4449_v10 = vld [vmem:[%s10336_s2 + $0xd8] sm:$0xf0] }
  0x65   :  { %1473 = vmatpush.bf16.msrb.mxu0 %v4720_v19  ;;  %1397 = vmatmul.bf16.vlgmr.msra.gmra.mxu1 %v7283_v60  ;;  %v4656_v11 = vor.u32 %v6488_v3, %v4655_v2  ;;  %v6516_v19 = vld [vmem:[%s10336_s2 + $0x354] sm:$0xf0]  ;;  %v4607_v44 = vld [vmem:[%s10336_s2 + $0x208] sm:$0xf]  ;;  %v6470_v3 = vld [vmem:[%s10336_s2 + $0x1ec] sm:$0xf] }
  0x66   :  { %1445 = vmatpush.bf16.msrb.mxu1 %v4464_v13  ;;  %1411 = vmatmul.bf16.vlgmr.msra.gmra.mxu3 %v7496_v37  ;;  %v6420_v13 = vld [vmem:[%s10336_s2 + $0x54] sm:$0xf0]  ;;  %v5103_v61 = vld [vmem:[%s10336_s2 + $0x5e8] sm:$0xf]  ;;  %v4561_v30 = vld [vmem:[%s10336_s2 + $0x1b8] sm:$0xf0] }
  0x67   :  { %1438 = vmatpush.bf16.msrb.mxu3 %v5116_v16  ;;  %v6484_v16 = vld [vmem:[%s10336_s2 + $0x254] sm:$0xf0]  ;;  %v4959_v63 = vld [vmem:[%s10336_s2 + $0x4c8] sm:$0xf] }
  0x68   :  { %1424 = vmatpush.bf16.msrb.mxu2 %v4988_v20  ;;  %v4384_v20 = vor.u32 %v6420_v13, %v4383_v12  ;;  %v6448_v34 = vld [vmem:[%s10336_s2 + $0x134] sm:$0xf0]  ;;  %v5087_v13 = vld [vmem:[%s10336_s2 + $0x5c8] sm:$0xf] }
  0x69   :  { %1474 = vmatpush.bf16.msrb.mxu0 %v4704_v32  ;;  %v4368_v32 = vor.u32 %v6416_v25, %v4367_v24  ;;  %v6412_v38 = vld [vmem:[%s10336_s2 + $0x14] sm:$0xf0]  ;;  %v4496_v47 = vor.u32 %v6448_v34, %v4495_v33  ;;  %v5071_v25 = vld [vmem:[%s10336_s2 + $0x5a8] sm:$0xf]  ;;  %v6426_v33 = vld [vmem:[%s10336_s2 + $0x8c] sm:$0xf] }
  0x6a   :  { %1446 = vmatpush.bf16.msrb.mxu1 %v4448_v29  ;;  %v4512_v29 = vor.u32 %v6452_v22, %v4511_v21  ;;  %v6568_v40 = vld [vmem:[%s10336_s2 + $0x4f4] sm:$0xf0]  ;;  %v6430_v21 = vld [vmem:[%s10336_s2 + $0xac] sm:$0xf]  ;;  %v4433_v22 = vld [vmem:[%s10336_s2 + $0xb8] sm:$0xf0] }
  0x6b   :  { %1459 = vmatpush.bf16.msra.mxu3 %v4592_v26  ;;  %1425 = vmatmul.bf16.vlgmr.msrb.gmra.mxu2 %v7507_v42  ;;  %v4768_v26 = vor.u32 %v6516_v19, %v4767_v18  ;;  %v6476_v45 = vld [vmem:[%s10336_s2 + $0x214] sm:$0xf0]  ;;  %v4577_v18 = vld [vmem:[%s10336_s2 + $0x1d8] sm:$0xf0]  ;;  %v4452_v19 = vor.u32 %v6434_v9, %v4449_v10  ;;  %v4927_v27 = vld [vmem:[%s10336_s2 + $0x488] sm:$0xf]  ;;  %v4436_v31 = vor.u32 %v6430_v21, %v4433_v22 }
  0x6c   :  { %1487 = vmatpush.bf16.msra.mxu2 %v4848_v23  ;;  %v4640_v23 = vor.u32 %v6484_v16, %v4639_v15  ;;  %v6508_v48 = vld [vmem:[%s10336_s2 + $0x314] sm:$0xf0]  ;;  %v4608_v59 = vor.u32 %v6476_v45, %v4607_v44  ;;  %v4943_v15 = vld [vmem:[%s10336_s2 + $0x4a8] sm:$0xf]  ;;  %v4417_v34 = vld [vmem:[%s10336_s2 + $0x98] sm:$0xf0] }
  0x6d   :  { %1475 = vmatpush.bf16.msrb.mxu0 %v4688_v46  ;;  %v4735_v46 = vld [vmem:[%s10336_s2 + $0x308] sm:$0xf]  ;;  %v6604_v51 = vld [vmem:[%s10336_s2 + $0x614] sm:$0xf0]  ;;  %v4545_v44 = vld [vmem:[%s10336_s2 + $0x198] sm:$0xf0]  ;;  %v4420_v45 = vor.u32 %v6426_v33, %v4417_v34 }
  0x6e   :  { %1447 = vmatpush.bf16.msrb.mxu1 %v4432_v43  ;;  %v4479_v43 = vld [vmem:[%s10336_s2 + $0x108] sm:$0xf]  ;;  %v4736_v0 = vor.u32 %v6508_v48, %v4735_v46  ;;  %v6560_v16 = vld [vmem:[%s10336_s2 + $0x4b4] sm:$0xf0]  ;;  %v4401_v48 = vld [vmem:[%s10336_s2 + $0x78] sm:$0xf0] }
  0x6f   :  { %1460 = vmatpush.bf16.msra.mxu3 %v4576_v39  ;;  %v4975_v39 = vld [vmem:[%s10336_s2 + $0x4e8] sm:$0xf]  ;;  %v6556_v28 = vld [vmem:[%s10336_s2 + $0x494] sm:$0xf0]  ;;  %v4513_v9 = vld [vmem:[%s10336_s2 + $0x158] sm:$0xf0] }
  0x70   :  { %1488 = vmatpush.bf16.msra.mxu2 %v4832_v35  ;;  %v4351_v35 = vld [vmem:[%s10336_s2 + $0x8] sm:$0xf]  ;;  %v6548_v57 = vld [vmem:[%s10336_s2 + $0x454] sm:$0xf0]  ;;  %v4497_v21 = vld [vmem:[%s10336_s2 + $0x138] sm:$0xf0] }
  0x71   :  { %1476 = vmatpush.bf16.msrb.mxu0 %v4672_v62  ;;  %v4352_v52 = vor.u32 %v6412_v38, %v4351_v35  ;;  %v6600_v62 = vld [vmem:[%s10336_s2 + $0x5f4] sm:$0xf0]  ;;  %v4928_v35 = vor.u32 %v6556_v28, %v4927_v27  ;;  %v5055_v38 = vld [vmem:[%s10336_s2 + $0x588] sm:$0xf]  ;;  %v6410_v27 = vld [vmem:[%s10336_s2 + $0xc] sm:$0xf] }
  0x72   :  { %1448 = vmatpush.bf16.msrb.mxu1 %v4416_v58  ;;  %v4976_v58 = vor.u32 %v6568_v40, %v4975_v39  ;;  %v6588_v39 = vld [vmem:[%s10336_s2 + $0x594] sm:$0xf0]  ;;  %v4911_v40 = vld [vmem:[%s10336_s2 + $0x468] sm:$0xf]  ;;  %v4353_v28 = vld [vmem:[%s10336_s2 + $0x18] sm:$0xf0] }
  0x73   :  { %1461 = vmatpush.bf16.msra.mxu3 %v4560_v53  ;;  %v6444_v53 = vld [vmem:[%s10336_s2 + $0x114] sm:$0xf0]  ;;  %v5056_v46 = vor.u32 %v6588_v39, %v5055_v38  ;;  %v4895_v56 = vld [vmem:[%s10336_s2 + $0x448] sm:$0xf]  ;;  %v4849_v33 = vld [vmem:[%s10336_s2 + $0x3f8] sm:$0xf0]  ;;  %v4356_v39 = vor.u32 %v6410_v27, %v4353_v28 }
  0x74   :  { %1489 = vmatpush.bf16.msra.mxu2 %v4816_v49  ;;  %v5119_v49 = vld [vmem:[%s10336_s2 + $0x608] sm:$0xf]  ;;  %v4480_v5 = vor.u32 %v6444_v53, %v4479_v43  ;;  %v6458_v43 = vld [vmem:[%s10336_s2 + $0x18c] sm:$0xf]  ;;  %v6584_v53 = vld [vmem:[%s10336_s2 + $0x574] sm:$0xf0] }
  0x75   :  { %1477 = vmatpush.bf16.msrb.mxu0 %v4656_v11  ;;  %v5120_v2 = vor.u32 %v6604_v51, %v5119_v49  ;;  %v4548_v51 = vor.u32 %v6458_v43, %v4545_v44  ;;  %v6498_v38 = vld [vmem:[%s10336_s2 + $0x2cc] sm:$0xf]  ;;  %v4481_v43 = vld [vmem:[%s10336_s2 + $0x118] sm:$0xf0] }
  0x76   :  { %1449 = vmatpush.bf16.msrb.mxu1 %v4400_v7  ;;  %5126 = vmatmul.msk.bf16.vlgmr.msrb.gmra.mxu3 %vm1245_vm0, %v7399_v50  ;;  %v5104_v7 = vor.u32 %v6600_v62, %v5103_v61  ;;  %v4785_v27 = vld [vmem:[%s10336_s2 + $0x378] sm:$0xf0]  ;;  %v6550_v28 = vld [vmem:[%s10336_s2 + $0x46c] sm:$0xf] }
  0x77   :  { %1462 = vmatpush.bf16.msra.mxu3 %v4544_v4  ;;  %v4593_v4 = vld [vmem:[%s10336_s2 + $0x1f8] sm:$0xf0] }
  0x78   :  { %1490 = vmatpush.bf16.msra.mxu2 %v4800_v1  ;;  %v6564_v1 = vld [vmem:[%s10336_s2 + $0x4d4] sm:$0xf0]  ;;  %v4596_v12 = vor.u32 %v6470_v3, %v4593_v4  ;;  %v5023_v3 = vld [vmem:[%s10336_s2 + $0x548] sm:$0xf] }
  0x79   :  { %1478 = vmatpush.bf16.msrb.mxu0 %v4640_v23  ;;  %v4960_v11 = vor.u32 %v6564_v1, %v4959_v63  ;;  %v4944_v23 = vor.u32 %v6560_v16, %v4943_v15  ;;  %v6418_v63 = vld [vmem:[%s10336_s2 + $0x4c] sm:$0xf]  ;;  %v4896_v1 = vor.u32 %v6548_v57, %v4895_v56  ;;  %v6580_v4 = vld [vmem:[%s10336_s2 + $0x554] sm:$0xf0]  ;;  %v5007_v16 = vld [vmem:[%s10336_s2 + $0x528] sm:$0xf] }
  0x7a   :  { %1450 = vmatpush.bf16.msrb.mxu1 %v4384_v20  ;;  %v6562_v56 = vld [vmem:[%s10336_s2 + $0x4cc] sm:$0xf]  ;;  %v4961_v57 = vld [vmem:[%s10336_s2 + $0x4d8] sm:$0xf0] }
  0x7b   :  { %1463 = vmatpush.bf16.msra.mxu3 %v4528_v17  ;;  %v6466_v17 = vld [vmem:[%s10336_s2 + $0x1cc] sm:$0xf] }
  0x7c   :  { %1491 = vmatpush.bf16.msra.mxu2 %v4784_v14  ;;  %v6596_v14 = vld [vmem:[%s10336_s2 + $0x5d4] sm:$0xf0]  ;;  %v4580_v24 = vor.u32 %v6466_v17, %v4577_v18  ;;  %v4863_v18 = vld [vmem:[%s10336_s2 + $0x408] sm:$0xf] }
  0x7d   :  { %1479 = vmatpush.bf16.msrb.mxu0 %v4624_v36  ;;  %v5088_v20 = vor.u32 %v6596_v14, %v5087_v13  ;;  %v4369_v13 = vld [vmem:[%s10336_s2 + $0x38] sm:$0xf0]  ;;  %v6576_v17 = vld [vmem:[%s10336_s2 + $0x534] sm:$0xf0] }
  0x7e   :  { %1451 = vmatpush.bf16.msrb.mxu1 %v4368_v32 }
  0x7f   :  { %1464 = vmatpush.bf16.msra.mxu3 %v4512_v29  ;;  %v6462_v29 = vld [vmem:[%s10336_s2 + $0x1ac] sm:$0xf] }
  0x80   :  { %1492 = vmatpush.bf16.msra.mxu2 %v4768_v26  ;;  %v6592_v26 = vld [vmem:[%s10336_s2 + $0x5b4] sm:$0xf0]  ;;  %v4564_v36 = vor.u32 %v6462_v29, %v4561_v30 }
  0x81   :  { %1480 = vmatpush.bf16.msrb.mxu0 %v4608_v59  ;;  %v5072_v32 = vor.u32 %v6592_v26, %v5071_v25  ;;  %v4529_v59 = vld [vmem:[%s10336_s2 + $0x178] sm:$0xf0]  ;;  %v5008_v25 = vor.u32 %v6576_v17, %v5007_v16  ;;  %v4991_v26 = vld [vmem:[%s10336_s2 + $0x508] sm:$0xf]  ;;  %v6554_v17 = vld [vmem:[%s10336_s2 + $0x48c] sm:$0xf] }
  0x82   :  { %1452 = vmatpush.bf16.msrb.mxu1 %v4352_v52  ;;  %v5039_v52 = vld [vmem:[%s10336_s2 + $0x568] sm:$0xf] }
  0x83   :  { %1465 = vmatpush.bf16.msra.mxu3 %v4496_v47  ;;  %v6422_v47 = vld [vmem:[%s10336_s2 + $0x6c] sm:$0xf]  ;;  %v5040_v62 = vor.u32 %v6584_v53, %v5039_v52  ;;  %v4833_v53 = vld [vmem:[%s10336_s2 + $0x3d8] sm:$0xf0] }
  0x84   :  { %1493 = vmatpush.bf16.msra.mxu2 %v4752_v41  ;;  %1481 = vmatmul.bf16.vlgmr.msrb.gmra.mxu0 %v7270_v54  ;;  %v6552_v41 = vld [vmem:[%s10336_s2 + $0x474] sm:$0xf0]  ;;  %v4404_v61 = vor.u32 %v6422_v47, %v4401_v48 }
  0x85   :  { %1536 = vmatpush.bf16.msra.mxu0 %v5120_v2  ;;  %1453 = vmatmul.bf16.vlgmr.msrb.gmra.mxu1 %v7272_v55  ;;  %v4912_v49 = vor.u32 %v6552_v41, %v4911_v40  ;;  %v4705_v40 = vld [vmem:[%s10336_s2 + $0x2d8] sm:$0xf0]  ;;  %v6442_v41 = vld [vmem:[%s10336_s2 + $0x10c] sm:$0xf] }
  0x86   :  { %1501 = vmatpush.bf16.msra.mxu1 %v4976_v58  ;;  %v6454_v58 = vld [vmem:[%s10336_s2 + $0x16c] sm:$0xf]  ;;  %v4484_v52 = vor.u32 %v6442_v41, %v4481_v43  ;;  %v4897_v43 = vld [vmem:[%s10336_s2 + $0x458] sm:$0xf0] }
  0x87   :  { %1466 = vmatpush.bf16.msra.mxu3 %v4480_v5  ;;  %v4532_v2 = vor.u32 %v6454_v58, %v4529_v59  ;;  %v4879_v5 = vld [vmem:[%s10336_s2 + $0x428] sm:$0xf]  ;;  %v6494_v59 = vld [vmem:[%s10336_s2 + $0x2ac] sm:$0xf] }
  0x88   :  { %1494 = vmatpush.bf16.msra.mxu2 %v4736_v0  ;;  %v4385_v0 = vld [vmem:[%s10336_s2 + $0x58] sm:$0xf0]  ;;  %v6546_v41 = vld [vmem:[%s10336_s2 + $0x44c] sm:$0xf] }
  0x89   :  { %1557 = vmatpush.bf16.msrb.mxu0 %v4596_v12  ;;  %v4388_v10 = vor.u32 %v6418_v63, %v4385_v0  ;;  %v6414_v12 = vld [vmem:[%s10336_s2 + $0x2c] sm:$0xf]  ;;  %v5089_v63 = vld [vmem:[%s10336_s2 + $0x5d8] sm:$0xf0] }
  0x8a   :  { %1502 = vmatpush.bf16.msra.mxu1 %v4960_v11  ;;  %1467 = vmatmul.bf16.vlgmr.msra.gmra.mxu3 %v7308_v8  ;;  %v5024_v11 = vor.u32 %v6580_v4, %v5023_v3  ;;  %v4372_v22 = vor.u32 %v6414_v12, %v4369_v13  ;;  %v4817_v4 = vld [vmem:[%s10336_s2 + $0x3b8] sm:$0xf0] }
  0x8b   :  { %1515 = vmatpush.bf16.msrb.mxu3 %v5104_v7  ;;  %1495 = vmatmul.bf16.vlgmr.msra.gmra.mxu2 %v7283_v60  ;;  %v6450_v7 = vld [vmem:[%s10336_s2 + $0x14c] sm:$0xf]  ;;  %v5073_v12 = vld [vmem:[%s10336_s2 + $0x5b8] sm:$0xf0] }
  0x8c   :  { %1543 = vmatpush.bf16.msrb.mxu2 %v4468_v6  ;;  %v6544_v6 = vld [vmem:[%s10336_s2 + $0x434] sm:$0xf0]  ;;  %v4516_v15 = vor.u32 %v6450_v7, %v4513_v9  ;;  %v6490_v9 = vld [vmem:[%s10336_s2 + $0x28c] sm:$0xf] }
  0x8d   :  { %1558 = vmatpush.bf16.msrb.mxu0 %v4580_v24  ;;  %v4880_v14 = vor.u32 %v6544_v6, %v4879_v5  ;;  %v4721_v24 = vld [vmem:[%s10336_s2 + $0x2f8] sm:$0xf0]  ;;  %v6558_v5 = vld [vmem:[%s10336_s2 + $0x4ac] sm:$0xf] }
  0x8e   :  { %1503 = vmatpush.bf16.msra.mxu1 %v4944_v23  ;;  %v6502_v23 = vld [vmem:[%s10336_s2 + $0x2ec] sm:$0xf]  ;;  %v4945_v6 = vld [vmem:[%s10336_s2 + $0x4b8] sm:$0xf0] }
  0x8f   :  { %1516 = vmatpush.bf16.msrb.mxu3 %v5088_v20  ;;  %v6446_v20 = vld [vmem:[%s10336_s2 + $0x12c] sm:$0xf]  ;;  %v4724_v34 = vor.u32 %v6502_v23, %v4721_v24  ;;  %v5057_v23 = vld [vmem:[%s10336_s2 + $0x598] sm:$0xf0] }
  0x90   :  { %1544 = vmatpush.bf16.msrb.mxu2 %v4452_v19  ;;  %v6540_v19 = vld [vmem:[%s10336_s2 + $0x414] sm:$0xf0]  ;;  %v4500_v30 = vor.u32 %v6446_v20, %v4497_v21  ;;  %v6486_v20 = vld [vmem:[%s10336_s2 + $0x26c] sm:$0xf]  ;;  %v4657_v21 = vld [vmem:[%s10336_s2 + $0x278] sm:$0xf0] }
  0x91   :  { %1559 = vmatpush.bf16.msrb.mxu0 %v4564_v36  ;;  %v4864_v29 = vor.u32 %v6540_v19, %v4863_v18  ;;  %v4977_v36 = vld [vmem:[%s10336_s2 + $0x4f8] sm:$0xf0] }
  0x92   :  { %1504 = vmatpush.bf16.msra.mxu1 %v4928_v35  ;;  %v6566_v35 = vld [vmem:[%s10336_s2 + $0x4ec] sm:$0xf]  ;;  %v4929_v18 = vld [vmem:[%s10336_s2 + $0x498] sm:$0xf0] }
  0x93   :  { %1517 = vmatpush.bf16.msrb.mxu3 %v5072_v32  ;;  %v6534_v32 = vld [vmem:[%s10336_s2 + $0x3ec] sm:$0xf]  ;;  %v4980_v48 = vor.u32 %v6566_v35, %v4977_v36  ;;  %v4932_v24 = vor.u32 %v6554_v17, %v4929_v18  ;;  %v8286_v17 = vld [vmem:[%s10339_s3] sm:$0xf] }
  0x94   :  { %1545 = vmatpush.bf16.msrb.mxu2 %v4436_v31  ;;  %5127 = vmatmul.msk.bf16.vlgmr.msra.gmra.mxu0 %vm1245_vm0, %v7399_v50  ;;  %v6572_v31 = vld [vmem:[%s10336_s2 + $0x514] sm:$0xf0]  ;;  %v4852_v47 = vor.u32 %v6534_v32, %v4849_v33  ;;  %v4641_v32 = vld [vmem:[%s10336_s2 + $0x258] sm:$0xf0]  ;;  %v6582_v33 = vld [vmem:[%s10336_s2 + $0x56c] sm:$0xf] }
  0x95   :  { %1560 = vmatpush.bf16.msrb.mxu0 %v4548_v51  ;;  %v4992_v44 = vor.u32 %v6572_v31, %v4991_v26  ;;  %v4708_v51 = vor.u32 %v6498_v38, %v4705_v40  ;;  %v4660_v26 = vor.u32 %v6486_v20, %v4657_v21  ;;  %v6482_v31 = vld [vmem:[%s10336_s2 + $0x24c] sm:$0xf]  ;;  %v4769_v40 = vld [vmem:[%s10336_s2 + $0x358] sm:$0xf0] }
  0x96   :  { %1505 = vmatpush.bf16.msra.mxu1 %v4912_v49  ;;  %v6530_v49 = vld [vmem:[%s10336_s2 + $0x3cc] sm:$0xf] }
  0x97   :  { %1518 = vmatpush.bf16.msrb.mxu3 %v5056_v46  ;;  %v5105_v46 = vld [vmem:[%s10336_s2 + $0x5f8] sm:$0xf0]  ;;  %v4836_v0 = vor.u32 %v6530_v49, %v4833_v53  ;;  %v6514_v38 = vld [vmem:[%s10336_s2 + $0x34c] sm:$0xf] }
  0x98   :  { %1546 = vmatpush.bf16.msrb.mxu2 %v4420_v45  ;;  %v6598_v45 = vld [vmem:[%s10336_s2 + $0x5ec] sm:$0xf]  ;;  %v4772_v49 = vor.u32 %v6514_v38, %v4769_v40  ;;  %v6616_v38 = vld [vmem:[%s10338_s4 + $0x54] sm:$0xf0] }
  0x99   :  { %1561 = vmatpush.bf16.msrb.mxu0 %v4532_v2  ;;  %v5108_v58 = vor.u32 %v6598_v45, %v5105_v46  ;;  %v6526_v2 = vld [vmem:[%s10336_s2 + $0x3ac] sm:$0xf]  ;;  %v4625_v46 = vld [vmem:[%s10336_s2 + $0x238] sm:$0xf0] }
  0x9a   :  { %1506 = vmatpush.bf16.msra.mxu1 %v4896_v1  ;;  %v4964_v1 = vor.u32 %v6562_v56, %v4961_v57  ;;  %v4820_v13 = vor.u32 %v6526_v2, %v4817_v4  ;;  %v6478_v45 = vld [vmem:[%s10336_s2 + $0x22c] sm:$0xf]  ;;  %v4753_v57 = vld [vmem:[%s10336_s2 + $0x338] sm:$0xf0] }
  0x9b   :  { %1519 = vmatpush.bf16.msrb.mxu3 %v5040_v62  ;;  %v6594_v62 = vld [vmem:[%s10336_s2 + $0x5cc] sm:$0xf]  ;;  %v4628_v56 = vor.u32 %v6478_v45, %v4625_v46  ;;  %v5009_v2 = vld [vmem:[%s10336_s2 + $0x538] sm:$0xf0] }
  0x9c   :  { %1547 = vmatpush.bf16.msrb.mxu2 %v4404_v61  ;;  %v4689_v61 = vld [vmem:[%s10336_s2 + $0x2b8] sm:$0xf0]  ;;  %v5092_v7 = vor.u32 %v6594_v62, %v5089_v63  ;;  %v6474_v63 = vld [vmem:[%s10336_s2 + $0x20c] sm:$0xf] }
  0x9d   :  { %1562 = vmatpush.bf16.msrb.mxu0 %v4516_v15  ;;  %v4692_v3 = vor.u32 %v6494_v59, %v4689_v61  ;;  %v6522_v15 = vld [vmem:[%s10336_s2 + $0x38c] sm:$0xf]  ;;  %v4881_v59 = vld [vmem:[%s10336_s2 + $0x438] sm:$0xf0] }
  0x9e   :  { %1507 = vmatpush.bf16.msra.mxu1 %v4880_v14  ;;  %v4948_v14 = vor.u32 %v6558_v5, %v4945_v6  ;;  %v5121_v4 = vld [vmem:[%s10336_s2 + $0x618] sm:$0xf0]  ;;  %v6570_v18 = vld [vmem:[%s10336_s2 + $0x50c] sm:$0xf] }
  0x9f   :  { %1520 = vmatpush.bf16.msrb.mxu3 %v5024_v11  ;;  %v6590_v11 = vld [vmem:[%s10336_s2 + $0x5ac] sm:$0xf] }
  0xa0   :  { %1548 = vmatpush.bf16.msrb.mxu2 %v4388_v10  ;;  %v4673_v10 = vld [vmem:[%s10336_s2 + $0x298] sm:$0xf0]  ;;  %v5076_v19 = vor.u32 %v6590_v11, %v5073_v12  ;;  %v6538_v12 = vld [vmem:[%s10336_s2 + $0x40c] sm:$0xf] }
  0xa1   :  { %1563 = vmatpush.bf16.msrb.mxu0 %v4500_v30  ;;  %v4676_v16 = vor.u32 %v6490_v9, %v4673_v10  ;;  %v6506_v10 = vld [vmem:[%s10336_s2 + $0x30c] sm:$0xf]  ;;  %v4737_v11 = vld [vmem:[%s10336_s2 + $0x318] sm:$0xf0] }
  0xa2   :  { %1508 = vmatpush.bf16.msra.mxu1 %v4864_v29  ;;  %v4913_v29 = vld [vmem:[%s10336_s2 + $0x478] sm:$0xf0]  ;;  %v4740_v20 = vor.u32 %v6506_v10, %v4737_v11 }
  0xa3   :  { %1521 = vmatpush.bf16.msrb.mxu3 %v5008_v25  ;;  %v6518_v25 = vld [vmem:[%s10336_s2 + $0x36c] sm:$0xf]  ;;  %v4916_v36 = vor.u32 %v6550_v28, %v4913_v29 }
  0xa4   :  { %1549 = vmatpush.bf16.msrb.mxu2 %v4372_v22  ;;  %v6586_v22 = vld [vmem:[%s10336_s2 + $0x58c] sm:$0xf]  ;;  %v4788_v35 = vor.u32 %v6518_v25, %v4785_v27  ;;  %v1258_v53 = vpop.f32.mrf.mxu0  ;;  %v6618_v27 = vld [vmem:[%s10338_s4 + $0x64] sm:$0xf0] }
  0xa5   :  { %1509 = vmatmul.bf16.vlgmr.msra.gmra.mxu1 %v7496_v37  ;;  %1564 = vmatpush.bf16.msrb.mxu0 %v4484_v52  ;;  %v5060_v30 = vor.u32 %v6586_v22, %v5057_v23  ;;  %v6510_v52 = vld [vmem:[%s10336_s2 + $0x32c] sm:$0xf]  ;;  %v5251_v23 = vld [vmem:[%s10338_s4 + $0xf0] sm:$0xf] }
  0xa6   :  { %1571 = vmatpush.bf16.msrb.mxu1 %v4724_v34  ;;  %v5041_v34 = vld [vmem:[%s10336_s2 + $0x578] sm:$0xf0]  ;;  %v4756_v5 = vor.u32 %v6510_v52, %v4753_v57  ;;  %v6630_v52 = vld [vmem:[%s10338_s4 + $0xc4] sm:$0xf0]  ;;  %v5155_v57 = vld [vmem:[%s10338_s4 + $0x30] sm:$0xf] }
  0xa7   :  { %1522 = vmatpush.bf16.msrb.mxu3 %v4992_v44  ;;  %v5044_v44 = vor.u32 %v6582_v33, %v5041_v34  ;;  %v5243_v33 = vld [vmem:[%s10338_s4 + $0xe0] sm:$0xf]  ;;  %v6634_v34 = vld [vmem:[%s10338_s4 + $0xe4] sm:$0xf0] }
  0xa8   :  { %1550 = vmatpush.bf16.msrb.mxu2 %v4356_v39  ;;  %1565 = vmatmul.bf16.vlgmr.msrb.gmra.mxu0 %v7308_v8  ;;  %v4644_v39 = vor.u32 %v6482_v31, %v4641_v32  ;;  %v8243_v61 = vpop.f32.mrf.mxu1 }
  0xa9   :  { %1613 = vmatpush.bf16.msra.mxu0 %v5108_v58  ;;  %v6542_v58 = vld [vmem:[%s10336_s2 + $0x42c] sm:$0xf] }
  0xaa   :  { %1572 = vmatpush.bf16.msrb.mxu1 %v4708_v51  ;;  %1523 = vmatmul.bf16.vlgmr.msrb.gmra.mxu3 %v7507_v42  ;;  %v4900_v51 = vor.u32 %v6546_v41, %v4897_v43  ;;  %v4884_v6 = vor.u32 %v6542_v58, %v4881_v59  ;;  %v5235_v43 = vld [vmem:[%s10338_s4 + $0xd0] sm:$0xf]  ;;  %v6612_v58 = vld [vmem:[%s10338_s4 + $0x34] sm:$0xf0] }
  0xab   :  { %1585 = vmatpush.bf16.msra.mxu3 %v4852_v47  ;;  %1551 = vmatmul.bf16.vlgmr.msrb.gmra.mxu2 %v7272_v55  ;;  %v4801_v55 = vld [vmem:[%s10336_s2 + $0x398] sm:$0xf0]  ;;  %v6578_v47 = vld [vmem:[%s10336_s2 + $0x54c] sm:$0xf]  ;;  %v1300_v31 = vpop.f32.mrf.mxu3 }
  0xac   :  { %1599 = vmatpush.bf16.msra.mxu2 %v4980_v48  ;;  %v4804_v8 = vor.u32 %v6522_v15, %v4801_v55  ;;  %v5025_v48 = vld [vmem:[%s10336_s2 + $0x558] sm:$0xf0]  ;;  %v5187_v15 = vld [vmem:[%s10338_s4 + $0x70] sm:$0xf]  ;;  %v1260_v29 = vpop.f32.mrf.mxu0 }
  0xad   :  { %1614 = vmatpush.bf16.msra.mxu0 %v5092_v7  ;;  %v5028_v62 = vor.u32 %v6578_v47, %v5025_v48  ;;  %v8263_v7 = vpop.f32.mrf.mxu2 }
  0xae   :  { %1573 = vmatpush.bf16.msrb.mxu1 %v4692_v3  ;;  %v6602_v3 = vld [vmem:[%s10336_s2 + $0x60c] sm:$0xf] }
  0xaf   :  { %1586 = vmatpush.bf16.msra.mxu3 %v4836_v0  ;;  %v4609_v0 = vld [vmem:[%s10336_s2 + $0x218] sm:$0xf0]  ;;  %v5124_v55 = vor.u32 %v6602_v3, %v5121_v4  ;;  %v5147_v4 = vld [vmem:[%s10338_s4 + $0x20] sm:$0xf] }
  0xb0   :  { %1600 = vmatpush.bf16.msra.mxu2 %v4964_v1  ;;  %v6574_v1 = vld [vmem:[%s10336_s2 + $0x52c] sm:$0xf]  ;;  %v4612_v9 = vor.u32 %v6474_v63, %v4609_v0  ;;  %v5156_v63 = vor.u32 %v6612_v58, %v5155_v57  ;;  %v5219_v0 = vld [vmem:[%s10338_s4 + $0xb0] sm:$0xf] }
  0xb1   :  { %1615 = vmatpush.bf16.msra.mxu0 %v5076_v19  ;;  %v4993_v19 = vld [vmem:[%s10336_s2 + $0x518] sm:$0xf0] }
  0xb2   :  { %1574 = vmatpush.bf16.msrb.mxu1 %v4676_v16  ;;  %v6620_v16 = vld [vmem:[%s10338_s4 + $0x74] sm:$0xf0]  ;;  %v4996_v25 = vor.u32 %v6570_v18, %v4993_v19 }
  0xb3   :  { %1587 = vmatpush.bf16.msra.mxu3 %v4820_v13  ;;  %v5012_v13 = vor.u32 %v6574_v1, %v5009_v2  ;;  %v5188_v22 = vor.u32 %v6620_v16, %v5187_v15  ;;  %v6628_v1 = vld [vmem:[%s10338_s4 + $0xb4] sm:$0xf0]  ;;  %v5139_v16 = vld [vmem:[%s10338_s4 + $0x10] sm:$0xf] }
  0xb4   :  { %1601 = vmatpush.bf16.msra.mxu2 %v4948_v14  ;;  %v4865_v14 = vld [vmem:[%s10336_s2 + $0x418] sm:$0xf0] }
  0xb5   :  { %1616 = vmatpush.bf16.msra.mxu0 %v5060_v30  ;;  %v4868_v21 = vor.u32 %v6538_v12, %v4865_v14  ;;  %v1274_v30 = vpop.f32.mrf.mxu1  ;;  %v1288_v40 = vpop.f32.mrf.mxu2  ;;  %v6626_v14 = vld [vmem:[%s10338_s4 + $0xa4] sm:$0xf0] }
  0xb6   :  { %1575 = vmatpush.bf16.msrb.mxu1 %v4660_v26  ;;  %v5179_v26 = vld [vmem:[%s10338_s4 + $0x60] sm:$0xf] }
  0xb7   :  { %1588 = vmatpush.bf16.msra.mxu3 %v4804_v8  ;;  %v6636_v8 = vld [vmem:[%s10338_s4 + $0xf4] sm:$0xf0]  ;;  %v5180_v32 = vor.u32 %v6618_v27, %v5179_v26  ;;  %v6619_v26 = vld [vmem:[%s10338_s4 + $0x74] sm:$0xf]  ;;  %v5189_v27 = vld [vmem:[%s10338_s4 + $0x78] sm:$0xf0] }
  0xb8   :  { %1602 = vmatpush.bf16.msra.mxu2 %v4932_v24  ;;  %v257_v24 = vperm.slane %v8286_v17, 0  ;;  %v5252_v28 = vor.u32 %v6636_v8, %v5251_v23  ;;  %v5131_v8 = vld [vmem:[%s10338_s4] sm:$0xf] }
  0xb9   :  { %1617 = vmatpush.bf16.msra.mxu0 %v5044_v44  ;;  %v6632_v44 = vld [vmem:[%s10338_s4 + $0xd4] sm:$0xf0] }
  0xba   :  { %1576 = vmatpush.bf16.msrb.mxu1 %v4644_v39  ;;  %v5244_v39 = vor.u32 %v6634_v34, %v5243_v33  ;;  %v5192_v34 = vor.u32 %v6619_v26, %v5189_v27  ;;  %v5205_v26 = vld [vmem:[%s10338_s4 + $0x98] sm:$0xf0] }
  0xbb   :  { %1589 = vmatpush.bf16.msra.mxu3 %v4788_v35  ;;  %v1259_v35 = vadd.f32 %v1258_v53, %v257_v24 }
  0xbc   :  { %1603 = vmatpush.bf16.msra.mxu2 %v4916_v36  ;;  %v1261_v36 = vadd.f32 %v1260_v29, %v257_v24  ;;  %v6606_v24 = vld [vmem:[%s10338_s4 + $0x4] sm:$0xf0] }
  0xbd   :  { %1618 = vmatpush.bf16.msra.mxu0 %v5028_v62  ;;  %v1273_v45 = vadd.f32 %v8243_v61, %v1259_v35  ;;  %v1302_v61 = vpop.f32.mrf.mxu3  ;;  %v1342_v62 = vpop.f32.mrf.mxu2  ;;  %v5132_v29 = vor.u32 %v6606_v24, %v5131_v8 }
  0xbe   :  { %1577 = vmatpush.bf16.msrb.mxu1 %v4628_v56  ;;  %v1275_v46 = vadd.f32 %v1274_v30, %v1261_v36  ;;  %v5195_v30 = vld [vmem:[%s10338_s4 + $0x80] sm:$0xf]  ;;  %v6635_v36 = vld [vmem:[%s10338_s4 + $0xf4] sm:$0xf] }
  0xbf   :  { %1590 = vmatpush.bf16.msra.mxu3 %v4772_v49  ;;  %v1287_v53 = vadd.f32 %v8263_v7, %v1273_v45  ;;  %v6633_v45 = vld [vmem:[%s10338_s4 + $0xe4] sm:$0xf] }
  0xc0   :  { %1604 = vmatpush.bf16.msra.mxu2 %v4900_v51  ;;  %v5227_v51 = vld [vmem:[%s10338_s4 + $0xc0] sm:$0xf]  ;;  %v1289_v56 = vadd.f32 %v1288_v40, %v1275_v46  ;;  %v5245_v46 = vld [vmem:[%s10338_s4 + $0xe8] sm:$0xf0] }
  0xc1   :  { %1619 = vmatpush.bf16.msra.mxu0 %v5012_v13  ;;  %v1314_v47 = vpop.f32.mrf.mxu0  ;;  %v5228_v59 = vor.u32 %v6630_v52, %v5227_v51  ;;  %v1301_v2 = vadd.f32 %v1300_v31, %v1287_v53  ;;  %v5211_v13 = vld [vmem:[%s10338_s4 + $0xa0] sm:$0xf]  ;;  %v6622_v31 = vld [vmem:[%s10338_s4 + $0x84] sm:$0xf0]  ;;  %v6613_v51 = vld [vmem:[%s10338_s4 + $0x44] sm:$0xf] }
  0xc2   :  { %1578 = vmatpush.bf16.msrb.mxu1 %v4612_v9  ;;  %v1328_v48 = vpop.f32.mrf.mxu1  ;;  %v1303_v3 = vadd.f32 %v1302_v61, %v1289_v56  ;;  %v5196_v35 = vor.u32 %v6622_v31, %v5195_v30  ;;  %v5165_v52 = vld [vmem:[%s10338_s4 + $0x48] sm:$0xf0] }
  0xc3   :  { %1591 = vmatpush.bf16.msra.mxu3 %v4756_v5  ;;  %v6610_v5 = vld [vmem:[%s10338_s4 + $0x24] sm:$0xf0]  ;;  %v1315_v9 = vadd.f32 %v1314_v47, %v1301_v2  ;;  %v5168_v58 = vor.u32 %v6613_v51, %v5165_v52  ;;  %v5229_v61 = vld [vmem:[%s10338_s4 + $0xc8] sm:$0xf0]  ;;  %v6627_v2 = vld [vmem:[%s10338_s4 + $0xb4] sm:$0xf] }
  0xc4   :  { %1605 = vmatpush.bf16.msra.mxu2 %v4884_v6  ;;  %v5220_v6 = vor.u32 %v6628_v1, %v5219_v0  ;;  %v5148_v12 = vor.u32 %v6610_v5, %v5147_v4  ;;  %v6609_v4 = vld [vmem:[%s10338_s4 + $0x24] sm:$0xf]  ;;  %v5149_v5 = vld [vmem:[%s10338_s4 + $0x28] sm:$0xf0]  ;;  %v6644_v51 = vld [vmem:[%s10338_s4 + $0x134] sm:$0xf0] }
  0xc5   :  { %1579 = vmatmul.bf16.vlgmr.msrb.gmra.mxu1 %v7270_v54  ;;  %1620 = vmatpush.bf16.msra.mxu0 %v4996_v25  ;;  %v5171_v54 = vld [vmem:[%s10338_s4 + $0x50] sm:$0xf]  ;;  %v1329_v18 = vadd.f32 %v1328_v48, %v1315_v9  ;;  %v1344_v19 = vpop.f32.mrf.mxu2  ;;  %v6631_v48 = vld [vmem:[%s10338_s4 + $0xd4] sm:$0xf] }
  0xc6   :  { %1634 = vmatpush.bf16.msra.mxu1 %v5124_v55  ;;  %v5172_v41 = vor.u32 %v6616_v38, %v5171_v54  ;;  %v5212_v55 = vor.u32 %v6626_v14, %v5211_v13  ;;  %v5253_v54 = vld [vmem:[%s10338_s4 + $0xf8] sm:$0xf0]  ;;  %v6617_v38 = vld [vmem:[%s10338_s4 + $0x64] sm:$0xf] }
  0xc7   :  { %1592 = vmatpush.bf16.msra.mxu3 %v4740_v20  ;;  %v5256_v40 = vor.u32 %v6635_v36, %v5253_v54 }
  0xc8   :  { %1606 = vmatpush.bf16.msra.mxu2 %v4868_v21  ;;  %1621 = vmatmul.bf16.vlgmr.msra.gmra.mxu0 %v7507_v42  ;;  %v5236_v42 = vor.u32 %v6632_v44, %v5235_v43  ;;  %v5203_v21 = vld [vmem:[%s10338_s4 + $0x90] sm:$0xf] }
  0xc9   :  { %v1316_v7 = vpop.f32.mrf.mxu0  ;;  %v8399_v33 = vpop.f32.mrf.mxu3 }
  0xca   :  { %2057 = vmatpush.bf16.msrb.mxu1 %v5252_v28  ;;  %1593 = vmatmul.bf16.vlgmr.msra.gmra.mxu3 %v7283_v60  ;;  %v5163_v60 = vld [vmem:[%s10338_s4 + $0x40] sm:$0xf]  ;;  %v1317_v10 = vadd.f32 %v1316_v7, %v1303_v3  ;;  %v1330_v11 = vpop.f32.mrf.mxu1  ;;  %v1343_v28 = vadd.f32 %v1342_v62, %v1329_v18  ;;  %v6611_v62 = vld [vmem:[%s10338_s4 + $0x34] sm:$0xf]  ;;  %v5221_v3 = vld [vmem:[%s10338_s4 + $0xb8] sm:$0xf0] }
  0xcb   :  { %2043 = vmatpush.bf16.msrb.mxu3 %v5188_v22  ;;  %1607 = vmatmul.bf16.vlgmr.msra.gmra.mxu2 %v7496_v37  ;;  %v6614_v37 = vld [vmem:[%s10338_s4 + $0x44] sm:$0xf0]  ;;  %v6624_v22 = vld [vmem:[%s10338_s4 + $0x94] sm:$0xf0]  ;;  %v5141_v18 = vld [vmem:[%s10338_s4 + $0x18] sm:$0xf0] }
  0xcc   :  { %v5164_v49 = vor.u32 %v6614_v37, %v5163_v60  ;;  %v1331_v15 = vadd.f32 %v1330_v11, %v1317_v10  ;;  %v5204_v25 = vor.u32 %v6624_v22, %v5203_v21  ;;  %v6615_v60 = vld [vmem:[%s10338_s4 + $0x54] sm:$0xf]  ;;  %v5173_v37 = vld [vmem:[%s10338_s4 + $0x58] sm:$0xf0]  ;;  %v5315_v10 = vld [vmem:[%s10338_s4 + $0x170] sm:$0xf] }
  0xcd   :  { %v5176_v47 = vor.u32 %v6615_v60, %v5173_v37  ;;  %v6652_v11 = vld [vmem:[%s10338_s4 + $0x174] sm:$0xf0]  ;;  %v5307_v21 = vld [vmem:[%s10338_s4 + $0x160] sm:$0xf]  ;;  %v6650_v22 = vld [vmem:[%s10338_s4 + $0x164] sm:$0xf0] }
  0xce   :  { %2058 = vmatpush.bf16.msrb.mxu1 %v5244_v39  ;;  %v1345_v23 = vadd.f32 %v1344_v19, %v1331_v15  ;;  %v5181_v39 = vld [vmem:[%s10338_s4 + $0x68] sm:$0xf0]  ;;  %v1370_v56 = vpop.f32.mrf.mxu2  ;;  %v5316_v13 = vor.u32 %v6652_v11, %v5315_v10  ;;  %v5152_v15 = vor.u32 %v6609_v4, %v5149_v5  ;;  %v5308_v8 = vor.u32 %v6650_v22, %v5307_v21  ;;  %v6646_v60 = vld [vmem:[%s10338_s4 + $0x144] sm:$0xf0]  ;;  %v5259_v10 = vld [vmem:[%s10338_s4 + $0x100] sm:$0xf] }
  0xcf   :  { %2044 = vmatpush.bf16.msrb.mxu3 %v5180_v32  ;;  %v5184_v44 = vor.u32 %v6617_v38, %v5181_v39  ;;  %v6621_v39 = vld [vmem:[%s10338_s4 + $0x84] sm:$0xf]  ;;  %v6638_v11 = vld [vmem:[%s10338_s4 + $0x104] sm:$0xf0]  ;;  %v6668_v21 = vld [vmem:[%s10338_s4 + $0x1f4] sm:$0xf0] }
  0xd0   :  { %v1645_v32 = vmax.f32 %v1345_v23, 0.0  ;;  %2071 = vmatpush.bf16.msrb.mxu2 %v5316_v13  ;;  %v5260_v13 = vor.u32 %v6638_v11, %v5259_v10 }
  0xd1   :  { %v1358_v57 = vpop.f32.mrf.mxu3 }
  0xd2   :  { %2059 = vmatpush.bf16.msrb.mxu1 %v5236_v42  ;;  %v5248_v42 = vor.u32 %v6633_v45, %v5245_v46  ;;  %v5291_v46 = vld [vmem:[%s10338_s4 + $0x140] sm:$0xf] }
  0xd3   :  { %2045 = vmatpush.bf16.msrb.mxu3 %v5172_v41  ;;  %v1641_v41 = vmax.f32 %v1343_v28, 0.0  ;;  %v6605_v28 = vld [vmem:[%s10338_s4 + $0x4] sm:$0xf] }
  0xd4   :  { %2072 = vmatpush.bf16.msrb.mxu2 %v5308_v8  ;;  %v6647_v8 = vld [vmem:[%s10338_s4 + $0x154] sm:$0xf] }
  0xd5   :  { %5128 = vmatmul.msk.bf16.vlgmr.msra.gmra.mxu1 %vm1245_vm0, %v7399_v50  ;;  %v6608_v50 = vld [vmem:[%s10338_s4 + $0x14] sm:$0xf0]  ;;  %v8413_v43 = vpack.c.bf16 %v1645_v32, %v1641_v41  ;;  %v5299_v32 = vld [vmem:[%s10338_s4 + $0x150] sm:$0xf] }
  0xd6   :  { %2060 = vmatpush.bf16.msrb.mxu1 %v5228_v59  ;;  %v5140_v20 = vor.u32 %v6608_v50, %v5139_v16  ;;  %v6629_v59 = vld [vmem:[%s10338_s4 + $0xc4] sm:$0xf]  ;;  %v1372_v14 = vpop.f32.mrf.mxu2  ;;  %v5213_v50 = vld [vmem:[%s10338_s4 + $0xa8] sm:$0xf0] }
  0xd7   :  { %2046 = vmatpush.bf16.msrb.mxu3 %v5164_v49  ;;  %v5237_v49 = vld [vmem:[%s10338_s4 + $0xd8] sm:$0xf0]  ;;  %v5232_v0 = vor.u32 %v6629_v59, %v5229_v61  ;;  %v6625_v16 = vld [vmem:[%s10338_s4 + $0xa4] sm:$0xf]  ;;  %v5275_v61 = vld [vmem:[%s10338_s4 + $0x120] sm:$0xf] }
  0xd8   :  { %v5240_v53 = vor.u32 %v6631_v48, %v5237_v49  ;;  %v5216_v19 = vor.u32 %v6625_v16, %v5213_v50  ;;  %v5283_v49 = vld [vmem:[%s10338_s4 + $0x130] sm:$0xf]  ;;  %v6649_v50 = vld [vmem:[%s10338_s4 + $0x164] sm:$0xf] }
  0xda   :  { %2061 = vmatpush.bf16.msrb.mxu1 %v5220_v6  ;;  %v5224_v6 = vor.u32 %v6627_v2, %v5221_v3 }
  0xdb   :  { %2047 = vmatpush.bf16.msrb.mxu3 %v5156_v63  ;;  %v5157_v63 = vld [vmem:[%s10338_s4 + $0x38] sm:$0xf0] }
  0xdc   :  { %v5160_v1 = vor.u32 %v6611_v62, %v5157_v63  ;;  %v6642_v62 = vld [vmem:[%s10338_s4 + $0x124] sm:$0xf0] }
  0xde   :  { %2062 = vmatpush.bf16.msrb.mxu1 %v5212_v55  ;;  %v6607_v55 = vld [vmem:[%s10338_s4 + $0x14] sm:$0xf] }
  0xdf   :  { %2048 = vmatpush.bf16.msrb.mxu3 %v5148_v12  ;;  %v258_v12 = vperm.slane %v8286_v17, 1  ;;  %v5144_v24 = vor.u32 %v6607_v55, %v5141_v18  ;;  %v5309_v55 = vld [vmem:[%s10338_s4 + $0x168] sm:$0xf0] }
  0xe1   :  { %v1384_v7 = vpop.f32.mrf.mxu0  ;;  %v1357_v23 = vadd.f32 %v8399_v33, %v258_v12  ;;  %v1359_v27 = vadd.f32 %v1358_v57, %v258_v12  ;;  %v6648_v33 = vld [vmem:[%s10338_s4 + $0x154] sm:$0xf0] }
  0xe2   :  { %2063 = vmatpush.bf16.msrb.mxu1 %v5204_v25  ;;  %v6623_v25 = vld [vmem:[%s10338_s4 + $0x94] sm:$0xf] }
  0xe3   :  { %2049 = vmatpush.bf16.msrb.mxu3 %v5140_v20  ;;  %v1398_v20 = vpop.f32.mrf.mxu1  ;;  %v5208_v30 = vor.u32 %v6623_v25, %v5205_v26  ;;  %v1373_v41 = vadd.f32 %v1372_v14, %v1359_v27  ;;  %v6651_v14 = vld [vmem:[%s10338_s4 + $0x174] sm:$0xf]  ;;  %v5371_v26 = vld [vmem:[%s10338_s4 + $0x1e0] sm:$0xf]  ;;  %v6666_v27 = vld [vmem:[%s10338_s4 + $0x1e4] sm:$0xf0] }
  0xe6   :  { %2064 = vmatpush.bf16.msrb.mxu1 %v5196_v35  ;;  %v5300_v35 = vor.u32 %v6648_v33, %v5299_v32  ;;  %v5363_v32 = vld [vmem:[%s10338_s4 + $0x1d0] sm:$0xf]  ;;  %v6664_v33 = vld [vmem:[%s10338_s4 + $0x1d4] sm:$0xf0] }
  0xe7   :  { %2050 = vmatpush.bf16.msrb.mxu3 %v5132_v29  ;;  %v5133_v29 = vld [vmem:[%s10338_s4 + $0x8] sm:$0xf0] }
  0xe8   :  { %v5136_v38 = vor.u32 %v6605_v28, %v5133_v29  ;;  %2073 = vmatpush.bf16.msrb.mxu2 %v5300_v35  ;;  %v5372_v28 = vor.u32 %v6666_v27, %v5371_v26  ;;  %v6645_v29 = vld [vmem:[%s10338_s4 + $0x144] sm:$0xf]  ;;  %v5364_v35 = vor.u32 %v6664_v33, %v5363_v32  ;;  %v5365_v32 = vld [vmem:[%s10338_s4 + $0x1d8] sm:$0xf0] }
  0xe9   :  { %v1412_v9 = vpop.f32.mrf.mxu3  ;;  %v1386_v36 = vpop.f32.mrf.mxu0 }
  0xea   :  { %2113 = vmatpush.bf16.msra.mxu1 %v5256_v40  ;;  %2051 = vmatmul.bf16.vlgmr.msrb.gmra.mxu3 %v8413_v43  ;;  %v5197_v40 = vld [vmem:[%s10338_s4 + $0x88] sm:$0xf0]  ;;  %v1387_v37 = vadd.f32 %v1386_v36, %v1373_v41  ;;  %v5355_v41 = vld [vmem:[%s10338_s4 + $0x1c0] sm:$0xf] }
  0xeb   :  { %2099 = vmatpush.bf16.msra.mxu3 %v5192_v34  ;;  %v1371_v34 = vadd.f32 %v1370_v56, %v1357_v23  ;;  %v5200_v45 = vor.u32 %v6621_v39, %v5197_v40  ;;  %v259_v39 = vperm.slane %v8286_v17, 2 }
  0xee   :  { %2114 = vmatpush.bf16.msra.mxu1 %v5248_v42  ;;  %v1426_v54 = vpop.f32.mrf.mxu2  ;;  %v5292_v42 = vor.u32 %v6646_v60, %v5291_v46  ;;  %v6641_v60 = vld [vmem:[%s10338_s4 + $0x124] sm:$0xf] }
  0xef   :  { %2100 = vmatpush.bf16.msra.mxu3 %v5184_v44  ;;  %v1385_v44 = vadd.f32 %v1384_v7, %v1371_v34 }
  0xf0   :  { %2074 = vmatpush.bf16.msrb.mxu2 %v5292_v42 }
  0xf1   :  { %v1414_v31 = vpop.f32.mrf.mxu3  ;;  %v1399_v48 = vadd.f32 %v1398_v20, %v1385_v44  ;;  %v5379_v20 = vld [vmem:[%s10338_s4 + $0x1f0] sm:$0xf]  ;;  %v6662_v44 = vld [vmem:[%s10338_s4 + $0x1c4] sm:$0xf0] }
  0xf2   :  { %2115 = vmatpush.bf16.msra.mxu1 %v5240_v53  ;;  %v5284_v53 = vor.u32 %v6644_v51, %v5283_v49  ;;  %v5380_v22 = vor.u32 %v6668_v21, %v5379_v20  ;;  %v5356_v46 = vor.u32 %v6662_v44, %v5355_v41  ;;  %v6660_v49 = vld [vmem:[%s10338_s4 + $0x1b4] sm:$0xf0] }
  0xf3   :  { %2101 = vmatpush.bf16.msra.mxu3 %v5176_v47  ;;  %v1400_v47 = vpop.f32.mrf.mxu1  ;;  %v1413_v56 = vadd.f32 %v1412_v9, %v1399_v48  ;;  %v5347_v48 = vld [vmem:[%s10338_s4 + $0x1b0] sm:$0xf] }
  0xf4   :  { %v1401_v57 = vadd.f32 %v1400_v47, %v1387_v37  ;;  %2075 = vmatpush.bf16.msrb.mxu2 %v5284_v53  ;;  %2085 = vmatpush.bf16.msrb.mxu0 %v5380_v22  ;;  %v5277_v37 = vld [vmem:[%s10338_s4 + $0x128] sm:$0xf0]  ;;  %v5348_v51 = vor.u32 %v6660_v49, %v5347_v48 }
  0xf5   :  { %v1427_v63 = vadd.f32 %v1426_v54, %v1413_v56  ;;  %v6643_v54 = vld [vmem:[%s10338_s4 + $0x134] sm:$0xf]  ;;  %v5280_v47 = vor.u32 %v6641_v60, %v5277_v37  ;;  %v5349_v60 = vld [vmem:[%s10338_s4 + $0x1b8] sm:$0xf0] }
  0xf6   :  { %2116 = vmatpush.bf16.msra.mxu1 %v5232_v0  ;;  %v1428_v59 = vpop.f32.mrf.mxu2  ;;  %v5276_v0 = vor.u32 %v6642_v62, %v5275_v61 }
  0xf7   :  { %2102 = vmatpush.bf16.msra.mxu3 %v5168_v58  ;;  %v1415_v58 = vadd.f32 %v1414_v31, %v1401_v57  ;;  %v6639_v57 = vld [vmem:[%s10338_s4 + $0x114] sm:$0xf] }
  0xf8   :  { %2076 = vmatpush.bf16.msrb.mxu2 %v5276_v0  ;;  %2086 = vmatpush.bf16.msrb.mxu0 %v5372_v28  ;;  %v6658_v0 = vld [vmem:[%s10338_s4 + $0x1a4] sm:$0xf0] }
  0xf9   :  { %v1440_v52 = vpop.f32.mrf.mxu3  ;;  %v1429_v2 = vadd.f32 %v1428_v59, %v1415_v58  ;;  %v5269_v58 = vld [vmem:[%s10338_s4 + $0x118] sm:$0xf0] }
  0xfa   :  { %2117 = vmatpush.bf16.msra.mxu1 %v5224_v6  ;;  %v1441_v3 = vadd.f32 %v1440_v52, %v1427_v63  ;;  %v5272_v62 = vor.u32 %v6639_v57, %v5269_v58  ;;  %v5339_v63 = vld [vmem:[%s10338_s4 + $0x1a0] sm:$0xf]  ;;  %v5333_v57 = vld [vmem:[%s10338_s4 + $0x198] sm:$0xf0] }
  0xfb   :  { %2103 = vmatpush.bf16.msra.mxu3 %v5160_v1  ;;  %v5267_v1 = vld [vmem:[%s10338_s4 + $0x110] sm:$0xf] }
  0xfc   :  { %v1642_v7 = vmax.f32 %v1441_v3, 0.0  ;;  %2087 = vmatpush.bf16.msrb.mxu0 %v5364_v35  ;;  %v5261_v3 = vld [vmem:[%s10338_s4 + $0x108] sm:$0xf0] }
  0xfe   :  { %2118 = vmatpush.bf16.msra.mxu1 %v5216_v19  ;;  %v5312_v19 = vor.u32 %v6649_v50, %v5309_v55 }
  0xff   :  { %2104 = vmatpush.bf16.msra.mxu3 %v5152_v15  ;;  %v5317_v15 = vld [vmem:[%s10338_s4 + $0x178] sm:$0xf0] }
 0x100   :  { %v5320_v16 = vor.u32 %v6651_v14, %v5317_v15  ;;  %2088 = vmatpush.bf16.msrb.mxu0 %v5356_v46  ;;  %v5323_v15 = vld [vmem:[%s10338_s4 + $0x180] sm:$0xf]  ;;  %v6659_v46 = vld [vmem:[%s10338_s4 + $0x1b4] sm:$0xf] }
 0x101   :  { %v1442_v5 = vpop.f32.mrf.mxu3  ;;  %v1482_v18 = vpop.f32.mrf.mxu0  ;;  %v5352_v37 = vor.u32 %v6659_v46, %v5349_v60  ;;  %v8742_v46 = vld [vmem:[%s10341_s5] sm:$0x3] }
 0x102   :  { %2119 = vmatpush.bf16.msra.mxu1 %v5208_v30  ;;  %v1443_v6 = vadd.f32 %v1442_v5, %v1429_v2  ;;  %v1454_v23 = vpop.f32.mrf.mxu1  ;;  %v5293_v30 = vld [vmem:[%s10338_s4 + $0x148] sm:$0xf0]  ;;  %v6637_v2 = vld [vmem:[%s10338_s4 + $0x104] sm:$0xf] }
 0x103   :  { %2105 = vmatpush.bf16.msra.mxu3 %v5144_v24  ;;  %v5301_v24 = vld [vmem:[%s10338_s4 + $0x158] sm:$0xf0]  ;;  %v5296_v31 = vor.u32 %v6645_v29, %v5293_v30  ;;  %v1455_v42 = vadd.f32 %v1454_v23, %v259_v39 }
 0x104   :  { %v1646_v9 = vmax.f32 %v1443_v6, 0.0  ;;  %v5304_v25 = vor.u32 %v6647_v8, %v5301_v24  ;;  %2089 = vmatpush.bf16.msrb.mxu0 %v5348_v51  ;;  %v5264_v6 = vor.u32 %v6637_v2, %v5261_v3  ;;  %v6665_v24 = vld [vmem:[%s10338_s4 + $0x1e4] sm:$0xf] }
 0x106   :  { %2120 = vmatpush.bf16.msra.mxu1 %v5200_v45  ;;  %v1650_v12 = vpack.c.bf16 %v1646_v9, %v1642_v7  ;;  %v5331_v7 = vld [vmem:[%s10338_s4 + $0x190] sm:$0xf]  ;;  %v6656_v9 = vld [vmem:[%s10338_s4 + $0x194] sm:$0xf0] }
 0x107   :  { %2106 = vmatpush.bf16.msra.mxu3 %v5136_v38  ;;  %v5285_v38 = vld [vmem:[%s10338_s4 + $0x138] sm:$0xf0]  ;;  %v5332_v10 = vor.u32 %v6656_v9, %v5331_v7 }
 0x108   :  { %2065 = vmatmul.bf16.vlgmr.msrb.gmra.mxu1 %v1650_v12  ;;  %v5288_v40 = vor.u32 %v6643_v54, %v5285_v38 }
 0x109   :  { %v1484_v36 = vpop.f32.mrf.mxu0 }
 0x10a   :  { %2107 = vmatmul.bf16.vlgmr.msra.gmra.mxu3 %v8413_v43  ;;  %v6640_v43 = vld [vmem:[%s10338_s4 + $0x114] sm:$0xf0]  ;;  %v1456_v45 = vpop.f32.mrf.mxu1 }
 0x10b   :  { %v5268_v4 = vor.u32 %v6640_v43, %v5267_v1  ;;  %v1457_v61 = vadd.f32 %v1456_v45, %v259_v39  ;;  %v5340_v43 = vor.u32 %v6658_v0, %v5339_v63  ;;  %v6661_v39 = vld [vmem:[%s10338_s4 + $0x1c4] sm:$0xf]  ;;  %v260_v45 = vperm.slane %v8286_v17, 3 }
 0x10d   :  { %2077 = vmatpush.bf16.msrb.mxu2 %v5268_v4  ;;  %v1468_v34 = vpop.f32.mrf.mxu3  ;;  %2090 = vmatpush.bf16.msrb.mxu0 %v5340_v43 }
 0x10e   :  { %v1496_v53 = vpop.f32.mrf.mxu2  ;;  %v1469_v59 = vadd.f32 %v1468_v34, %v1455_v42  ;;  %v6657_v42 = vld [vmem:[%s10338_s4 + $0x1a4] sm:$0xf] }
 0x110   :  { %v1483_v4 = vadd.f32 %v1482_v18, %v1469_v59  ;;  %v6667_v18 = vld [vmem:[%s10338_s4 + $0x1f4] sm:$0xf]  ;;  %v6653_v59 = vld [vmem:[%s10338_s4 + $0x184] sm:$0xf] }
 0x111   :  { %2078 = vmatpush.bf16.msrb.mxu2 %v5260_v13  ;;  %v1538_v52 = vpop.f32.mrf.mxu0  ;;  %2091 = vmatpush.bf16.msrb.mxu0 %v5332_v10 }
 0x115   :  { %2127 = vmatpush.bf16.msra.mxu2 %v5320_v16  ;;  %v1470_v56 = vpop.f32.mrf.mxu3  ;;  %v6654_v16 = vld [vmem:[%s10338_s4 + $0x184] sm:$0xf0] }
 0x116   :  { %v1471_v5 = vadd.f32 %v1470_v56, %v1457_v61  ;;  %v1498_v50 = vpop.f32.mrf.mxu2  ;;  %v5324_v55 = vor.u32 %v6654_v16, %v5323_v15  ;;  %v6655_v56 = vld [vmem:[%s10338_s4 + $0x194] sm:$0xf]  ;;  %v5325_v61 = vld [vmem:[%s10338_s4 + $0x188] sm:$0xf0] }
 0x117   :  { %v5336_v58 = vor.u32 %v6655_v56, %v5333_v57 }
 0x118   :  { %2121 = vmatmul.bf16.vlgmr.msra.gmra.mxu1 %v1650_v12  ;;  %v1497_v12 = vadd.f32 %v1496_v53, %v1483_v4  ;;  %v1485_v13 = vadd.f32 %v1484_v36, %v1471_v5  ;;  %2092 = vmatpush.bf16.msrb.mxu0 %v5324_v55 }
 0x119   :  { %2128 = vmatpush.bf16.msra.mxu2 %v5312_v19  ;;  %v1540_v14 = vpop.f32.mrf.mxu0  ;;  %v5381_v19 = vld [vmem:[%s10338_s4 + $0x1f8] sm:$0xf0] }
 0x11a   :  { %v5384_v21 = vor.u32 %v6667_v18, %v5381_v19  ;;  %v1499_v23 = vadd.f32 %v1498_v50, %v1485_v13 }
 0x11c   :  { %2141 = vmatpush.bf16.msra.mxu0 %v5384_v21 }
 0x11d   :  { %2129 = vmatpush.bf16.msra.mxu2 %v5304_v25  ;;  %v5373_v25 = vld [vmem:[%s10338_s4 + $0x1e8] sm:$0xf0] }
 0x11e   :  { %v5376_v27 = vor.u32 %v6665_v24, %v5373_v25  ;;  %v5501_v25 = vld [vmem:[%s10340_s6 + $0xf0] sm:$0xf0] }
 0x120   :  { %2142 = vmatpush.bf16.msra.mxu0 %v5376_v27  ;;  %v6700_v27 = vld [vmem:[%s10340_s6 + $0xf4] sm:$0xf0] }
 0x121   :  { %2130 = vmatpush.bf16.msra.mxu2 %v5296_v31  ;;  %v6663_v31 = vld [vmem:[%s10338_s4 + $0x1d4] sm:$0xf] }
 0x122   :  { %v1510_v1 = vpop.f32.mrf.mxu1  ;;  %v5368_v35 = vor.u32 %v6663_v31, %v5365_v32  ;;  %v5509_v31 = vld [vmem:[%s10340_s6 + $0xf8] sm:$0xf0] }
 0x123   :  { %v1511_v20 = vadd.f32 %v1510_v1, %v1497_v12  ;;  %v5328_v1 = vor.u32 %v6653_v59, %v5325_v61  ;;  %v5477_v59 = vld [vmem:[%s10340_s6 + $0xb8] sm:$0xf0] }
 0x124   :  { %2143 = vmatpush.bf16.msra.mxu0 %v5368_v35  ;;  %v6693_v35 = vld [vmem:[%s10340_s6 + $0xc4] sm:$0xf] }
 0x125   :  { %2131 = vmatpush.bf16.msra.mxu2 %v5288_v40  ;;  %v1566_v34 = vpop.f32.mrf.mxu0  ;;  %v5357_v40 = vld [vmem:[%s10338_s4 + $0x1c8] sm:$0xf0] }
 0x126   :  { %v5360_v44 = vor.u32 %v6661_v39, %v5357_v40  ;;  %v6696_v39 = vld [vmem:[%s10340_s6 + $0xd4] sm:$0xf0] }
 0x128   :  { %2144 = vmatpush.bf16.msra.mxu0 %v5360_v44  ;;  %v6694_v44 = vld [vmem:[%s10340_s6 + $0xcc] sm:$0xf] }
 0x129   :  { %2132 = vmatpush.bf16.msra.mxu2 %v5280_v47  ;;  %v5341_v47 = vld [vmem:[%s10338_s4 + $0x1a8] sm:$0xf0] }
 0x12a   :  { %v1512_v22 = vpop.f32.mrf.mxu1  ;;  %v5344_v51 = vor.u32 %v6657_v42, %v5341_v47  ;;  %v6691_v42 = vld [vmem:[%s10340_s6 + $0xac] sm:$0xf0]  ;;  %v6689_v47 = vld [vmem:[%s10340_s6 + $0xa4] sm:$0xf] }
 0x12b   :  { %v1513_v26 = vadd.f32 %v1512_v22, %v1499_v23  ;;  %v5499_v22 = vld [vmem:[%s10340_s6 + $0xe0] sm:$0xf]  ;;  %v6699_v23 = vld [vmem:[%s10340_s6 + $0xec] sm:$0xf0] }
 0x12c   :  { %2145 = vmatpush.bf16.msra.mxu0 %v5352_v37  ;;  %v5500_v24 = vor.u32 %v6699_v23, %v5499_v22  ;;  %v5467_v37 = vld [vmem:[%s10340_s6 + $0xa0] sm:$0xf]  ;;  %v6682_v22 = vld [vmem:[%s10340_s6 + $0x6c] sm:$0xf]  ;;  %v5445_v23 = vld [vmem:[%s10340_s6 + $0x78] sm:$0xf0] }
 0x12d   :  { %2133 = vmatpush.bf16.msra.mxu2 %v5272_v62  ;;  %v1524_v11 = vpop.f32.mrf.mxu3  ;;  %v1568_v49 = vpop.f32.mrf.mxu0 }
 0x12e   :  { %v1525_v8 = vadd.f32 %v1524_v11, %v1511_v20  ;;  %v1552_v36 = vpop.f32.mrf.mxu2  ;;  %2372 = vmatpush.bf16.msrb.mxu3 %v5500_v24 }
 0x12f   :  { %v1553_v48 = vadd.f32 %v1552_v36, %v260_v45 }
 0x130   :  { %v1539_v29 = vadd.f32 %v1538_v52, %v1525_v8  ;;  %2146 = vmatpush.bf16.msra.mxu0 %v5344_v51  ;;  %v6697_v8 = vld [vmem:[%s10340_s6 + $0xe4] sm:$0xf]  ;;  %v5469_v51 = vld [vmem:[%s10340_s6 + $0xb0] sm:$0xf0] }
 0x131   :  { %2134 = vmatpush.bf16.msra.mxu2 %v5264_v6  ;;  %v1567_v53 = vadd.f32 %v1566_v34, %v1553_v48  ;;  %v6695_v34 = vld [vmem:[%s10340_s6 + $0xcc] sm:$0xf0]  ;;  %v5472_v56 = vor.u32 %v6689_v47, %v5469_v51  ;;  %v5405_v47 = vld [vmem:[%s10340_s6 + $0x30] sm:$0xf0] }
 0x132   :  { %v1643_v54 = vmax.f32 %v1539_v29, 0.0 }
 0x134   :  { %2147 = vmatpush.bf16.msra.mxu0 %v5336_v58  ;;  %v6690_v58 = vld [vmem:[%s10340_s6 + $0xac] sm:$0xf] }
 0x135   :  { %v1526_v28 = vpop.f32.mrf.mxu3 }
 0x136   :  { %v1527_v30 = vadd.f32 %v1526_v28, %v1513_v26  ;;  %v1554_v52 = vpop.f32.mrf.mxu2  ;;  %v5507_v26 = vld [vmem:[%s10340_s6 + $0xe8] sm:$0xf]  ;;  %v5504_v28 = vor.u32 %v6697_v8, %v5501_v25  ;;  %v5448_v25 = vor.u32 %v6682_v22, %v5445_v23 }
 0x137   :  { %v1555_v43 = vadd.f32 %v1554_v52, %v260_v45  ;;  %v5508_v29 = vor.u32 %v6700_v27, %v5507_v26  ;;  %v5493_v45 = vld [vmem:[%s10340_s6 + $0xd8] sm:$0xf0]  ;;  %v5475_v52 = vld [vmem:[%s10340_s6 + $0xa8] sm:$0xf]  ;;  %v5419_v27 = vld [vmem:[%s10340_s6 + $0x40] sm:$0xf] }
 0x138   :  { %v1541_v33 = vadd.f32 %v1540_v14, %v1527_v30  ;;  %2148 = vmatpush.bf16.msra.mxu0 %v5328_v1  ;;  %v6698_v30 = vld [vmem:[%s10340_s6 + $0xec] sm:$0xf]  ;;  %2386 = vmatpush.bf16.msrb.mxu1 %v5504_v28  ;;  %v5496_v60 = vor.u32 %v6694_v44, %v5493_v45  ;;  %v6687_v1 = vld [vmem:[%s10340_s6 + $0x8c] sm:$0xf0]  ;;  %v5403_v45 = vld [vmem:[%s10340_s6 + $0x20] sm:$0xf] }
 0x139   :  { %v1569_v5 = vadd.f32 %v1568_v49, %v1555_v43  ;;  %v5512_v32 = vor.u32 %v6698_v30, %v5509_v31  ;;  %v5468_v49 = vor.u32 %v6691_v42, %v5467_v37  ;;  %v6679_v28 = vld [vmem:[%s10340_s6 + $0x4c] sm:$0xf0]  ;;  %v6673_v37 = vld [vmem:[%s10340_s6 + $0x24] sm:$0xf] }
 0x13a   :  { %v1647_v38 = vmax.f32 %v1541_v33, 0.0  ;;  %v5483_v33 = vld [vmem:[%s10340_s6 + $0xc0] sm:$0xf] }
 0x13b   :  { %v5484_v36 = vor.u32 %v6695_v34, %v5483_v33  ;;  %v5421_v33 = vld [vmem:[%s10340_s6 + $0x50] sm:$0xf0]  ;;  %v5427_v34 = vld [vmem:[%s10340_s6 + $0x48] sm:$0xf] }
 0x13c   :  { %v1651_v41 = vpack.c.bf16 %v1647_v38, %v1643_v54  ;;  %v5485_v54 = vld [vmem:[%s10340_s6 + $0xd0] sm:$0xf0]  ;;  %v5491_v38 = vld [vmem:[%s10340_s6 + $0xc8] sm:$0xf] }
 0x13d   :  { %v5488_v40 = vor.u32 %v6693_v35, %v5485_v54  ;;  %2373 = vmatpush.bf16.msrb.mxu3 %v5484_v36  ;;  %v6680_v35 = vld [vmem:[%s10340_s6 + $0x54] sm:$0xf0] }
 0x13e   :  { %2079 = vmatmul.bf16.vlgmr.msrb.gmra.mxu2 %v1651_v41 }
 0x13f   :  { %2400 = vmatpush.bf16.msrb.mxu2 %v5508_v29  ;;  %2387 = vmatpush.bf16.msrb.mxu1 %v5488_v40  ;;  %v6677_v29 = vld [vmem:[%s10340_s6 + $0x44] sm:$0xf]  ;;  %v5429_v40 = vld [vmem:[%s10340_s6 + $0x58] sm:$0xf0] }
 0x140   :  { %v5424_v54 = vor.u32 %v6677_v29, %v5421_v33  ;;  %v6753_v29 = vld [vmem:[%s10343_s8 + $0x1a0] sm:$0xf0] }
 0x141   :  { %2374 = vmatpush.bf16.msrb.mxu3 %v5468_v49  ;;  %v1720_v49 = vperm.slane %v8742_v46, 1 }
 0x142   :  { %v1580_v17 = vpop.f32.mrf.mxu1 }
 0x143   :  { %v1581_v63 = vadd.f32 %v1580_v17, %v1567_v53  ;;  %v6692_v53 = vld [vmem:[%s10340_s6 + $0xb4] sm:$0xf0]  ;;  %2388 = vmatpush.bf16.msrb.mxu1 %v5472_v56  ;;  %v6674_v56 = vld [vmem:[%s10340_s6 + $0x2c] sm:$0xf] }
 0x144   :  { %v5476_v57 = vor.u32 %v6692_v53, %v5475_v52  ;;  %v5408_v52 = vor.u32 %v6673_v37, %v5405_v47  ;;  %v6131_v47 = vld [vmem:[%s10343_s8 + $0x4d0] sm:$0xf] }
 0x145   :  { %v1622_v3 = vpop.f32.mrf.mxu0 }
 0x14a   :  { %v1582_v62 = vpop.f32.mrf.mxu1 }
 0x14b   :  { %v1583_v7 = vadd.f32 %v1582_v62, %v1569_v5  ;;  %v5480_v62 = vor.u32 %v6690_v58, %v5477_v59 }
 0x14d   :  { %v1594_v0 = vpop.f32.mrf.mxu3  ;;  %v1624_v15 = vpop.f32.mrf.mxu0 }
 0x14e   :  { %v1608_v2 = vpop.f32.mrf.mxu2  ;;  %v1595_v4 = vadd.f32 %v1594_v0, %v1581_v63  ;;  %2135 = vmatmul.bf16.vlgmr.msra.gmra.mxu2 %v1651_v41  ;;  %v5492_v41 = vor.u32 %v6696_v39, %v5491_v38  ;;  %v1719_v63 = vperm.slane %v8742_v46, 0  ;;  %v5451_v0 = vld [vmem:[%s10340_s6 + $0x80] sm:$0xf]  ;;  %v5428_v38 = vor.u32 %v6680_v35, %v5427_v34  ;;  %v6678_v39 = vld [vmem:[%s10340_s6 + $0x4c] sm:$0xf] }
 0x14f   :  { %v5452_v43 = vor.u32 %v6687_v1, %v5451_v0 }
 0x150   :  { %v1609_v6 = vadd.f32 %v1608_v2, %v1595_v4  ;;  %2401 = vmatpush.bf16.msrb.mxu2 %v5492_v41  ;;  %v6685_v2 = vld [vmem:[%s10340_s6 + $0x84] sm:$0xf]  ;;  %v5459_v4 = vld [vmem:[%s10340_s6 + $0x88] sm:$0xf]  ;;  %v5432_v41 = vor.u32 %v6678_v39, %v5429_v40  ;;  %v6327_v39 = vld [vmem:[%s10343_s8 + $0x658] sm:$0xf] }
 0x151   :  { %2375 = vmatpush.bf16.msrb.mxu3 %v5452_v43  ;;  %v5389_v43 = vld [vmem:[%s10340_s6 + $0x10] sm:$0xf0] }
 0x152   :  { %v1636_v9 = vpop.f32.mrf.mxu1  ;;  %v1623_v12 = vadd.f32 %v1622_v3, %v1609_v6  ;;  %v5453_v3 = vld [vmem:[%s10340_s6 + $0x90] sm:$0xf0]  ;;  %v6688_v6 = vld [vmem:[%s10340_s6 + $0x94] sm:$0xf0] }
 0x153   :  { %v5456_v5 = vor.u32 %v6685_v2, %v5453_v3  ;;  %v5395_v2 = vld [vmem:[%s10340_s6 + $0x8] sm:$0xf]  ;;  %v6672_v3 = vld [vmem:[%s10340_s6 + $0x14] sm:$0xf0] }
 0x154   :  { %v1637_v50 = vadd.f32 %v1636_v9, %v1623_v12  ;;  %2402 = vmatpush.bf16.msrb.mxu2 %v5476_v57  ;;  %v5461_v9 = vld [vmem:[%s10340_s6 + $0x98] sm:$0xf0] }
 0x155   :  { %v1596_v10 = vpop.f32.mrf.mxu3  ;;  %2389 = vmatpush.bf16.msrb.mxu1 %v5456_v5  ;;  %v5413_v57 = vld [vmem:[%s10340_s6 + $0x38] sm:$0xf0] }
 0x156   :  { %v1597_v11 = vadd.f32 %v1596_v10, %v1583_v7  ;;  %v1610_v13 = vpop.f32.mrf.mxu2  ;;  %v1644_v19 = vmax.f32 %v1637_v50, 0.0  ;;  %v6686_v7 = vld [vmem:[%s10340_s6 + $0x8c] sm:$0xf]  ;;  %v5460_v10 = vor.u32 %v6688_v6, %v5459_v4  ;;  %v5437_v50 = vld [vmem:[%s10340_s6 + $0x70] sm:$0xf0]  ;;  %v5416_v59 = vor.u32 %v6674_v56, %v5413_v57 }
 0x157   :  { %v6299_v57 = vld [vmem:[%s10343_s8 + $0x620] sm:$0xf] }
 0x158   :  { %v1611_v14 = vadd.f32 %v1610_v13, %v1597_v11  ;;  %v5464_v11 = vor.u32 %v6686_v7, %v5461_v9  ;;  %v5435_v13 = vld [vmem:[%s10340_s6 + $0x60] sm:$0xf]  ;;  %2403 = vmatpush.bf16.msrb.mxu2 %v5460_v10  ;;  %v5396_v7 = vor.u32 %v6672_v3, %v5395_v2  ;;  %v6670_v9 = vld [vmem:[%s10340_s6 + $0xc] sm:$0xf]  ;;  %v5397_v10 = vld [vmem:[%s10340_s6 + $0x18] sm:$0xf0] }
 0x15a   :  { %v1625_v16 = vadd.f32 %v1624_v15, %v1611_v14  ;;  %v1638_v55 = vpop.f32.mrf.mxu1  ;;  %v6683_v14 = vld [vmem:[%s10340_s6 + $0x6c] sm:$0xf0]  ;;  %v6681_v15 = vld [vmem:[%s10340_s6 + $0x64] sm:$0xf] }
 0x15c   :  { %v1639_v18 = vadd.f32 %v1638_v55, %v1625_v16  ;;  %v5436_v16 = vor.u32 %v6683_v14, %v5435_v13  ;;  %v5443_v55 = vld [vmem:[%s10340_s6 + $0x68] sm:$0xf] }
 0x15e   :  { %v1648_v20 = vmax.f32 %v1639_v18, 0.0  ;;  %v6684_v18 = vld [vmem:[%s10340_s6 + $0x74] sm:$0xf0]  ;;  %2376 = vmatpush.bf16.msrb.mxu3 %v5436_v16  ;;  %v5935_v16 = vld [vmem:[%s10343_s8 + $0x348] sm:$0xf] }
 0x160   :  { %v1652_v21 = vpack.c.bf16 %v1648_v20, %v1644_v19  ;;  %v5440_v20 = vor.u32 %v6681_v15, %v5437_v50  ;;  %v6809_v50 = vld [vmem:[%s10343_s8 + $0x360] sm:$0xf0] }
 0x162   :  { %2093 = vmatmul.bf16.vlgmr.msrb.gmra.mxu0 %v1652_v21  ;;  %2390 = vmatpush.bf16.msrb.mxu1 %v5440_v20  ;;  %v5907_v20 = vld [vmem:[%s10343_s8 + $0x310] sm:$0xf] }
 0x163   :  { %2414 = vmatpush.bf16.msrb.mxu0 %v5512_v32  ;;  %v5420_v32 = vor.u32 %v6679_v28, %v5419_v27 }
 0x165   :  { %2377 = vmatpush.bf16.msrb.mxu3 %v5420_v32 }
 0x166   :  { %2391 = vmatpush.bf16.msrb.mxu1 %v5424_v54  ;;  %v5879_v54 = vld [vmem:[%s10343_s8 + $0x2d8] sm:$0xf] }
 0x167   :  { %2415 = vmatpush.bf16.msrb.mxu0 %v5496_v60  ;;  %v6675_v60 = vld [vmem:[%s10340_s6 + $0x2c] sm:$0xf0] }
 0x168   :  { %v5404_v42 = vor.u32 %v6675_v60, %v5403_v45  ;;  %v6746_v45 = vld [vmem:[%s10343_s8 + $0x168] sm:$0xf0] }
 0x16a   :  { %2378 = vmatpush.bf16.msrb.mxu3 %v5404_v42  ;;  %2392 = vmatpush.bf16.msrb.mxu1 %v5408_v52  ;;  %v6788_v52 = vld [vmem:[%s10343_s8 + $0x2b8] sm:$0xf0] }
 0x16b   :  { %2416 = vmatpush.bf16.msrb.mxu0 %v5480_v62  ;;  %v6671_v62 = vld [vmem:[%s10340_s6 + $0xc] sm:$0xf0] }
 0x16d   :  { %v2052_v17 = vpop.f32.mrf.mxu3 }
 0x16e   :  { %v2053_v12 = vadd.f32 %v2052_v17, %v1719_v63  ;;  %v5411_v17 = vld [vmem:[%s10340_s6 + $0x28] sm:$0xf] }
 0x16f   :  { %2417 = vmatpush.bf16.msrb.mxu0 %v5464_v11 }
 0x172   :  { %2149 = vmatmul.bf16.vlgmr.msra.gmra.mxu0 %v1652_v21  ;;  %v5444_v21 = vor.u32 %v6684_v18, %v5443_v55  ;;  %v6383_v55 = vld [vmem:[%s10343_s8 + $0x6c8] sm:$0xf]  ;;  %v5936_v18 = vor.u32 %v6809_v50, %v5935_v16  ;;  %v6893_v16 = vld [vmem:[%s10343_s8 + $0x600] sm:$0xf0] }
 0x173   :  { %2418 = vmatpush.bf16.msrb.mxu0 %v5448_v25  ;;  %v5711_v25 = vld [vmem:[%s10343_s8 + $0x188] sm:$0xf]  ;;  %v6926_v50 = vld [vmem:[%s10344_s1] sm:$0xff]  }
 0x174   :  { %2404 = vmatpush.bf16.msrb.mxu2 %v5444_v21  ;;  %v6802_v21 = vld [vmem:[%s10343_s8 + $0x328] sm:$0xf0]  ;;  %v5712_v34 = vor.u32 %v6753_v29, %v5711_v25 }
 0x175   :  { %v2054_v8 = vpop.f32.mrf.mxu3  ;;  %v5908_v28 = vor.u32 %v6802_v21, %v5907_v20  ;;  %v5599_v20 = vld [vmem:[%s10343_s8 + $0xa8] sm:$0xf]  ;;  %v6886_v29 = vld [vmem:[%s10343_s8 + $0x5c8] sm:$0xf0] }
 0x176   :  { %v2055_v44 = vadd.f32 %v2054_v8, %v1719_v63  ;;  %v6669_v63 = vld [vmem:[%s10340_s6 + $0x4] sm:$0xf]  ;;  %v6355_v8 = vld [vmem:[%s10343_s8 + $0x690] sm:$0xf] }
 0x177   :  { %2419 = vmatpush.bf16.msrb.mxu0 %v5432_v41  ;;  %v5392_v6 = vor.u32 %v6669_v63, %v5389_v43  ;;  %v6907_v41 = vld [vmem:[%s10343_s8 + $0x670] sm:$0xf0] }
 0x178   :  { %2405 = vmatpush.bf16.msrb.mxu2 %v5428_v38  ;;  %v6795_v38 = vld [vmem:[%s10343_s8 + $0x2f0] sm:$0xf0]  ;;  %v6328_v56 = vor.u32 %v6907_v41, %v6327_v39  ;;  %v5767_v41 = vld [vmem:[%s10343_s8 + $0x1f8] sm:$0xf] }
 0x179   :  { %2393 = vmatpush.bf16.msrb.mxu1 %v5392_v6  ;;  %v5880_v46 = vor.u32 %v6795_v38, %v5879_v54  ;;  %v6851_v63 = vld [vmem:[%s10343_s8 + $0x4b0] sm:$0xf0]  ;;  %v5627_v6 = vld [vmem:[%s10343_s8 + $0xe0] sm:$0xf]  ;;  %v6019_v54 = vld [vmem:[%s10343_s8 + $0x3f0] sm:$0xf] }
 0x17a   :  { %v6830_v38 = vld [vmem:[%s10343_s8 + $0x408] sm:$0xf0] }
 0x17b   :  { %2420 = vmatpush.bf16.msrb.mxu0 %v5416_v59  ;;  %v5655_v59 = vld [vmem:[%s10343_s8 + $0x118] sm:$0xf] }
 0x17d   :  { %3878 = vmatpush.bf16.msra.mxu1 %v5936_v18 }
 0x181   :  { %3879 = vmatpush.bf16.msra.mxu1 %v5908_v28  ;;  %v6243_v28 = vld [vmem:[%s10343_s8 + $0x5b0] sm:$0xf] }
 0x185   :  { %v2066_v48 = vpop.f32.mrf.mxu1  ;;  %3880 = vmatpush.bf16.msra.mxu1 %v5880_v46 }
 0x186   :  { %v2067_v19 = vadd.f32 %v2066_v48, %v2053_v12  ;;  %v6676_v48 = vld [vmem:[%s10340_s6 + $0x34] sm:$0xf0]  ;;  %v5400_v12 = vor.u32 %v6670_v9, %v5397_v10 }
 0x187   :  { %v5412_v53 = vor.u32 %v6676_v48, %v5411_v17  ;;  %v6858_v17 = vld [vmem:[%s10343_s8 + $0x4e8] sm:$0xf0] }
 0x188   :  { %2421 = vmatpush.bf16.msrb.mxu0 %v5400_v12  ;;  %v6781_v12 = vld [vmem:[%s10343_s8 + $0x280] sm:$0xf0] }
 0x189   :  { %2406 = vmatpush.bf16.msrb.mxu2 %v5412_v53 }
 0x18d   :  { %v2068_v24 = vpop.f32.mrf.mxu1  ;;  %v2108_v58 = vpop.f32.mrf.mxu3  ;;  %2407 = vmatpush.bf16.msrb.mxu2 %v5396_v7  ;;  %v6732_v7 = vld [vmem:[%s10343_s8 + $0xf8] sm:$0xf0] }
 0x18e   :  { %v2069_v51 = vadd.f32 %v2068_v24, %v2055_v44  ;;  %v2109_v14 = vadd.f32 %v2108_v58, %v1720_v49  ;;  %v6914_v24 = vld [vmem:[%s10343_s8 + $0x6a8] sm:$0xf0]  ;;  %v5683_v44 = vld [vmem:[%s10343_s8 + $0x150] sm:$0xf]  ;;  %v6900_v58 = vld [vmem:[%s10343_s8 + $0x638] sm:$0xf0]  ;;  %v5628_v18 = vor.u32 %v6732_v7, %v5627_v6 }
 0x18f   :  { %v6356_v33 = vor.u32 %v6914_v24, %v6355_v8  ;;  %v5684_v42 = vor.u32 %v6746_v45, %v5683_v44  ;;  %v6300_v10 = vor.u32 %v6900_v58, %v6299_v57  ;;  %v6837_v8 = vld [vmem:[%s10343_s8 + $0x440] sm:$0xf0]  ;;  %v6767_v44 = vld [vmem:[%s10343_s8 + $0x210] sm:$0xf0]  ;;  %v6928_v45 = vunpack.c.h.bf16 %v6926_v50  ;;  %v5739_v57 = vld [vmem:[%s10343_s8 + $0x1c0] sm:$0xf] }
 0x190   :  { %v5768_v46 = vor.u32 %v6767_v44, %v5767_v41  ;;  %v5515_v6 = vld [vmem:[%s10343_s8] sm:$0xf]  ;;  %v6704_v7 = vld [vmem:[%s10343_s8 + $0x18] sm:$0xf0]  ;;  %v6897_v44 = vld [vmem:[%s10343_s8 + $0x624] sm:$0xf] }
 0x191   :  { %v5853_v41 = vld [vmem:[%s10343_s8 + $0x2bc] sm:$0xf0] }
 0x195   :  { %v2122_v4 = vpop.f32.mrf.mxu1 }
 0x196   :  { %v2123_v15 = vadd.f32 %v2122_v4, %v2109_v14  ;;  %v6844_v14 = vld [vmem:[%s10343_s8 + $0x478] sm:$0xf0] }
 0x19d   :  { %v2124_v40 = vpop.f32.mrf.mxu1 }
 0x1c1   :  { %v2080_v61 = vpop.f32.mrf.mxu2 }
 0x1c2   :  { %v2081_v26 = vadd.f32 %v2080_v61, %v2067_v19  ;;  %v5387_v61 = vld [vmem:[%s10340_s6] sm:$0xf]  ;;  %v6921_v19 = vld [vmem:[%s10343_s8 + $0x6e0] sm:$0xf0] }
 0x1c3   :  { %v5388_v1 = vor.u32 %v6671_v62, %v5387_v61  ;;  %v6384_v23 = vor.u32 %v6921_v19, %v6383_v55  ;;  %v6739_v61 = vld [vmem:[%s10343_s8 + $0x130] sm:$0xf0]  ;;  %v6103_v62 = vld [vmem:[%s10343_s8 + $0x498] sm:$0xf] }
 0x1c4   :  { %v5656_v43 = vor.u32 %v6739_v61, %v5655_v59  ;;  %v6104_v2 = vor.u32 %v6851_v63, %v6103_v62  ;;  %v6760_v59 = vld [vmem:[%s10343_s8 + $0x1d8] sm:$0xf0]  ;;  %v6187_v61 = vld [vmem:[%s10343_s8 + $0x540] sm:$0xf]  ;;  %v6806_v63 = vld [vmem:[%s10343_s8 + $0x34c] sm:$0xf] }
 0x1c5   :  { %2379 = vmatpush.bf16.msrb.mxu3 %v5388_v1  ;;  %3906 = vmatpush.bf16.msra.mxu0 %v6384_v23  ;;  %v6047_v23 = vld [vmem:[%s10343_s8 + $0x428] sm:$0xf]  ;;  %v6872_v62 = vld [vmem:[%s10343_s8 + $0x558] sm:$0xf0] }
 0x1c9   :  { %v2082_v30 = vpop.f32.mrf.mxu2  ;;  %3864 = vmatpush.bf16.msra.mxu3 %v5712_v34  ;;  %3907 = vmatpush.bf16.msra.mxu0 %v6356_v33  ;;  %v6927_v33 = vunpack.c.l.bf16 %v6926_v50 }
 0x1ca   :  { %v2083_v0 = vadd.f32 %v2082_v30, %v2069_v51  ;;  %v6159_v30 = vld [vmem:[%s10343_s8 + $0x508] sm:$0xf]  ;;  %v5851_v51 = vld [vmem:[%s10343_s8 + $0x2a0] sm:$0xf] }
 0x1cb   :  { %v5852_v4 = vor.u32 %v6788_v52, %v5851_v51  ;;  %v5991_v51 = vld [vmem:[%s10343_s8 + $0x3b8] sm:$0xf]  ;;  %v6823_v52 = vld [vmem:[%s10343_s8 + $0x3d0] sm:$0xf0] }
 0x1cd   :  { %3865 = vmatpush.bf16.msra.mxu3 %v5684_v42  ;;  %3908 = vmatpush.bf16.msra.mxu0 %v6328_v56 }
 0x1ce   :  { %3881 = vmatpush.bf16.msra.mxu1 %v5852_v4 }
 0x1d1   :  { %v2136_v13 = vpop.f32.mrf.mxu2  ;;  %3866 = vmatpush.bf16.msra.mxu3 %v5656_v43  ;;  %3909 = vmatpush.bf16.msra.mxu0 %v6300_v10 }
 0x1d2   :  { %v2137_v22 = vadd.f32 %v2136_v13, %v2123_v15  ;;  %v6075_v13 = vld [vmem:[%s10343_s8 + $0x460] sm:$0xf]  ;;  %v6271_v15 = vld [vmem:[%s10343_s8 + $0x5e8] sm:$0xf] }
 0x1d3   :  { %v6076_v19 = vor.u32 %v6844_v14, %v6075_v13  ;;  %v6272_v25 = vor.u32 %v6893_v16, %v6271_v15  ;;  %v6188_v13 = vor.u32 %v6872_v62, %v6187_v61  ;;  %v5713_v14 = vld [vmem:[%s10343_s8 + $0x1a4] sm:$0xf0]  ;;  %v6862_v15 = vld [vmem:[%s10343_s8 + $0x50c] sm:$0xf]  ;;  %v5629_v61 = vld [vmem:[%s10343_s8 + $0xfc] sm:$0xf0] }
 0x1d4   :  { %v6161_v16 = vld [vmem:[%s10343_s8 + $0x524] sm:$0xf0]  ;;  %v6841_v62 = vld [vmem:[%s10343_s8 + $0x464] sm:$0xf] }
 0x1d5   :  { %3867 = vmatpush.bf16.msra.mxu3 %v5628_v18  ;;  %3910 = vmatpush.bf16.msra.mxu0 %v6272_v25  ;;  %v6799_v18 = vld [vmem:[%s10343_s8 + $0x314] sm:$0xf] }
 0x1d6   :  { %v6743_v25 = vld [vmem:[%s10343_s8 + $0x154] sm:$0xf] }
 0x1d9   :  { %v2138_v48 = vpop.f32.mrf.mxu2 }
 0x1df   :  { %v2094_v31 = vpop.f32.mrf.mxu0 }
 0x1e0   :  { %v8835_v36 = vadd.f32 %v2094_v31, %v2081_v26  ;;  %v2110_v26 = vpop.f32.mrf.mxu3  ;;  %v6865_v31 = vld [vmem:[%s10343_s8 + $0x520] sm:$0xf0] }
 0x1e1   :  { %v6160_v35 = vor.u32 %v6865_v31, %v6159_v30  ;;  %v2111_v60 = vadd.f32 %v2110_v26, %v1720_v49  ;;  %v6132_v49 = vor.u32 %v6858_v17, %v6131_v47  ;;  %v5795_v26 = vld [vmem:[%s10343_s8 + $0x230] sm:$0xf]  ;;  %v6048_v31 = vor.u32 %v6837_v8, %v6047_v23  ;;  %v5543_v17 = vld [vmem:[%s10343_s8 + $0x38] sm:$0xf] }
 0x1e2   :  { %4329 = vst [vmem:[%s10342_s11] sm:$0xff] %v8835_v36  ;;  %v6020_v47 = vor.u32 %v6830_v38, %v6019_v54 }
 0x1e3   :  { %3892 = vmatpush.bf16.msra.mxu2 %v6160_v35  ;;  %v2125_v53 = vadd.f32 %v2124_v40, %v2111_v60  ;;  %v6718_v35 = vld [vmem:[%s10343_s8 + $0x88] sm:$0xf0]  ;;  %v6244_v40 = vor.u32 %v6886_v29, %v6243_v28  ;;  %v6215_v60 = vld [vmem:[%s10343_s8 + $0x578] sm:$0xf]  ;;  %v6133_v28 = vld [vmem:[%s10343_s8 + $0x4ec] sm:$0xf0] }
 0x1e5   :  { %3911 = vmatpush.bf16.msra.mxu0 %v6244_v40  ;;  %v6785_v40 = vld [vmem:[%s10343_s8 + $0x2a4] sm:$0xf] }
 0x1e7   :  { %v2096_v5 = vpop.f32.mrf.mxu0  ;;  %3893 = vmatpush.bf16.msra.mxu2 %v6132_v49  ;;  %v6711_v49 = vld [vmem:[%s10343_s8 + $0x50] sm:$0xf0] }
 0x1e8   :  { %v8896_v11 = vadd.f32 %v2096_v5, %v2083_v0  ;;  %v2139_v0 = vadd.f32 %v2138_v48, %v2125_v53  ;;  %v5823_v5 = vld [vmem:[%s10343_s8 + $0x268] sm:$0xf]  ;;  %v5544_v43 = vor.u32 %v6711_v49, %v5543_v17  ;;  %v6848_v17 = vld [vmem:[%s10343_s8 + $0x49c] sm:$0xf] }
 0x1e9   :  { %v5824_v21 = vor.u32 %v6781_v12, %v5823_v5  ;;  %v6385_v5 = vld [vmem:[%s10343_s8 + $0x6e4] sm:$0xf0]  ;;  %v5740_v12 = vor.u32 %v6760_v59, %v5739_v57  ;;  %v6729_v59 = vld [vmem:[%s10343_s8 + $0xe4] sm:$0xf] }
 0x1ea   :  { %4331 = vst [vmem:[%s10342_s11 + $0x10] sm:$0xff] %v8896_v11  ;;  %v6273_v57 = vld [vmem:[%s10343_s8 + $0x604] sm:$0xf0] }
 0x1eb   :  { %3894 = vmatpush.bf16.msra.mxu2 %v6104_v2  ;;  %3882 = vmatpush.bf16.msra.mxu1 %v5824_v21  ;;  %v5992_v2 = vor.u32 %v6823_v52, %v5991_v51  ;;  %v6357_v21 = vld [vmem:[%s10343_s8 + $0x6ac] sm:$0xf0]  ;;  %v6778_v51 = vld [vmem:[%s10343_s8 + $0x26c] sm:$0xf]  ;;  %v5825_v52 = vld [vmem:[%s10343_s8 + $0x284] sm:$0xf0] }
 0x1ef   :  { %v2150_v27 = vpop.f32.mrf.mxu0  ;;  %3895 = vmatpush.bf16.msra.mxu2 %v6076_v19  ;;  %v5909_v19 = vld [vmem:[%s10343_s8 + $0x32c] sm:$0xf0] }
 0x1f0   :  { %v2151_v32 = vadd.f32 %v2150_v27, %v2137_v22  ;;  %v6725_v22 = vld [vmem:[%s10343_s8 + $0xc0] sm:$0xf0]  ;;  %v6774_v27 = vld [vmem:[%s10343_s8 + $0x248] sm:$0xf0]  ;;  %v5912_v29 = vor.u32 %v6799_v18, %v5909_v19  ;;  %v6715_v18 = vld [vmem:[%s10343_s8 + $0x74] sm:$0xf] }
 0x1f1   :  { %v5600_v30 = vor.u32 %v6725_v22, %v5599_v20  ;;  %v5796_v34 = vor.u32 %v6774_v27, %v5795_v26  ;;  %v6911_v20 = vld [vmem:[%s10343_s8 + $0x694] sm:$0xf]  ;;  %v5516_v22 = vor.u32 %v6704_v7, %v5515_v6  ;;  %v5685_v26 = vld [vmem:[%s10343_s8 + $0x16c] sm:$0xf0]  ;;  %v6722_v7 = vld [vmem:[%s10343_s8 + $0xac] sm:$0xf] }
 0x1f2   :  { %v2155_v37 = vmul.f32 0.5, %v2151_v32  ;;  %4330 = vst [vmem:[%s10342_s11 + $0x8] sm:$0xff] %v2151_v32  ;;  %v5571_v32 = vld [vmem:[%s10343_s8 + $0x70] sm:$0xf]  ;;  %v6855_v27 = vld [vmem:[%s10343_s8 + $0x4d4] sm:$0xf] }
 0x1f3   :  { %3868 = vmatpush.bf16.msra.mxu3 %v5600_v30  ;;  %3896 = vmatpush.bf16.msra.mxu2 %v6048_v31  ;;  %v5572_v42 = vor.u32 %v6718_v35, %v5571_v32  ;;  %v6360_v30 = vor.u32 %v6911_v20, %v6357_v21  ;;  %v6792_v31 = vld [vmem:[%s10343_s8 + $0x2dc] sm:$0xf]  ;;  %v5881_v32 = vld [vmem:[%s10343_s8 + $0x2f4] sm:$0xf0]  ;;  %v5688_v35 = vor.u32 %v6743_v25, %v5685_v26  ;;  %v5573_v19 = vld [vmem:[%s10343_s8 + $0x8c] sm:$0xf0] }
 0x1f4   :  { %v2157_v1 = vmul.f32 1.442695, %v2155_v37  ;;  %v6879_v37 = vld [vmem:[%s10343_s8 + $0x590] sm:$0xf0]  ;;  %3883 = vmatpush.bf16.msra.mxu1 %v5796_v34  ;;  %v6329_v34 = vld [vmem:[%s10343_s8 + $0x674] sm:$0xf0]  ;;  %v6136_v54 = vor.u32 %v6855_v27, %v6133_v28  ;;  %v5884_v38 = vor.u32 %v6792_v31, %v5881_v32  ;;  %v5576_v21 = vor.u32 %v6715_v18, %v5573_v19 }
 0x1f5   :  { %v6216_v56 = vor.u32 %v6879_v37, %v6215_v60  ;;  %v5856_v60 = vor.u32 %v6785_v40, %v5853_v41  ;;  %v6827_v20 = vld [vmem:[%s10343_s8 + $0x3f4] sm:$0xf]  ;;  %v6869_v25 = vld [vmem:[%s10343_s8 + $0x544] sm:$0xf]  ;;  %v6189_v27 = vld [vmem:[%s10343_s8 + $0x55c] sm:$0xf0] }
 0x1f6   :  { %6929 = vpow2.f32 %v2157_v1  ;;  %v6918_v1 = vld [vmem:[%s10343_s8 + $0x6cc] sm:$0xf]  ;;  %v6192_v28 = vor.u32 %v6869_v25, %v6189_v27  ;;  %v6820_v31 = vld [vmem:[%s10343_s8 + $0x3bc] sm:$0xf]  ;;  %v5965_v40 = vld [vmem:[%s10343_s8 + $0x39c] sm:$0xf0] }
 0x1f7   :  { %v2152_v3 = vpop.f32.mrf.mxu0  ;;  %3869 = vmatpush.bf16.msra.mxu3 %v5572_v42  ;;  %3897 = vmatpush.bf16.msra.mxu2 %v6020_v47  ;;  %v6736_v42 = vld [vmem:[%s10343_s8 + $0x11c] sm:$0xf]  ;;  %v5657_v47 = vld [vmem:[%s10343_s8 + $0x134] sm:$0xf0]  ;;  %v6167_v18 = vld [vmem:[%s10343_s8 + $0x510] sm:$0xf] }
 0x1f8   :  { %v2153_v9 = vadd.f32 %v2152_v3, %v2139_v0  ;;  %v5937_v0 = vld [vmem:[%s10343_s8 + $0x364] sm:$0xf0]  ;;  %3884 = vmatpush.bf16.msra.mxu1 %v5768_v46  ;;  %3912 = vmatpush.bf16.msra.mxu0 %v6216_v56  ;;  %v6105_v46 = vld [vmem:[%s10343_s8 + $0x4b4] sm:$0xf0]  ;;  %v6890_v56 = vld [vmem:[%s10343_s8 + $0x5ec] sm:$0xf] }
 0x1f9   :  { %v5940_v50 = vor.u32 %v6806_v63, %v5937_v0  ;;  %v6108_v49 = vor.u32 %v6848_v17, %v6105_v46  ;;  %v5632_v63 = vor.u32 %v6729_v59, %v5629_v61  ;;  %v6077_v0 = vld [vmem:[%s10343_s8 + $0x47c] sm:$0xf0]  ;;  %v6391_v61 = vld [vmem:[%s10343_s8 + $0x6d0] sm:$0xf]  ;;  %v6866_v19 = vld [vmem:[%s10343_s8 + $0x528] sm:$0xf0] }
 0x1fa   :  { %v2156_v55 = vmul.f32 0.5, %v2153_v9  ;;  %4332 = vst [vmem:[%s10342_s11 + $0x18] sm:$0xff] %v2153_v9  ;;  %v6750_v9 = vld [vmem:[%s10343_s8 + $0x18c] sm:$0xf]  ;;  %v6335_v27 = vld [vmem:[%s10343_s8 + $0x660] sm:$0xf] }
 0x1fb   :  { %3870 = vmatpush.bf16.msra.mxu3 %v5544_v43  ;;  %3898 = vmatpush.bf16.msra.mxu2 %v5992_v2  ;;  %v5716_v8 = vor.u32 %v6750_v9, %v5713_v14  ;;  %v6771_v43 = vld [vmem:[%s10343_s8 + $0x234] sm:$0xf]  ;;  %v5797_v2 = vld [vmem:[%s10343_s8 + $0x24c] sm:$0xf0]  ;;  %v6834_v9 = vld [vmem:[%s10343_s8 + $0x42c] sm:$0xf] }
 0x1fc   :  { %v2159_v24 = vmul.f32 1.442695, %v2156_v55  ;;  %v6930_v39 = vpop.eup %6929  ;;  %v6388_v55 = vor.u32 %v6918_v1, %v6385_v5  ;;  %3885 = vmatpush.bf16.msra.mxu1 %v5740_v12  ;;  %3913 = vmatpush.bf16.msra.mxu0 %v6188_v13  ;;  %v6080_v1 = vor.u32 %v6841_v62, %v6077_v0  ;;  %v6245_v5 = vld [vmem:[%s10343_s8 + $0x5cc] sm:$0xf0]  ;;  %v6764_v13 = vld [vmem:[%s10343_s8 + $0x1fc] sm:$0xf] }
 0x1fd   :  { %v2165_v48 = vmul.f32 %v6930_v39, %v6927_v33  ;;  %v6904_v33 = vld [vmem:[%s10343_s8 + $0x65c] sm:$0xf]  ;;  %v5769_v14 = vld [vmem:[%s10343_s8 + $0x214] sm:$0xf0]  ;;  %v6922_v62 = vld [vmem:[%s10343_s8 + $0x6e8] sm:$0xf0] }
 0x1fe   :  { %6931 = vpow2.f32 %v2159_v24  ;;  %v6164_v24 = vor.u32 %v6862_v15, %v6161_v16  ;;  %v6332_v39 = vor.u32 %v6904_v33, %v6329_v34  ;;  %v6876_v15 = vld [vmem:[%s10343_s8 + $0x57c] sm:$0xf]  ;;  %v5772_v16 = vor.u32 %v6764_v13, %v5769_v14  ;;  %v5993_v33 = vld [vmem:[%s10343_s8 + $0x3d4] sm:$0xf0] }
 0x1ff   :  { %v2167_v3 = vadd.f32 %v2165_v48, %v8835_v36  ;;  %v5963_v36 = vld [vmem:[%s10343_s8 + $0x380] sm:$0xf]  ;;  %3871 = vmatpush.bf16.msra.mxu3 %v5516_v22  ;;  %v5660_v48 = vor.u32 %v6736_v42, %v5657_v47  ;;  %v6021_v22 = vld [vmem:[%s10343_s8 + $0x40c] sm:$0xf0]  ;;  %v5996_v34 = vor.u32 %v6820_v31, %v5993_v33  ;;  %v5691_v31 = vld [vmem:[%s10343_s8 + $0x158] sm:$0xf] }
 0x204   :  { %v6932_v53 = vpop.eup %6931 }
 0x205   :  { %v2166_v58 = vmul.f32 %v6932_v53, %v6928_v45  ;;  %v6301_v45 = vld [vmem:[%s10343_s8 + $0x63c] sm:$0xf0]  ;;  %v5828_v53 = vor.u32 %v6778_v51, %v5825_v52 }
 0x206   :  { %v6304_v37 = vor.u32 %v6897_v44, %v6301_v45  ;;  %v2202_v44 = vld [vmem:[%s10345_s7] sm:$0xf] }
 0x207   :  { %v2168_v4 = vadd.f32 %v2166_v58, %v8896_v11  ;;  %v6816_v11 = vld [vmem:[%s10343_s8 + $0x398] sm:$0xf0]  ;;  %v6276_v58 = vor.u32 %v6890_v56, %v6273_v57  ;;  %v2207_v42 = vperm.slane %v2202_v44, 3  ;;  %v2204_v51 = vperm.slane %v2202_v44, 0  ;;  %v5943_v56 = vld [vmem:[%s10343_s8 + $0x350] sm:$0xf] }
 0x208   :  { %v5964_v23 = vor.u32 %v6816_v11, %v5963_v36  ;;  %v5601_v36 = vld [vmem:[%s10343_s8 + $0xc4] sm:$0xf0]  ;;  %v6810_v57 = vld [vmem:[%s10343_s8 + $0x368] sm:$0xf0] }
 0x209   :  { %v2169_v10 = vpack.c.bf16 %v2168_v4, %v2167_v3  ;;  %v5800_v3 = vor.u32 %v6771_v43, %v5797_v2  ;;  %v6883_v4 = vld [vmem:[%s10343_s8 + $0x5b4] sm:$0xf]  ;;  %v5604_v11 = vor.u32 %v6722_v7, %v5601_v36  ;;  %v5944_v2 = vor.u32 %v6810_v57, %v5943_v56  ;;  %v6894_v56 = vld [vmem:[%s10343_s8 + $0x608] sm:$0xf0] }
 0x20a   :  { %3899 = vmatpush.bf16.msra.mxu2 %v5964_v23  ;;  %v6248_v6 = vor.u32 %v6883_v4, %v6245_v5  ;;  %v6024_v23 = vor.u32 %v6827_v20, %v6021_v22  ;;  %v6392_v5 = vor.u32 %v6922_v62, %v6391_v61  ;;  %v6803_v7 = vld [vmem:[%s10343_s8 + $0x330] sm:$0xf0]  ;;  %v6083_v62 = vld [vmem:[%s10343_s8 + $0x468] sm:$0xf] }
 0x20b   :  { %2380 = vmatmul.bf16.vlgmr.msrb.gmra.mxu3 %v2169_v10  ;;  %2394 = vmatmul.bf16.vlgmr.msrb.gmra.mxu1 %v2169_v10 }
 0x20c   :  { %2408 = vmatmul.bf16.vlgmr.msrb.gmra.mxu2 %v2169_v10  ;;  %2422 = vmatmul.bf16.vlgmr.msrb.gmra.mxu0 %v2169_v10  ;;  %v6049_v10 = vld [vmem:[%s10343_s8 + $0x444] sm:$0xf0] }
 0x20d   :  { %3934 = vmatpush.bf16.msrb.mxu1 %v5940_v50  ;;  %3962 = vmatpush.bf16.msrb.mxu0 %v6388_v55  ;;  %v6052_v12 = vor.u32 %v6834_v9, %v6049_v10  ;;  %v6217_v50 = vld [vmem:[%s10343_s8 + $0x594] sm:$0xf0] }
 0x20e   :  { %3920 = vmatpush.bf16.msrb.mxu3 %v5716_v8  ;;  %3948 = vmatpush.bf16.msrb.mxu2 %v6164_v24  ;;  %v6220_v55 = vor.u32 %v6876_v15, %v6217_v50  ;;  %v6757_v8 = vld [vmem:[%s10343_s8 + $0x1c4] sm:$0xf]  ;;  %v5741_v24 = vld [vmem:[%s10343_s8 + $0x1dc] sm:$0xf0]  ;;  %v6363_v10 = vld [vmem:[%s10343_s8 + $0x698] sm:$0xf] }
 0x20f   :  { %v5744_v26 = vor.u32 %v6757_v8, %v5741_v24  ;;  %v5719_v15 = vld [vmem:[%s10343_s8 + $0x190] sm:$0xf]  ;;  %v6796_v8 = vld [vmem:[%s10343_s8 + $0x2f8] sm:$0xf0] }
 0x211   :  { %3935 = vmatpush.bf16.msrb.mxu1 %v5912_v29  ;;  %3963 = vmatpush.bf16.msrb.mxu0 %v6360_v30  ;;  %v6708_v29 = vld [vmem:[%s10343_s8 + $0x3c] sm:$0xf]  ;;  %v5545_v30 = vld [vmem:[%s10343_s8 + $0x54] sm:$0xf0] }
 0x212   :  { %3921 = vmatpush.bf16.msrb.mxu3 %v5688_v35  ;;  %3949 = vmatpush.bf16.msrb.mxu2 %v6136_v54  ;;  %v5548_v32 = vor.u32 %v6708_v29, %v5545_v30  ;;  %v6701_v35 = vld [vmem:[%s10343_s8 + $0x4] sm:$0xf]  ;;  %v5517_v54 = vld [vmem:[%s10343_s8 + $0x1c] sm:$0xf0]  ;;  %v6168_v30 = vor.u32 %v6866_v19, %v6167_v18  ;;  %v5579_v19 = vld [vmem:[%s10343_s8 + $0x78] sm:$0xf] }
 0x215   :  { %3936 = vmatpush.bf16.msrb.mxu1 %v5884_v38  ;;  %3964 = vmatpush.bf16.msrb.mxu0 %v6332_v39  ;;  %v5520_v38 = vor.u32 %v6701_v35, %v5517_v54  ;;  %v6813_v39 = vld [vmem:[%s10343_s8 + $0x384] sm:$0xf]  ;;  %v6139_v35 = vld [vmem:[%s10343_s8 + $0x4d8] sm:$0xf]  ;;  %v6859_v54 = vld [vmem:[%s10343_s8 + $0x4f0] sm:$0xf0] }
 0x216   :  { %3922 = vmatpush.bf16.msrb.mxu3 %v5660_v48  ;;  %3950 = vmatpush.bf16.msrb.mxu2 %v6108_v49  ;;  %v5968_v41 = vor.u32 %v6813_v39, %v5965_v40  ;;  %v5859_v39 = vld [vmem:[%s10343_s8 + $0x2a8] sm:$0xf]  ;;  %v6789_v40 = vld [vmem:[%s10343_s8 + $0x2c0] sm:$0xf0] }
 0x219   :  { %3937 = vmatpush.bf16.msrb.mxu1 %v5856_v60  ;;  %3965 = vmatpush.bf16.msrb.mxu0 %v6304_v37  ;;  %v2205_v37 = vperm.slane %v2202_v44, 1 }
 0x21a   :  { %3923 = vmatpush.bf16.msrb.mxu3 %v5632_v63  ;;  %3951 = vmatpush.bf16.msrb.mxu2 %v6080_v1 }
 0x21d   :  { %3938 = vmatpush.bf16.msrb.mxu1 %v5828_v53  ;;  %3966 = vmatpush.bf16.msrb.mxu0 %v6276_v58  ;;  %v2206_v58 = vperm.slane %v2202_v44, 2  ;;  %v6307_v44 = vld [vmem:[%s10343_s8 + $0x628] sm:$0xf] }
 0x21e   :  { %3924 = vmatpush.bf16.msrb.mxu3 %v5604_v11  ;;  %3952 = vmatpush.bf16.msrb.mxu2 %v6052_v12  ;;  %v6915_v12 = vld [vmem:[%s10343_s8 + $0x6b0] sm:$0xf0] }
 0x21f   :  { %v6364_v22 = vor.u32 %v6915_v12, %v6363_v10  ;;  %v6055_v10 = vld [vmem:[%s10343_s8 + $0x430] sm:$0xf]  ;;  %v6838_v12 = vld [vmem:[%s10343_s8 + $0x448] sm:$0xf0] }
 0x220   :  { %v6056_v18 = vor.u32 %v6838_v12, %v6055_v10  ;;  %v6856_v10 = vld [vmem:[%s10343_s8 + $0x4dc] sm:$0xf]  ;;  %v6141_v12 = vld [vmem:[%s10343_s8 + $0x4f4] sm:$0xf0] }
 0x221   :  { %3939 = vmatpush.bf16.msrb.mxu1 %v5800_v3  ;;  %3967 = vmatpush.bf16.msrb.mxu0 %v6248_v6  ;;  %v5915_v6 = vld [vmem:[%s10343_s8 + $0x318] sm:$0xf] }
 0x222   :  { %3925 = vmatpush.bf16.msrb.mxu3 %v5576_v21  ;;  %3953 = vmatpush.bf16.msrb.mxu2 %v6024_v23  ;;  %v5887_v23 = vld [vmem:[%s10343_s8 + $0x2e0] sm:$0xf] }
 0x225   :  { %3940 = vmatpush.bf16.msrb.mxu1 %v5772_v16  ;;  %3968 = vmatpush.bf16.msrb.mxu0 %v6220_v55  ;;  %v6754_v16 = vld [vmem:[%s10343_s8 + $0x1a8] sm:$0xf0]  ;;  %v5916_v55 = vor.u32 %v6803_v7, %v5915_v6  ;;  %v5607_v7 = vld [vmem:[%s10343_s8 + $0xb0] sm:$0xf] }
 0x226   :  { %3926 = vmatpush.bf16.msrb.mxu3 %v5548_v32  ;;  %3954 = vmatpush.bf16.msrb.mxu2 %v5996_v34  ;;  %v6747_v32 = vld [vmem:[%s10343_s8 + $0x170] sm:$0xf0]  ;;  %v5888_v34 = vor.u32 %v6796_v8, %v5887_v23  ;;  %v5747_v8 = vld [vmem:[%s10343_s8 + $0x1c8] sm:$0xf] }
 0x227   :  { %v6831_v23 = vld [vmem:[%s10343_s8 + $0x410] sm:$0xf0] }
 0x229   :  { %3941 = vmatpush.bf16.msrb.mxu1 %v5744_v26  ;;  %3969 = vmatpush.bf16.msrb.mxu0 %v6192_v28  ;;  %v5720_v26 = vor.u32 %v6754_v16, %v5719_v15  ;;  %v6908_v28 = vld [vmem:[%s10343_s8 + $0x678] sm:$0xf0] }
 0x22a   :  { %3927 = vmatpush.bf16.msrb.mxu3 %v5520_v38  ;;  %3955 = vmatpush.bf16.msrb.mxu2 %v5968_v41  ;;  %v6336_v38 = vor.u32 %v6908_v28, %v6335_v27  ;;  %v5692_v41 = vor.u32 %v6747_v32, %v5691_v31  ;;  %v6768_v15 = vld [vmem:[%s10343_s8 + $0x218] sm:$0xf0]  ;;  %v6873_v27 = vld [vmem:[%s10343_s8 + $0x560] sm:$0xf0]  ;;  %v5945_v31 = vld [vmem:[%s10343_s8 + $0x36c] sm:$0xf0] }
 0x22b   :  { %v6919_v32 = vld [vmem:[%s10343_s8 + $0x6d4] sm:$0xf] }
 0x288   :  { %v2395_v45 = vpop.f32.mrf.mxu1 }
 0x289   :  { %v2423_v60 = vpop.f32.mrf.mxu0  ;;  %v2396_v17 = vadd.f32 %v2395_v45, %v2205_v37  ;;  %v6901_v45 = vld [vmem:[%s10343_s8 + $0x640] sm:$0xf0] }
 0x28a   :  { %v2424_v46 = vadd.f32 %v2423_v60, %v2207_v42  ;;  %v6140_v60 = vor.u32 %v6859_v54, %v6139_v35  ;;  %v6393_v35 = vld [vmem:[%s10343_s8 + $0x6ec] sm:$0xf0]  ;;  %v5551_v54 = vld [vmem:[%s10343_s8 + $0x40] sm:$0xf] }
 0x28b   :  { %v2429_v63 = vmax.f32 %v2396_v17, 0.0  ;;  %v6111_v17 = vld [vmem:[%s10343_s8 + $0x4a0] sm:$0xf] }
 0x28c   :  { %v2431_v1 = vmax.f32 %v2424_v46, 0.0  ;;  %v6308_v46 = vor.u32 %v6901_v45, %v6307_v44 }
 0x28e   :  { %v2381_v47 = vpop.f32.mrf.mxu3 }
 0x28f   :  { %v2409_v48 = vpop.f32.mrf.mxu2  ;;  %v2382_v3 = vadd.f32 %v2381_v47, %v2204_v51  ;;  %v5860_v47 = vor.u32 %v6789_v40, %v5859_v39  ;;  %v5999_v40 = vld [vmem:[%s10343_s8 + $0x3c0] sm:$0xf] }
 0x290   :  { %v2397_v49 = vpop.f32.mrf.mxu1  ;;  %v2410_v36 = vadd.f32 %v2409_v48, %v2206_v58  ;;  %v6852_v48 = vld [vmem:[%s10343_s8 + $0x4b8] sm:$0xf0] }
 0x291   :  { %v2398_v52 = vadd.f32 %v2397_v49, %v2205_v37  ;;  %v2425_v53 = vpop.f32.mrf.mxu0  ;;  %v2428_v20 = vmax.f32 %v2382_v3, 0.0  ;;  %v5663_v37 = vld [vmem:[%s10343_s8 + $0x120] sm:$0xf]  ;;  %v5831_v49 = vld [vmem:[%s10343_s8 + $0x270] sm:$0xf]  ;;  %v6112_v57 = vor.u32 %v6852_v48, %v6111_v17 }
 0x292   :  { %v2426_v59 = vadd.f32 %v2425_v53, %v2207_v42  ;;  %v2430_v24 = vmax.f32 %v2410_v36, 0.0  ;;  %v6740_v42 = vld [vmem:[%s10343_s8 + $0x138] sm:$0xf0]  ;;  %v6279_v53 = vld [vmem:[%s10343_s8 + $0x5f0] sm:$0xf] }
 0x293   :  { %v2433_v0 = vmax.f32 %v2398_v52, 0.0  ;;  %v5664_v52 = vor.u32 %v6740_v42, %v5663_v37  ;;  %v6251_v3 = vld [vmem:[%s10343_s8 + $0x5b8] sm:$0xf]  ;;  %v6726_v36 = vld [vmem:[%s10343_s8 + $0xc8] sm:$0xf0]  ;;  %v6396_v37 = vor.u32 %v6919_v32, %v6393_v35 }
 0x294   :  { %v2435_v43 = vmax.f32 %v2426_v59, 0.0  ;;  %v6733_v59 = vld [vmem:[%s10343_s8 + $0x100] sm:$0xf0]  ;;  %v5608_v16 = vor.u32 %v6726_v36, %v5607_v7  ;;  %v6912_v17 = vld [vmem:[%s10343_s8 + $0x69c] sm:$0xf] }
 0x295   :  { %v9316_v4 = vpack.c.bf16 %v2433_v0, %v2429_v63  ;;  %v6845_v63 = vld [vmem:[%s10343_s8 + $0x480] sm:$0xf0]  ;;  %v6280_v0 = vor.u32 %v6894_v56, %v6279_v53  ;;  %v6365_v48 = vld [vmem:[%s10343_s8 + $0x6b4] sm:$0xf0]  ;;  %v6751_v56 = vld [vmem:[%s10343_s8 + $0x194] sm:$0xf] }
 0x296   :  { %v9324_v11 = vpack.c.bf16 %v2435_v43, %v2431_v1  ;;  %v2383_v9 = vpop.f32.mrf.mxu3  ;;  %v5803_v1 = vld [vmem:[%s10343_s8 + $0x238] sm:$0xf]  ;;  %v6775_v43 = vld [vmem:[%s10343_s8 + $0x250] sm:$0xf0]  ;;  %v6084_v6 = vor.u32 %v6845_v63, %v6083_v62  ;;  %v6817_v53 = vld [vmem:[%s10343_s8 + $0x3a0] sm:$0xf0]  ;;  %v6368_v62 = vor.u32 %v6912_v17, %v6365_v48 }
 0x297   :  { %v2384_v13 = vadd.f32 %v2383_v9, %v2204_v51  ;;  %v2411_v14 = vpop.f32.mrf.mxu2  ;;  %3886 = vmatmul.bf16.vlgmr.msra.gmra.mxu1 %v9316_v4  ;;  %v6782_v51 = vld [vmem:[%s10343_s8 + $0x288] sm:$0xf0]  ;;  %v5804_v9 = vor.u32 %v6775_v43, %v5803_v1  ;;  %v5889_v1 = vld [vmem:[%s10343_s8 + $0x2fc] sm:$0xf0]  ;;  %v6744_v7 = vld [vmem:[%s10343_s8 + $0x15c] sm:$0xf] }
 0x298   :  { %v2412_v50 = vadd.f32 %v2411_v14, %v2206_v58  ;;  %3914 = vmatmul.bf16.vlgmr.msra.gmra.mxu0 %v9324_v11  ;;  %3990 = vmatpush.bf16.msra.mxu1 %v5944_v2  ;;  %v5635_v58 = vld [vmem:[%s10343_s8 + $0xe8] sm:$0xf]  ;;  %v5832_v61 = vor.u32 %v6782_v51, %v5831_v49  ;;  %v5775_v14 = vld [vmem:[%s10343_s8 + $0x200] sm:$0xf]  ;;  %v6705_v51 = vld [vmem:[%s10343_s8 + $0x20] sm:$0xf0] }
 0x299   :  { %v2432_v21 = vmax.f32 %v2384_v13, 0.0  ;;  %4018 = vmatpush.bf16.msra.mxu0 %v6392_v5  ;;  %v5636_v2 = vor.u32 %v6733_v59, %v5635_v58  ;;  %v6887_v5 = vld [vmem:[%s10343_s8 + $0x5d0] sm:$0xf0]  ;;  %v5523_v49 = vld [vmem:[%s10343_s8 + $0x8] sm:$0xf] }
 0x29a   :  { %v2434_v25 = vmax.f32 %v2412_v50, 0.0  ;;  %v6252_v13 = vor.u32 %v6887_v5, %v6251_v3  ;;  %v6223_v50 = vld [vmem:[%s10343_s8 + $0x580] sm:$0xf]  ;;  %v6863_v59 = vld [vmem:[%s10343_s8 + $0x514] sm:$0xf]  ;;  %v5524_v63 = vor.u32 %v6705_v51, %v5523_v49 }
 0x29b   :  { %v9358_v29 = vpack.c.bf16 %v2432_v21, %v2428_v20  ;;  %v6719_v20 = vld [vmem:[%s10343_s8 + $0x90] sm:$0xf0]  ;;  %v5776_v21 = vor.u32 %v6768_v15, %v5775_v14  ;;  %v6905_v3 = vld [vmem:[%s10343_s8 + $0x664] sm:$0xf]  ;;  %v6337_v5 = vld [vmem:[%s10343_s8 + $0x67c] sm:$0xf0] }
 0x29c   :  { %v9366_v33 = vpack.c.bf16 %v2434_v25, %v2430_v24  ;;  %3991 = vmatpush.bf16.msra.mxu1 %v5916_v55  ;;  %v6880_v55 = vld [vmem:[%s10343_s8 + $0x598] sm:$0xf0]  ;;  %v6761_v25 = vld [vmem:[%s10343_s8 + $0x1e0] sm:$0xf0]  ;;  %v5580_v28 = vor.u32 %v6719_v20, %v5579_v19  ;;  %v5693_v36 = vld [vmem:[%s10343_s8 + $0x174] sm:$0xf0] }
 0x29d   :  { %4019 = vmatpush.bf16.msra.mxu0 %v6364_v22  ;;  %3872 = vmatmul.bf16.vlgmr.msra.gmra.mxu3 %v9358_v29  ;;  %v6027_v22 = vld [vmem:[%s10343_s8 + $0x3f8] sm:$0xf]  ;;  %v6224_v24 = vor.u32 %v6880_v55, %v6223_v50  ;;  %v5748_v39 = vor.u32 %v6761_v25, %v5747_v8  ;;  %v6786_v14 = vld [vmem:[%s10343_s8 + $0x2ac] sm:$0xf]  ;;  %v5861_v15 = vld [vmem:[%s10343_s8 + $0x2c4] sm:$0xf0] }
 0x29e   :  { %3900 = vmatmul.bf16.vlgmr.msra.gmra.mxu2 %v9366_v33  ;;  %3976 = vmatpush.bf16.msra.mxu3 %v5720_v26  ;;  %v6195_v26 = vld [vmem:[%s10343_s8 + $0x548] sm:$0xf]  ;;  %v6898_v50 = vld [vmem:[%s10343_s8 + $0x62c] sm:$0xf]  ;;  %v6737_v19 = vld [vmem:[%s10343_s8 + $0x124] sm:$0xf] }
 0x29f   :  { %4004 = vmatpush.bf16.msra.mxu2 %v6168_v30  ;;  %v6807_v30 = vld [vmem:[%s10343_s8 + $0x354] sm:$0xf]  ;;  %v6196_v44 = vor.u32 %v6873_v27, %v6195_v26  ;;  %v6309_v55 = vld [vmem:[%s10343_s8 + $0x644] sm:$0xf0]  ;;  %v5665_v20 = vld [vmem:[%s10343_s8 + $0x13c] sm:$0xf0] }
 0x2a0   :  { %3992 = vmatpush.bf16.msra.mxu1 %v5888_v34  ;;  %v6028_v34 = vor.u32 %v6831_v23, %v6027_v22  ;;  %v5948_v45 = vor.u32 %v6807_v30, %v5945_v31  ;;  %v6849_v22 = vld [vmem:[%s10343_s8 + $0x4a4] sm:$0xf]  ;;  %v6113_v23 = vld [vmem:[%s10343_s8 + $0x4bc] sm:$0xf0]  ;;  %v6312_v8 = vor.u32 %v6898_v50, %v6309_v55  ;;  %v5833_v25 = vld [vmem:[%s10343_s8 + $0x28c] sm:$0xf0]  ;;  %v5668_v26 = vor.u32 %v6737_v19, %v5665_v20 }
 0x2a1   :  { %4020 = vmatpush.bf16.msra.mxu0 %v6336_v38  ;;  %v6712_v38 = vld [vmem:[%s10343_s8 + $0x58] sm:$0xf0]  ;;  %v6891_v27 = vld [vmem:[%s10343_s8 + $0x5f4] sm:$0xf]  ;;  %v6116_v30 = vor.u32 %v6849_v22, %v6113_v23  ;;  %v6730_v31 = vld [vmem:[%s10343_s8 + $0xec] sm:$0xf] }
 0x2a2   :  { %3977 = vmatpush.bf16.msra.mxu3 %v5692_v41  ;;  %v6824_v41 = vld [vmem:[%s10343_s8 + $0x3d8] sm:$0xf0]  ;;  %v5552_v42 = vor.u32 %v6712_v38, %v5551_v54  ;;  %v5637_v32 = vld [vmem:[%s10343_s8 + $0x104] sm:$0xf0]  ;;  %v6842_v35 = vld [vmem:[%s10343_s8 + $0x46c] sm:$0xf] }
 0x2a3   :  { %4005 = vmatpush.bf16.msra.mxu2 %v6140_v60  ;;  %v6800_v60 = vld [vmem:[%s10343_s8 + $0x31c] sm:$0xf]  ;;  %v6085_v54 = vld [vmem:[%s10343_s8 + $0x484] sm:$0xf0]  ;;  %v6835_v17 = vld [vmem:[%s10343_s8 + $0x434] sm:$0xf] }
 0x2a4   :  { %3993 = vmatpush.bf16.msra.mxu1 %v5860_v47  ;;  %v5917_v47 = vld [vmem:[%s10343_s8 + $0x334] sm:$0xf0]  ;;  %v6057_v48 = vld [vmem:[%s10343_s8 + $0x44c] sm:$0xf0]  ;;  %v6765_v49 = vld [vmem:[%s10343_s8 + $0x204] sm:$0xf] }
 0x2a5   :  { %4021 = vmatpush.bf16.msra.mxu0 %v6308_v46  ;;  %v6000_v46 = vor.u32 %v6824_v41, %v5999_v40  ;;  %v5920_v58 = vor.u32 %v6800_v60, %v5917_v47  ;;  %v5805_v40 = vld [vmem:[%s10343_s8 + $0x254] sm:$0xf0]  ;;  %v5640_v41 = vor.u32 %v6730_v31, %v5637_v32  ;;  %v6088_v60 = vor.u32 %v6842_v35, %v6085_v54  ;;  %v5777_v51 = vld [vmem:[%s10343_s8 + $0x21c] sm:$0xf0]  ;;  %v6916_v23 = vld [vmem:[%s10343_s8 + $0x6b8] sm:$0xf0] }
 0x2a6   :  { %3978 = vmatpush.bf16.msra.mxu3 %v5664_v52  ;;  %v5971_v52 = vld [vmem:[%s10343_s8 + $0x388] sm:$0xf]  ;;  %v6371_v22 = vld [vmem:[%s10343_s8 + $0x6a0] sm:$0xf]  ;;  %v6175_v32 = vld [vmem:[%s10343_s8 + $0x518] sm:$0xf] }
 0x2a7   :  { %4006 = vmatpush.bf16.msra.mxu2 %v6112_v57  ;;  %3942 = vmatmul.bf16.vlgmr.msrb.gmra.mxu1 %v9316_v4  ;;  %v5721_v57 = vld [vmem:[%s10343_s8 + $0x1ac] sm:$0xf0]  ;;  %v5972_v43 = vor.u32 %v6817_v53, %v5971_v52  ;;  %v6877_v53 = vld [vmem:[%s10343_s8 + $0x584] sm:$0xf]  ;;  %v6372_v35 = vor.u32 %v6916_v23, %v6371_v22  ;;  %v6063_v22 = vld [vmem:[%s10343_s8 + $0x438] sm:$0xf] }
 0x2a8   :  { %3970 = vmatmul.bf16.vlgmr.msrb.gmra.mxu0 %v9324_v11  ;;  %3994 = vmatpush.bf16.msra.mxu1 %v5832_v61  ;;  %v6169_v61 = vld [vmem:[%s10343_s8 + $0x52c] sm:$0xf0]  ;;  %v6839_v23 = vld [vmem:[%s10343_s8 + $0x450] sm:$0xf0] }
 0x2a9   :  { %4022 = vmatpush.bf16.msra.mxu0 %v6280_v0  ;;  %v6793_v0 = vld [vmem:[%s10343_s8 + $0x2e4] sm:$0xf] }
 0x2aa   :  { %3979 = vmatpush.bf16.msra.mxu3 %v5636_v2  ;;  %v5724_v2 = vor.u32 %v6751_v56, %v5721_v57  ;;  %v6225_v56 = vld [vmem:[%s10343_s8 + $0x59c] sm:$0xf0]  ;;  %v6060_v57 = vor.u32 %v6835_v17, %v6057_v48  ;;  %v6860_v48 = vld [vmem:[%s10343_s8 + $0x4f8] sm:$0xf0] }
 0x2ab   :  { %4007 = vmatpush.bf16.msra.mxu2 %v6084_v6  ;;  %v6172_v6 = vor.u32 %v6863_v59, %v6169_v61  ;;  %v5581_v59 = vld [vmem:[%s10343_s8 + $0x94] sm:$0xf0]  ;;  %v5780_v61 = vor.u32 %v6765_v49, %v5777_v51  ;;  %v6147_v17 = vld [vmem:[%s10343_s8 + $0x4e0] sm:$0xf]  ;;  %v5867_v49 = vld [vmem:[%s10343_s8 + $0x2b0] sm:$0xf] }
 0x2ac   :  { %3995 = vmatpush.bf16.msra.mxu1 %v5804_v9  ;;  %v5892_v9 = vor.u32 %v6793_v0, %v5889_v1  ;;  %v6758_v0 = vld [vmem:[%s10343_s8 + $0x1cc] sm:$0xf]  ;;  %v6228_v1 = vor.u32 %v6877_v53, %v6225_v56  ;;  %v6315_v53 = vld [vmem:[%s10343_s8 + $0x630] sm:$0xf] }
 0x2ad   :  { %4023 = vmatpush.bf16.msra.mxu0 %v6252_v13  ;;  %3928 = vmatmul.bf16.vlgmr.msrb.gmra.mxu3 %v9358_v29  ;;  %v6340_v13 = vor.u32 %v6905_v3, %v6337_v5  ;;  %v6197_v3 = vld [vmem:[%s10343_s8 + $0x564] sm:$0xf0]  ;;  %v6790_v51 = vld [vmem:[%s10343_s8 + $0x2c8] sm:$0xf0] }
 0x2ae   :  { %3956 = vmatmul.bf16.vlgmr.msrb.gmra.mxu2 %v9366_v33  ;;  %3980 = vmatpush.bf16.msra.mxu3 %v5608_v16  ;;  %v5696_v16 = vor.u32 %v6744_v7, %v5693_v36  ;;  %v6811_v7 = vld [vmem:[%s10343_s8 + $0x370] sm:$0xf0]  ;;  %v6399_v36 = vld [vmem:[%s10343_s8 + $0x6d8] sm:$0xf]  ;;  %v6902_v56 = vld [vmem:[%s10343_s8 + $0x648] sm:$0xf0] }
 0x2af   :  { %4008 = vmatpush.bf16.msra.mxu2 %v6056_v18  ;;  %v6144_v18 = vor.u32 %v6856_v10, %v6141_v12  ;;  %v6923_v10 = vld [vmem:[%s10343_s8 + $0x6f0] sm:$0xf0]  ;;  %v6709_v12 = vld [vmem:[%s10343_s8 + $0x44] sm:$0xf] }
 0x2b0   :  { %3996 = vmatpush.bf16.msra.mxu1 %v5776_v21  ;;  %v5864_v21 = vor.u32 %v6786_v14, %v5861_v15  ;;  %v6821_v15 = vld [vmem:[%s10343_s8 + $0x3c4] sm:$0xf]  ;;  %v6400_v19 = vor.u32 %v6923_v10, %v6399_v36  ;;  %v6734_v36 = vld [vmem:[%s10343_s8 + $0x108] sm:$0xf0]  ;;  %v6091_v10 = vld [vmem:[%s10343_s8 + $0x470] sm:$0xf] }
 0x2b1   :  { %4024 = vmatpush.bf16.msra.mxu0 %v6224_v24  ;;  %v6779_v24 = vld [vmem:[%s10343_s8 + $0x274] sm:$0xf] }
 0x2b2   :  { %3981 = vmatpush.bf16.msra.mxu3 %v5580_v28  ;;  %v6281_v28 = vld [vmem:[%s10343_s8 + $0x60c] sm:$0xf0] }
 0x2b3   :  { %4009 = vmatpush.bf16.msra.mxu2 %v6028_v34  ;;  %v5836_v34 = vor.u32 %v6779_v24, %v5833_v25  ;;  %v6284_v38 = vor.u32 %v6891_v27, %v6281_v28  ;;  %v6702_v24 = vld [vmem:[%s10343_s8 + $0xc] sm:$0xf]  ;;  %v5525_v25 = vld [vmem:[%s10343_s8 + $0x24] sm:$0xf0]  ;;  %v5727_v28 = vld [vmem:[%s10343_s8 + $0x198] sm:$0xf] }
 0x2b4   :  { %3997 = vmatpush.bf16.msra.mxu1 %v5748_v39  ;;  %v6772_v39 = vld [vmem:[%s10343_s8 + $0x23c] sm:$0xf]  ;;  %v5973_v27 = vld [vmem:[%s10343_s8 + $0x3a4] sm:$0xf0]  ;;  %v5528_v54 = vor.u32 %v6702_v24, %v5525_v25  ;;  %v6769_v25 = vld [vmem:[%s10343_s8 + $0x220] sm:$0xf0] }
 0x2b5   :  { %4025 = vmatpush.bf16.msra.mxu0 %v6196_v44  ;;  %v6884_v44 = vld [vmem:[%s10343_s8 + $0x5bc] sm:$0xf]  ;;  %v5808_v47 = vor.u32 %v6772_v39, %v5805_v40  ;;  %v6797_v39 = vld [vmem:[%s10343_s8 + $0x300] sm:$0xf0]  ;;  %v5783_v24 = vld [vmem:[%s10343_s8 + $0x208] sm:$0xf] }
 0x2b6   :  { %3982 = vmatpush.bf16.msra.mxu3 %v5552_v42  ;;  %v5609_v42 = vld [vmem:[%s10343_s8 + $0xcc] sm:$0xf0] }
 0x2b7   :  { %4010 = vmatpush.bf16.msra.mxu2 %v6000_v46  ;;  %3998 = vmatmul.bf16.vlgmr.msra.gmra.mxu1 %v9316_v4 }
 0x2b8   :  { %4046 = vmatpush.bf16.msrb.mxu1 %v5948_v45  ;;  %4026 = vmatmul.bf16.vlgmr.msra.gmra.mxu0 %v9324_v11  ;;  %v6253_v45 = vld [vmem:[%s10343_s8 + $0x5d4] sm:$0xf0] }
 0x2b9   :  { %4074 = vmatpush.bf16.msrb.mxu0 %v6396_v37  ;;  %v6723_v37 = vld [vmem:[%s10343_s8 + $0xb4] sm:$0xf]  ;;  %v6256_v46 = vor.u32 %v6884_v44, %v6253_v45  ;;  %v6343_v44 = vld [vmem:[%s10343_s8 + $0x668] sm:$0xf]  ;;  %v6909_v45 = vld [vmem:[%s10343_s8 + $0x680] sm:$0xf0] }
 0x2ba   :  { %3983 = vmatpush.bf16.msra.mxu3 %v5524_v63  ;;  %v5612_v52 = vor.u32 %v6723_v37, %v5609_v42  ;;  %v6029_v63 = vld [vmem:[%s10343_s8 + $0x414] sm:$0xf0]  ;;  %v5699_v37 = vld [vmem:[%s10343_s8 + $0x160] sm:$0xf]  ;;  %v6748_v42 = vld [vmem:[%s10343_s8 + $0x178] sm:$0xf0] }
 0x2bb   :  { %4011 = vmatpush.bf16.msra.mxu2 %v5972_v43  ;;  %v5749_v43 = vld [vmem:[%s10343_s8 + $0x1e4] sm:$0xf0] }
 0x2bc   :  { %4047 = vmatpush.bf16.msrb.mxu1 %v5920_v58  ;;  %v6716_v58 = vld [vmem:[%s10343_s8 + $0x7c] sm:$0xf]  ;;  %v5752_v14 = vor.u32 %v6758_v0, %v5749_v43  ;;  %v6316_v0 = vor.u32 %v6902_v56, %v6315_v53  ;;  %v6783_v43 = vld [vmem:[%s10343_s8 + $0x290] sm:$0xf0] }
 0x2bd   :  { %4075 = vmatpush.bf16.msrb.mxu0 %v6368_v62  ;;  %3984 = vmatmul.bf16.vlgmr.msra.gmra.mxu3 %v9358_v29  ;;  %v6828_v62 = vld [vmem:[%s10343_s8 + $0x3fc] sm:$0xf]  ;;  %v5584_v5 = vor.u32 %v6716_v58, %v5581_v59  ;;  %v5671_v58 = vld [vmem:[%s10343_s8 + $0x128] sm:$0xf]  ;;  %v6741_v59 = vld [vmem:[%s10343_s8 + $0x140] sm:$0xf0] }
 0x2be   :  { %4032 = vmatpush.bf16.msrb.mxu3 %v5724_v2  ;;  %4012 = vmatmul.bf16.vlgmr.msra.gmra.mxu2 %v9366_v33  ;;  %v6870_v2 = vld [vmem:[%s10343_s8 + $0x54c] sm:$0xf] }
 0x2bf   :  { %4060 = vmatpush.bf16.msrb.mxu2 %v6172_v6  ;;  %v5951_v6 = vld [vmem:[%s10343_s8 + $0x358] sm:$0xf]  ;;  %v6200_v50 = vor.u32 %v6870_v2, %v6197_v3  ;;  %v5672_v2 = vor.u32 %v6741_v59, %v5671_v58 }
 0x2c0   :  { %4048 = vmatpush.bf16.msrb.mxu1 %v5892_v9  ;;  %v6032_v9 = vor.u32 %v6828_v62, %v6029_v63  ;;  %v5952_v55 = vor.u32 %v6811_v7, %v5951_v6  ;;  %v6119_v62 = vld [vmem:[%s10343_s8 + $0x4a8] sm:$0xf]  ;;  %v6853_v63 = vld [vmem:[%s10343_s8 + $0x4c0] sm:$0xf0]  ;;  %v6287_v3 = vld [vmem:[%s10343_s8 + $0x5f8] sm:$0xf] }
 0x2c1   :  { %4076 = vmatpush.bf16.msrb.mxu0 %v6340_v13  ;;  %v5553_v13 = vld [vmem:[%s10343_s8 + $0x5c] sm:$0xf0]  ;;  %v6120_v6 = vor.u32 %v6853_v63, %v6119_v62  ;;  %v5643_v7 = vld [vmem:[%s10343_s8 + $0xf0] sm:$0xf]  ;;  %v6913_v62 = vld [vmem:[%s10343_s8 + $0x6a4] sm:$0xf] }
 0x2c2   :  { %4033 = vmatpush.bf16.msrb.mxu3 %v5696_v16  ;;  %v6001_v16 = vld [vmem:[%s10343_s8 + $0x3dc] sm:$0xf0]  ;;  %v5556_v20 = vor.u32 %v6709_v12, %v5553_v13  ;;  %v6846_v12 = vld [vmem:[%s10343_s8 + $0x488] sm:$0xf0] }
 0x2c3   :  { %4061 = vmatpush.bf16.msrb.mxu2 %v6144_v18  ;;  %v5923_v18 = vld [vmem:[%s10343_s8 + $0x320] sm:$0xf] }
 0x2c4   :  { %4049 = vmatpush.bf16.msrb.mxu1 %v5864_v21  ;;  %v6804_v21 = vld [vmem:[%s10343_s8 + $0x338] sm:$0xf0]  ;;  %v6373_v63 = vld [vmem:[%s10343_s8 + $0x6bc] sm:$0xf0] }
 0x2c5   :  { %4077 = vmatpush.bf16.msrb.mxu0 %v6312_v8  ;;  %v6004_v8 = vor.u32 %v6821_v15, %v6001_v16  ;;  %v5924_v31 = vor.u32 %v6804_v21, %v5923_v18  ;;  %v6776_v15 = vld [vmem:[%s10343_s8 + $0x258] sm:$0xf0]  ;;  %v5644_v16 = vor.u32 %v6734_v36, %v5643_v7  ;;  %v6092_v18 = vor.u32 %v6846_v12, %v6091_v10 }
 0x2c6   :  { %4034 = vmatpush.bf16.msrb.mxu3 %v5668_v26  ;;  %v6814_v26 = vld [vmem:[%s10343_s8 + $0x38c] sm:$0xf]  ;;  %v6864_v36 = vld [vmem:[%s10343_s8 + $0x51c] sm:$0xf]  ;;  %v6376_v10 = vor.u32 %v6913_v62, %v6373_v63  ;;  %v6065_v63 = vld [vmem:[%s10343_s8 + $0x454] sm:$0xf0] }
 0x2c7   :  { %4062 = vmatpush.bf16.msrb.mxu2 %v6116_v30  ;;  %v6755_v30 = vld [vmem:[%s10343_s8 + $0x1b0] sm:$0xf0]  ;;  %v5976_v40 = vor.u32 %v6814_v26, %v5973_v27  ;;  %v6231_v27 = vld [vmem:[%s10343_s8 + $0x588] sm:$0xf]  ;;  %v6836_v62 = vld [vmem:[%s10343_s8 + $0x43c] sm:$0xf] }
 0x2c8   :  { %4050 = vmatpush.bf16.msrb.mxu1 %v5836_v34  ;;  %v6867_v34 = vld [vmem:[%s10343_s8 + $0x530] sm:$0xf0] }
 0x2c9   :  { %4078 = vmatpush.bf16.msrb.mxu0 %v6284_v38  ;;  %v5895_v38 = vld [vmem:[%s10343_s8 + $0x2e8] sm:$0xf] }
 0x2ca   :  { %4035 = vmatpush.bf16.msrb.mxu3 %v5640_v41  ;;  %v5728_v41 = vor.u32 %v6755_v30, %v5727_v28  ;;  %v6881_v28 = vld [vmem:[%s10343_s8 + $0x5a0] sm:$0xf0]  ;;  %v6064_v30 = vor.u32 %v6839_v23, %v6063_v22  ;;  %v6149_v23 = vld [vmem:[%s10343_s8 + $0x4fc] sm:$0xf0] }
 0x2cb   :  { %4063 = vmatpush.bf16.msrb.mxu2 %v6088_v60  ;;  %v6176_v60 = vor.u32 %v6867_v34, %v6175_v32  ;;  %v6720_v32 = vld [vmem:[%s10343_s8 + $0x98] sm:$0xf0]  ;;  %v5784_v34 = vor.u32 %v6769_v25, %v5783_v24  ;;  %v6857_v22 = vld [vmem:[%s10343_s8 + $0x4e4] sm:$0xf]  ;;  %v6787_v24 = vld [vmem:[%s10343_s8 + $0x2b4] sm:$0xf] }
 0x2cc   :  { %4051 = vmatpush.bf16.msrb.mxu1 %v5808_v47  ;;  %v5896_v47 = vor.u32 %v6797_v39, %v5895_v38  ;;  %v5755_v38 = vld [vmem:[%s10343_s8 + $0x1d0] sm:$0xf]  ;;  %v6232_v39 = vor.u32 %v6881_v28, %v6231_v27  ;;  %v6899_v27 = vld [vmem:[%s10343_s8 + $0x634] sm:$0xf] }
 0x2cd   :  { %4079 = vmatpush.bf16.msrb.mxu0 %v6256_v46  ;;  %v6344_v46 = vor.u32 %v6909_v45, %v6343_v44  ;;  %v6874_v44 = vld [vmem:[%s10343_s8 + $0x568] sm:$0xf0]  ;;  %v5869_v25 = vld [vmem:[%s10343_s8 + $0x2cc] sm:$0xf0] }
 0x2ce   :  { %4036 = vmatpush.bf16.msrb.mxu3 %v5612_v52  ;;  %v5700_v52 = vor.u32 %v6748_v42, %v5699_v37  ;;  %v5953_v37 = vld [vmem:[%s10343_s8 + $0x374] sm:$0xf0]  ;;  %v6920_v42 = vld [vmem:[%s10343_s8 + $0x6dc] sm:$0xf]  ;;  %v6317_v28 = vld [vmem:[%s10343_s8 + $0x64c] sm:$0xf0] }
 0x2cf   :  { %4064 = vmatpush.bf16.msrb.mxu2 %v6060_v57  ;;  %v6148_v57 = vor.u32 %v6860_v48, %v6147_v17  ;;  %v6401_v17 = vld [vmem:[%s10343_s8 + $0x6f4] sm:$0xf0]  ;;  %v5559_v48 = vld [vmem:[%s10343_s8 + $0x48] sm:$0xf] }
 0x2d0   :  { %4052 = vmatpush.bf16.msrb.mxu1 %v5780_v61  ;;  %v5868_v61 = vor.u32 %v6790_v51, %v5867_v49  ;;  %v6007_v51 = vld [vmem:[%s10343_s8 + $0x3c8] sm:$0xf]  ;;  %v6404_v58 = vor.u32 %v6920_v42, %v6401_v17  ;;  %v5645_v42 = vld [vmem:[%s10343_s8 + $0x10c] sm:$0xf0]  ;;  %v6843_v17 = vld [vmem:[%s10343_s8 + $0x474] sm:$0xf] }
 0x2d1   :  { %4080 = vmatpush.bf16.msrb.mxu0 %v6228_v1  ;;  %v5839_v1 = vld [vmem:[%s10343_s8 + $0x278] sm:$0xf] }
 0x2d2   :  { %4037 = vmatpush.bf16.msrb.mxu3 %v5584_v5  ;;  %v6895_v5 = vld [vmem:[%s10343_s8 + $0x610] sm:$0xf0] }
 0x2d3   :  { %4065 = vmatpush.bf16.msrb.mxu2 %v6032_v9  ;;  %v5840_v9 = vor.u32 %v6783_v43, %v5839_v1  ;;  %v6288_v13 = vor.u32 %v6895_v5, %v6287_v3  ;;  %v5531_v1 = vld [vmem:[%s10343_s8 + $0x10] sm:$0xf]  ;;  %v6706_v43 = vld [vmem:[%s10343_s8 + $0x28] sm:$0xf0]  ;;  %v6752_v5 = vld [vmem:[%s10343_s8 + $0x19c] sm:$0xf] }
 0x2d4   :  { %4053 = vmatpush.bf16.msrb.mxu1 %v5752_v14  ;;  %v5811_v14 = vld [vmem:[%s10343_s8 + $0x240] sm:$0xf]  ;;  %v6818_v3 = vld [vmem:[%s10343_s8 + $0x3a8] sm:$0xf0]  ;;  %v5532_v12 = vor.u32 %v6706_v43, %v5531_v1  ;;  %v5785_v43 = vld [vmem:[%s10343_s8 + $0x224] sm:$0xf0] }
 0x2d5   :  { %4081 = vmatpush.bf16.msrb.mxu0 %v6200_v50  ;;  %v6259_v50 = vld [vmem:[%s10343_s8 + $0x5c0] sm:$0xf]  ;;  %v5812_v21 = vor.u32 %v6776_v15, %v5811_v14  ;;  %v5897_v14 = vld [vmem:[%s10343_s8 + $0x304] sm:$0xf0]  ;;  %v6766_v1 = vld [vmem:[%s10343_s8 + $0x20c] sm:$0xf] }
 0x2d6   :  { %4038 = vmatpush.bf16.msrb.mxu3 %v5556_v20  ;;  %v6727_v20 = vld [vmem:[%s10343_s8 + $0xd0] sm:$0xf0] }
 0x2d7   :  { %4066 = vmatpush.bf16.msrb.mxu2 %v6004_v8  ;;  %4054 = vmatmul.bf16.vlgmr.msrb.gmra.mxu1 %v9316_v4 }
 0x2d8   :  { %4102 = vmatpush.bf16.msra.mxu1 %v5952_v55  ;;  %4082 = vmatmul.bf16.vlgmr.msrb.gmra.mxu0 %v9324_v11  ;;  %v6888_v55 = vld [vmem:[%s10343_s8 + $0x5d8] sm:$0xf0] }
 0x2d9   :  { %4130 = vmatpush.bf16.msra.mxu0 %v6400_v19  ;;  %v5615_v19 = vld [vmem:[%s10343_s8 + $0xb8] sm:$0xf]  ;;  %v6260_v8 = vor.u32 %v6888_v55, %v6259_v50  ;;  %v6906_v50 = vld [vmem:[%s10343_s8 + $0x66c] sm:$0xf]  ;;  %v6345_v55 = vld [vmem:[%s10343_s8 + $0x684] sm:$0xf0] }
 0x2da   :  { %4039 = vmatpush.bf16.msrb.mxu3 %v5528_v54  ;;  %v5616_v26 = vor.u32 %v6727_v20, %v5615_v19  ;;  %v6832_v54 = vld [vmem:[%s10343_s8 + $0x418] sm:$0xf0]  ;;  %v6745_v19 = vld [vmem:[%s10343_s8 + $0x164] sm:$0xf]  ;;  %v5701_v20 = vld [vmem:[%s10343_s8 + $0x17c] sm:$0xf0] }
 0x2db   :  { %4067 = vmatpush.bf16.msrb.mxu2 %v5976_v40  ;;  %v6762_v40 = vld [vmem:[%s10343_s8 + $0x1e8] sm:$0xf0] }
 0x2dc   :  { %4103 = vmatpush.bf16.msra.mxu1 %v5924_v31  ;;  %v5587_v31 = vld [vmem:[%s10343_s8 + $0x80] sm:$0xf]  ;;  %v5756_v49 = vor.u32 %v6762_v40, %v5755_v38  ;;  %v6320_v38 = vor.u32 %v6899_v27, %v6317_v28  ;;  %v5841_v40 = vld [vmem:[%s10343_s8 + $0x294] sm:$0xf0] }
 0x2dd   :  { %4131 = vmatpush.bf16.msra.mxu0 %v6372_v35  ;;  %4040 = vmatmul.bf16.vlgmr.msrb.gmra.mxu3 %v9358_v29  ;;  %v6035_v35 = vld [vmem:[%s10343_s8 + $0x400] sm:$0xf]  ;;  %v5588_v45 = vor.u32 %v6720_v32, %v5587_v31  ;;  %v6738_v31 = vld [vmem:[%s10343_s8 + $0x12c] sm:$0xf]  ;;  %v5673_v32 = vld [vmem:[%s10343_s8 + $0x144] sm:$0xf0] }
 0x2de   :  { %4088 = vmatpush.bf16.msra.mxu3 %v5728_v41  ;;  %4068 = vmatmul.bf16.vlgmr.msrb.gmra.mxu2 %v9366_v33  ;;  %v6203_v41 = vld [vmem:[%s10343_s8 + $0x550] sm:$0xf] }
 0x2df   :  { %4116 = vmatpush.bf16.msra.mxu2 %v6176_v60  ;;  %v6808_v60 = vld [vmem:[%s10343_s8 + $0x35c] sm:$0xf]  ;;  %v6204_v53 = vor.u32 %v6874_v44, %v6203_v41  ;;  %v5676_v41 = vor.u32 %v6738_v31, %v5673_v32 }
 0x2e0   :  { %4104 = vmatpush.bf16.msra.mxu1 %v5896_v47  ;;  %v6036_v47 = vor.u32 %v6832_v54, %v6035_v35  ;;  %v5956_v56 = vor.u32 %v6808_v60, %v5953_v37  ;;  %v6850_v35 = vld [vmem:[%s10343_s8 + $0x4ac] sm:$0xf]  ;;  %v6121_v54 = vld [vmem:[%s10343_s8 + $0x4c4] sm:$0xf0]  ;;  %v6892_v44 = vld [vmem:[%s10343_s8 + $0x5fc] sm:$0xf] }
 0x2e1   :  { %4132 = vmatpush.bf16.msra.mxu0 %v6344_v46  ;;  %v6713_v46 = vld [vmem:[%s10343_s8 + $0x60] sm:$0xf0]  ;;  %v6124_v60 = vor.u32 %v6850_v35, %v6121_v54  ;;  %v6731_v37 = vld [vmem:[%s10343_s8 + $0xf4] sm:$0xf]  ;;  %v6379_v35 = vld [vmem:[%s10343_s8 + $0x6a8] sm:$0xf] }
 0x2e2   :  { %4089 = vmatpush.bf16.msra.mxu3 %v5700_v52  ;;  %v6825_v52 = vld [vmem:[%s10343_s8 + $0x3e0] sm:$0xf0]  ;;  %v5560_v59 = vor.u32 %v6713_v46, %v5559_v48  ;;  %v6093_v48 = vld [vmem:[%s10343_s8 + $0x48c] sm:$0xf0] }
 0x2e3   :  { %4117 = vmatpush.bf16.msra.mxu2 %v6148_v57  ;;  %v6801_v57 = vld [vmem:[%s10343_s8 + $0x324] sm:$0xf] }
 0x2e4   :  { %4105 = vmatpush.bf16.msra.mxu1 %v5868_v61  ;;  %v5925_v61 = vld [vmem:[%s10343_s8 + $0x33c] sm:$0xf0]  ;;  %v6917_v54 = vld [vmem:[%s10343_s8 + $0x6c0] sm:$0xf0] }
 0x2e5   :  { %4133 = vmatpush.bf16.msra.mxu0 %v6316_v0  ;;  %v6008_v0 = vor.u32 %v6825_v52, %v6007_v51  ;;  %v5928_v7 = vor.u32 %v6801_v57, %v5925_v61  ;;  %v5813_v51 = vld [vmem:[%s10343_s8 + $0x25c] sm:$0xf0]  ;;  %v5648_v52 = vor.u32 %v6731_v37, %v5645_v42  ;;  %v6096_v57 = vor.u32 %v6843_v17, %v6093_v48 }
 0x2e6   :  { %4090 = vmatpush.bf16.msra.mxu3 %v5672_v2  ;;  %v5979_v2 = vld [vmem:[%s10343_s8 + $0x390] sm:$0xf]  ;;  %v6183_v42 = vld [vmem:[%s10343_s8 + $0x520] sm:$0xf]  ;;  %v6380_v17 = vor.u32 %v6917_v54, %v6379_v35 }
 0x2e7   :  { %4118 = vmatpush.bf16.msra.mxu2 %v6120_v6  ;;  %v5729_v6 = vld [vmem:[%s10343_s8 + $0x1b4] sm:$0xf0]  ;;  %v5980_v15 = vor.u32 %v6818_v3, %v5979_v2  ;;  %v6878_v3 = vld [vmem:[%s10343_s8 + $0x58c] sm:$0xf]  ;;  %v10233_v54 = vld [vmem:[%s10346_s9] sm:$0x7f] }
 0x2e8   :  { %4106 = vmatpush.bf16.msra.mxu1 %v5840_v9  ;;  %v6177_v9 = vld [vmem:[%s10343_s8 + $0x534] sm:$0xf0] }
 0x2e9   :  { %4134 = vmatpush.bf16.msra.mxu0 %v6288_v13  ;;  %v6794_v13 = vld [vmem:[%s10343_s8 + $0x2ec] sm:$0xf] }
 0x2ea   :  { %4091 = vmatpush.bf16.msra.mxu3 %v5644_v16  ;;  %v5732_v16 = vor.u32 %v6752_v5, %v5729_v6  ;;  %v6233_v5 = vld [vmem:[%s10343_s8 + $0x5a4] sm:$0xf0]  ;;  %v6068_v6 = vor.u32 %v6836_v62, %v6065_v63  ;;  %v6861_v63 = vld [vmem:[%s10343_s8 + $0x500] sm:$0xf0] }
 0x2eb   :  { %4119 = vmatpush.bf16.msra.mxu2 %v6092_v18  ;;  %v6180_v18 = vor.u32 %v6864_v36, %v6177_v9  ;;  %v5589_v36 = vld [vmem:[%s10343_s8 + $0x9c] sm:$0xf0]  ;;  %v5788_v9 = vor.u32 %v6766_v1, %v5785_v43  ;;  %v6155_v62 = vld [vmem:[%s10343_s8 + $0x4e8] sm:$0xf]  ;;  %v5875_v1 = vld [vmem:[%s10343_s8 + $0x2b8] sm:$0xf] }
 0x2ec   :  { %4107 = vmatpush.bf16.msra.mxu1 %v5812_v21  ;;  %v5900_v21 = vor.u32 %v6794_v13, %v5897_v14  ;;  %v6759_v13 = vld [vmem:[%s10343_s8 + $0x1d4] sm:$0xf]  ;;  %v6236_v14 = vor.u32 %v6878_v3, %v6233_v5  ;;  %v6323_v3 = vld [vmem:[%s10343_s8 + $0x638] sm:$0xf] }
 0x2ed   :  { %4135 = vmatpush.bf16.msra.mxu0 %v6260_v8  ;;  %v6348_v8 = vor.u32 %v6906_v50, %v6345_v55  ;;  %v6205_v50 = vld [vmem:[%s10343_s8 + $0x56c] sm:$0xf0]  ;;  %v6791_v43 = vld [vmem:[%s10343_s8 + $0x2d0] sm:$0xf0] }
 0x2ee   :  { %4092 = vmatpush.bf16.msra.mxu3 %v5616_v26  ;;  %v5704_v26 = vor.u32 %v6745_v19, %v5701_v20  ;;  %v6812_v19 = vld [vmem:[%s10343_s8 + $0x378] sm:$0xf0]  ;;  %v6407_v20 = vld [vmem:[%s10343_s8 + $0x6e0] sm:$0xf]  ;;  %v6903_v5 = vld [vmem:[%s10343_s8 + $0x650] sm:$0xf0] }
 0x2ef   :  { %4120 = vmatpush.bf16.msra.mxu2 %v6064_v30  ;;  %v6152_v30 = vor.u32 %v6857_v22, %v6149_v23  ;;  %v6924_v22 = vld [vmem:[%s10343_s8 + $0x6f8] sm:$0xf0]  ;;  %v6710_v23 = vld [vmem:[%s10343_s8 + $0x4c] sm:$0xf] }
 0x2f0   :  { %4108 = vmatpush.bf16.msra.mxu1 %v5784_v34  ;;  %v5872_v34 = vor.u32 %v6787_v24, %v5869_v25  ;;  %v6822_v25 = vld [vmem:[%s10343_s8 + $0x3cc] sm:$0xf]  ;;  %v6408_v31 = vor.u32 %v6924_v22, %v6407_v20  ;;  %v6735_v20 = vld [vmem:[%s10343_s8 + $0x110] sm:$0xf0]  ;;  %v6099_v22 = vld [vmem:[%s10343_s8 + $0x478] sm:$0xf] }
 0x2f1   :  { %4136 = vmatpush.bf16.msra.mxu0 %v6232_v39  ;;  %v6780_v39 = vld [vmem:[%s10343_s8 + $0x27c] sm:$0xf] }
 0x2f2   :  { %4093 = vmatpush.bf16.msra.mxu3 %v5588_v45  ;;  %v6289_v45 = vld [vmem:[%s10343_s8 + $0x614] sm:$0xf0] }
 0x2f3   :  { %4121 = vmatpush.bf16.msra.mxu2 %v6036_v47  ;;  %v5844_v47 = vor.u32 %v6780_v39, %v5841_v40  ;;  %v6292_v46 = vor.u32 %v6892_v44, %v6289_v45  ;;  %v6703_v39 = vld [vmem:[%s10343_s8 + $0x14] sm:$0xf]  ;;  %v5533_v40 = vld [vmem:[%s10343_s8 + $0x2c] sm:$0xf0]  ;;  %v5735_v45 = vld [vmem:[%s10343_s8 + $0x1a0] sm:$0xf] }
 0x2f4   :  { %4109 = vmatpush.bf16.msra.mxu1 %v5756_v49  ;;  %v6773_v49 = vld [vmem:[%s10343_s8 + $0x244] sm:$0xf]  ;;  %v5981_v44 = vld [vmem:[%s10343_s8 + $0x3ac] sm:$0xf0]  ;;  %v5536_v48 = vor.u32 %v6703_v39, %v5533_v40  ;;  %v6840_v39 = vld [vmem:[%s10343_s8 + $0x458] sm:$0xf0] }
 0x2f5   :  { %4137 = vmatpush.bf16.msra.mxu0 %v6204_v53  ;;  %v6885_v53 = vld [vmem:[%s10343_s8 + $0x5c4] sm:$0xf]  ;;  %v5816_v61 = vor.u32 %v6773_v49, %v5813_v51  ;;  %v6798_v49 = vld [vmem:[%s10343_s8 + $0x308] sm:$0xf0] }
 0x2f6   :  { %4094 = vmatpush.bf16.msra.mxu3 %v5560_v59  ;;  %v5617_v59 = vld [vmem:[%s10343_s8 + $0xd4] sm:$0xf0] }
 0x2f7   :  { %4122 = vmatpush.bf16.msra.mxu2 %v6008_v0  ;;  %4110 = vmatmul.bf16.vlgmr.msra.gmra.mxu1 %v9316_v4 }
 0x2f8   :  { %4158 = vmatpush.bf16.msrb.mxu1 %v5956_v56  ;;  %4138 = vmatmul.bf16.vlgmr.msra.gmra.mxu0 %v9324_v11  ;;  %v6261_v56 = vld [vmem:[%s10343_s8 + $0x5dc] sm:$0xf0] }
 0x2f9   :  { %4186 = vmatpush.bf16.msrb.mxu0 %v6404_v58  ;;  %v6724_v58 = vld [vmem:[%s10343_s8 + $0xbc] sm:$0xf]  ;;  %v6264_v0 = vor.u32 %v6885_v53, %v6261_v56  ;;  %v6351_v53 = vld [vmem:[%s10343_s8 + $0x670] sm:$0xf]  ;;  %v6910_v56 = vld [vmem:[%s10343_s8 + $0x688] sm:$0xf0] }
 0x2fa   :  { %4095 = vmatpush.bf16.msra.mxu3 %v5532_v12  ;;  %v5620_v2 = vor.u32 %v6724_v58, %v5617_v59  ;;  %v6037_v12 = vld [vmem:[%s10343_s8 + $0x41c] sm:$0xf0]  ;;  %v5707_v58 = vld [vmem:[%s10343_s8 + $0x168] sm:$0xf]  ;;  %v6749_v59 = vld [vmem:[%s10343_s8 + $0x180] sm:$0xf0] }
 0x2fb   :  { %4123 = vmatpush.bf16.msra.mxu2 %v5980_v15  ;;  %v5757_v15 = vld [vmem:[%s10343_s8 + $0x1ec] sm:$0xf0] }
 0x2fc   :  { %4159 = vmatpush.bf16.msrb.mxu1 %v5928_v7  ;;  %v6717_v7 = vld [vmem:[%s10343_s8 + $0x84] sm:$0xf]  ;;  %v5760_v24 = vor.u32 %v6759_v13, %v5757_v15  ;;  %v6324_v13 = vor.u32 %v6903_v5, %v6323_v3  ;;  %v6784_v15 = vld [vmem:[%s10343_s8 + $0x298] sm:$0xf0]  ;;  %v6015_v5 = vld [vmem:[%s10343_s8 + $0x3d0] sm:$0xf] }
 0x2fd   :  { %4187 = vmatpush.bf16.msrb.mxu0 %v6376_v10  ;;  %4096 = vmatmul.bf16.vlgmr.msra.gmra.mxu3 %v9358_v29  ;;  %v6829_v10 = vld [vmem:[%s10343_s8 + $0x404] sm:$0xf]  ;;  %v5592_v55 = vor.u32 %v6717_v7, %v5589_v36  ;;  %v5679_v7 = vld [vmem:[%s10343_s8 + $0x130] sm:$0xf]  ;;  %v6742_v36 = vld [vmem:[%s10343_s8 + $0x148] sm:$0xf0] }
 0x2fe   :  { %4144 = vmatpush.bf16.msrb.mxu3 %v5732_v16  ;;  %4124 = vmatmul.bf16.vlgmr.msra.gmra.mxu2 %v9366_v33  ;;  %v6871_v16 = vld [vmem:[%s10343_s8 + $0x554] sm:$0xf] }
 0x2ff   :  { %4172 = vmatpush.bf16.msrb.mxu2 %v6180_v18  ;;  %v5959_v18 = vld [vmem:[%s10343_s8 + $0x360] sm:$0xf]  ;;  %v6208_v27 = vor.u32 %v6871_v16, %v6205_v50  ;;  %v5680_v16 = vor.u32 %v6742_v36, %v5679_v7 }
 0x300   :  { %4160 = vmatpush.bf16.msrb.mxu1 %v5900_v21  ;;  %v6040_v21 = vor.u32 %v6829_v10, %v6037_v12  ;;  %v5960_v28 = vor.u32 %v6812_v19, %v5959_v18  ;;  %v6127_v10 = vld [vmem:[%s10343_s8 + $0x4b0] sm:$0xf]  ;;  %v6854_v12 = vld [vmem:[%s10343_s8 + $0x4c8] sm:$0xf0]  ;;  %v6295_v50 = vld [vmem:[%s10343_s8 + $0x600] sm:$0xf] }
 0x301   :  { %4188 = vmatpush.bf16.msrb.mxu0 %v6348_v8  ;;  %v5561_v8 = vld [vmem:[%s10343_s8 + $0x64] sm:$0xf0]  ;;  %v6128_v18 = vor.u32 %v6854_v12, %v6127_v10  ;;  %v5651_v19 = vld [vmem:[%s10343_s8 + $0xf8] sm:$0xf] }
 0x302   :  { %4145 = vmatpush.bf16.msrb.mxu3 %v5704_v26  ;;  %v6009_v26 = vld [vmem:[%s10343_s8 + $0x3e4] sm:$0xf0]  ;;  %v5564_v32 = vor.u32 %v6710_v23, %v5561_v8  ;;  %v6847_v23 = vld [vmem:[%s10343_s8 + $0x490] sm:$0xf0] }
 0x303   :  { %4173 = vmatpush.bf16.msrb.mxu2 %v6152_v30  ;;  %v5931_v30 = vld [vmem:[%s10343_s8 + $0x328] sm:$0xf] }
 0x304   :  { %4161 = vmatpush.bf16.msrb.mxu1 %v5872_v34  ;;  %v6805_v34 = vld [vmem:[%s10343_s8 + $0x340] sm:$0xf0] }
 0x305   :  { %4189 = vmatpush.bf16.msrb.mxu0 %v6320_v38  ;;  %v6012_v38 = vor.u32 %v6822_v25, %v6009_v26  ;;  %v5932_v37 = vor.u32 %v6805_v34, %v5931_v30  ;;  %v6777_v25 = vld [vmem:[%s10343_s8 + $0x260] sm:$0xf0]  ;;  %v5652_v26 = vor.u32 %v6735_v20, %v5651_v19  ;;  %v6100_v30 = vor.u32 %v6847_v23, %v6099_v22 }
 0x306   :  { %4146 = vmatpush.bf16.msrb.mxu3 %v5676_v41  ;;  %v6815_v41 = vld [vmem:[%s10343_s8 + $0x394] sm:$0xf]  ;;  %v2699_v23 = vperm.slane %v10233_v54, 1 }
 0x307   :  { %4174 = vmatpush.bf16.msrb.mxu2 %v6124_v60  ;;  %v6756_v60 = vld [vmem:[%s10343_s8 + $0x1b8] sm:$0xf0]  ;;  %v5984_v51 = vor.u32 %v6815_v41, %v5981_v44  ;;  %v5791_v41 = vld [vmem:[%s10343_s8 + $0x210] sm:$0xf]  ;;  %v6770_v44 = vld [vmem:[%s10343_s8 + $0x228] sm:$0xf0] }
 0x308   :  { %4162 = vmatpush.bf16.msrb.mxu1 %v5844_v47  ;;  %v6868_v47 = vld [vmem:[%s10343_s8 + $0x538] sm:$0xf0] }
 0x309   :  { %4190 = vmatpush.bf16.msrb.mxu0 %v6292_v46  ;;  %v5903_v46 = vld [vmem:[%s10343_s8 + $0x2f0] sm:$0xf] }
 0x30a   :  { %4147 = vmatpush.bf16.msrb.mxu3 %v5648_v52  ;;  %v5736_v52 = vor.u32 %v6756_v60, %v5735_v45  ;;  %v6239_v60 = vld [vmem:[%s10343_s8 + $0x590] sm:$0xf] }
 0x30b   :  { %4175 = vmatpush.bf16.msrb.mxu2 %v6096_v57  ;;  %v6184_v57 = vor.u32 %v6868_v47, %v6183_v42  ;;  %v2698_v42 = vperm.slane %v10233_v54, 0 }
 0x30c   :  { %4163 = vmatpush.bf16.msrb.mxu1 %v5816_v61  ;;  %v5904_v61 = vor.u32 %v6798_v49, %v5903_v46 }
 0x30d   :  { %4191 = vmatpush.bf16.msrb.mxu0 %v6264_v0  ;;  %v6352_v0 = vor.u32 %v6910_v56, %v6351_v53  ;;  %v6833_v53 = vld [vmem:[%s10343_s8 + $0x420] sm:$0xf0] }
 0x30e   :  { %4148 = vmatpush.bf16.msrb.mxu3 %v5620_v2  ;;  %v5708_v2 = vor.u32 %v6749_v59, %v5707_v58  ;;  %v5763_v58 = vld [vmem:[%s10343_s8 + $0x1d8] sm:$0xf]  ;;  %v6763_v59 = vld [vmem:[%s10343_s8 + $0x1f0] sm:$0xf0] }
 0x30f   :  { %4176 = vmatpush.bf16.msrb.mxu2 %v6068_v6  ;;  %v6156_v6 = vor.u32 %v6861_v63, %v6155_v62  ;;  %v6211_v62 = vld [vmem:[%s10343_s8 + $0x558] sm:$0xf]  ;;  %v6875_v63 = vld [vmem:[%s10343_s8 + $0x570] sm:$0xf0]  ;;  %v5764_v3 = vor.u32 %v6763_v59, %v5763_v58 }
 0x310   :  { %4164 = vmatpush.bf16.msrb.mxu1 %v5788_v9  ;;  %v5876_v9 = vor.u32 %v6791_v43, %v5875_v1  ;;  %v5567_v43 = vld [vmem:[%s10343_s8 + $0x50] sm:$0xf]  ;;  %v6212_v7 = vor.u32 %v6875_v63, %v6211_v62 }
 0x311   :  { %4192 = vmatpush.bf16.msrb.mxu0 %v6236_v14  ;;  %v5847_v14 = vld [vmem:[%s10343_s8 + $0x280] sm:$0xf] }
 0x312   :  { %4149 = vmatpush.bf16.msrb.mxu3 %v5592_v55  ;;  %v6896_v55 = vld [vmem:[%s10343_s8 + $0x618] sm:$0xf0] }
 0x313   :  { %4177 = vmatpush.bf16.msrb.mxu2 %v6040_v21  ;;  %v5848_v21 = vor.u32 %v6784_v15, %v5847_v14  ;;  %v6296_v8 = vor.u32 %v6896_v55, %v6295_v50  ;;  %v6707_v14 = vld [vmem:[%s10343_s8 + $0x30] sm:$0xf0] }
 0x314   :  { %4165 = vmatpush.bf16.msrb.mxu1 %v5760_v24  ;;  %v5819_v24 = vld [vmem:[%s10343_s8 + $0x248] sm:$0xf]  ;;  %v3887_v34 = vpop.f32.mrf.mxu1  ;;  %v6819_v50 = vld [vmem:[%s10343_s8 + $0x3b0] sm:$0xf0] }
 0x315   :  { %4193 = vmatpush.bf16.msrb.mxu0 %v6208_v27  ;;  %v6267_v27 = vld [vmem:[%s10343_s8 + $0x5c8] sm:$0xf]  ;;  %v5820_v35 = vor.u32 %v6777_v25, %v5819_v24  ;;  %v3915_v46 = vpop.f32.mrf.mxu0 }
 0x316   :  { %4150 = vmatpush.bf16.msrb.mxu3 %v5564_v32  ;;  %v6728_v32 = vld [vmem:[%s10343_s8 + $0xd8] sm:$0xf0] }
 0x317   :  { %4178 = vmatpush.bf16.msrb.mxu2 %v6012_v38  ;;  %4166 = vmatmul.bf16.vlgmr.msrb.gmra.mxu1 %v9316_v4  ;;  %v6071_v38 = vld [vmem:[%s10343_s8 + $0x440] sm:$0xf] }
 0x318   :  { %4214 = vmatpush.bf16.msra.mxu1 %v5960_v28  ;;  %4194 = vmatmul.bf16.vlgmr.msrb.gmra.mxu0 %v9324_v11  ;;  %v6889_v28 = vld [vmem:[%s10343_s8 + $0x5e0] sm:$0xf0]  ;;  %v6072_v47 = vor.u32 %v6840_v39, %v6071_v38 }
 0x319   :  { %4242 = vmatpush.bf16.msra.mxu0 %v6408_v31  ;;  %v5623_v31 = vld [vmem:[%s10343_s8 + $0xc0] sm:$0xf]  ;;  %v6268_v40 = vor.u32 %v6889_v28, %v6267_v27 }
 0x31a   :  { %4151 = vmatpush.bf16.msrb.mxu3 %v5536_v48  ;;  %v5624_v45 = vor.u32 %v6728_v32, %v5623_v31  ;;  %v6721_v48 = vld [vmem:[%s10343_s8 + $0xa0] sm:$0xf0] }
 0x31b   :  { %4179 = vmatpush.bf16.msrb.mxu2 %v5984_v51  ;;  %v5792_v51 = vor.u32 %v6770_v44, %v5791_v41 }
 0x31c   :  { %4215 = vmatpush.bf16.msra.mxu1 %v5932_v37  ;;  %v6882_v37 = vld [vmem:[%s10343_s8 + $0x5a8] sm:$0xf0]  ;;  %v3889_v36 = vpop.f32.mrf.mxu1 }
 0x31d   :  { %4243 = vmatpush.bf16.msra.mxu0 %v6380_v17  ;;  %4152 = vmatmul.bf16.vlgmr.msrb.gmra.mxu3 %v9358_v29  ;;  %v5595_v17 = vld [vmem:[%s10343_s8 + $0x88] sm:$0xf] }
 0x31e   :  { %4200 = vmatpush.bf16.msra.mxu3 %v5736_v52  ;;  %4180 = vmatmul.bf16.vlgmr.msrb.gmra.mxu2 %v9366_v33  ;;  %v6043_v52 = vld [vmem:[%s10343_s8 + $0x408] sm:$0xf] }
 0x31f   :  { %4228 = vmatpush.bf16.msra.mxu2 %v6184_v57  ;;  %v6240_v57 = vor.u32 %v6882_v37, %v6239_v60  ;;  %v6044_v1 = vor.u32 %v6833_v53, %v6043_v52 }
 0x320   :  { %4216 = vmatpush.bf16.msra.mxu1 %v5904_v61  ;;  %v3873_v49 = vpop.f32.mrf.mxu3  ;;  %v5596_v61 = vor.u32 %v6721_v48, %v5595_v17 }
 0x321   :  { %4244 = vmatpush.bf16.msra.mxu0 %v6352_v0  ;;  %v3901_v56 = vpop.f32.mrf.mxu2  ;;  %v3874_v0 = vadd.f32 %v3873_v49, %v2698_v42 }
 0x322   :  { %4201 = vmatpush.bf16.msra.mxu3 %v5708_v2  ;;  %v6714_v2 = vld [vmem:[%s10343_s8 + $0x68] sm:$0xf0] }
 0x323   :  { %4229 = vmatpush.bf16.msra.mxu2 %v6156_v6  ;;  %v6826_v6 = vld [vmem:[%s10343_s8 + $0x3e8] sm:$0xf0]  ;;  %v3888_v10 = vadd.f32 %v3887_v34, %v3874_v0  ;;  %v2700_v0 = vperm.slane %v10233_v54, 2 }
 0x324   :  { %4217 = vmatpush.bf16.msra.mxu1 %v5876_v9  ;;  %v5568_v9 = vor.u32 %v6714_v2, %v5567_v43  ;;  %v6016_v12 = vor.u32 %v6826_v6, %v6015_v5  ;;  %v3943_v25 = vpop.f32.mrf.mxu1 }
 0x325   :  { %4245 = vmatpush.bf16.msra.mxu0 %v6324_v13  ;;  %v5539_v13 = vld [vmem:[%s10343_s8 + $0x18] sm:$0xf]  ;;  %v3902_v20 = vadd.f32 %v3901_v56, %v3888_v10 }
 0x326   :  { %4202 = vmatpush.bf16.msra.mxu3 %v5680_v16  ;;  %v5987_v16 = vld [vmem:[%s10343_s8 + $0x398] sm:$0xf]  ;;  %v5540_v19 = vor.u32 %v6707_v14, %v5539_v13  ;;  %v2701_v13 = vperm.slane %v10233_v54, 3 }
 0x327   :  { %4230 = vmatpush.bf16.msra.mxu2 %v6128_v18  ;;  %v3917_v18 = vpop.f32.mrf.mxu0  ;;  %v5988_v22 = vor.u32 %v6819_v50, %v5987_v16 }
 0x328   :  { %4218 = vmatpush.bf16.msra.mxu1 %v5848_v21  ;;  %v3875_v15 = vpop.f32.mrf.mxu3 }
 0x329   :  { %4246 = vmatpush.bf16.msra.mxu0 %v6296_v8  ;;  %v3903_v55 = vpop.f32.mrf.mxu2  ;;  %v3876_v21 = vadd.f32 %v3875_v15, %v2698_v42  ;;  %v3916_v8 = vadd.f32 %v3915_v46, %v3902_v20 }
 0x32a   :  { %4203 = vmatpush.bf16.msra.mxu3 %v5652_v26 }
 0x32b   :  { %4231 = vmatpush.bf16.msra.mxu2 %v6100_v30  ;;  %v3890_v24 = vadd.f32 %v3889_v36, %v3876_v21  ;;  %v4256_v30 = vmul.f32 0.5, %v3916_v8 }
 0x32c   :  { %4219 = vmatpush.bf16.msra.mxu1 %v5820_v35  ;;  %v3945_v41 = vpop.f32.mrf.mxu1 }
 0x32d   :  { %4247 = vmatpush.bf16.msra.mxu0 %v6268_v40  ;;  %v3904_v31 = vadd.f32 %v3903_v55, %v3890_v24  ;;  %6933 = vtanh.f32 %v4256_v30 }
 0x32e   :  { %4204 = vmatpush.bf16.msra.mxu3 %v5624_v45 }
 0x32f   :  { %4232 = vmatpush.bf16.msra.mxu2 %v6072_v47  ;;  %v3971_v32 = vpop.f32.mrf.mxu0 }
 0x330   :  { %4220 = vmatpush.bf16.msra.mxu1 %v5792_v51  ;;  %v3929_v26 = vpop.f32.mrf.mxu3 }
 0x331   :  { %4248 = vmatpush.bf16.msra.mxu0 %v6240_v57  ;;  %v3930_v27 = vadd.f32 %v3929_v26, %v2699_v23  ;;  %v3957_v28 = vpop.f32.mrf.mxu2 }
 0x332   :  { %4205 = vmatpush.bf16.msra.mxu3 %v5596_v61 }
 0x333   :  { %4233 = vmatpush.bf16.msra.mxu2 %v6044_v1 }
 0x334   :  { %4221 = vmatpush.bf16.msra.mxu1 %v5764_v3  ;;  %v3999_v59 = vpop.f32.mrf.mxu1 }
 0x335   :  { %4249 = vmatpush.bf16.msra.mxu0 %v6212_v7 }
 0x336   :  { %4206 = vmatpush.bf16.msra.mxu3 %v5568_v9 }
 0x337   :  { %4234 = vmatpush.bf16.msra.mxu2 %v6016_v12  ;;  %4222 = vmatmul.bf16.vlgmr.msra.gmra.mxu1 %v9316_v4  ;;  %v3944_v4 = vadd.f32 %v3943_v25, %v3930_v27  ;;  %v3973_v42 = vpop.f32.mrf.mxu0 }
 0x338   :  { %4250 = vmatmul.bf16.vlgmr.msra.gmra.mxu0 %v9324_v11  ;;  %v3918_v11 = vadd.f32 %v3917_v18, %v3904_v31  ;;  %v3931_v38 = vpop.f32.mrf.mxu3 }
 0x339   :  { %v3958_v34 = vadd.f32 %v3957_v28, %v3944_v4  ;;  %v3932_v40 = vadd.f32 %v3931_v38, %v2699_v23  ;;  %v3959_v60 = vpop.f32.mrf.mxu2 }
 0x33a   :  { %4207 = vmatpush.bf16.msra.mxu3 %v5540_v19  ;;  %v4263_v44 = vmul.f32 0.5, %v3918_v11 }
 0x33b   :  { %4235 = vmatpush.bf16.msra.mxu2 %v5988_v22  ;;  %v3972_v35 = vadd.f32 %v3971_v32, %v3958_v34  ;;  %v3946_v45 = vadd.f32 %v3945_v41, %v3932_v40 }
 0x33c   :  { %v4001_v6 = vpop.f32.mrf.mxu1 }
 0x33d   :  { %4208 = vmatmul.bf16.vlgmr.msra.gmra.mxu3 %v9358_v29  ;;  %v4257_v39 = vmul.f32 0.5, %v3972_v35  ;;  %v6934_v29 = vpop.eup %6933  ;;  %v3960_v37 = vadd.f32 %v3959_v60, %v3946_v45 }
 0x33e   :  { %4236 = vmatmul.bf16.vlgmr.msra.gmra.mxu2 %v9366_v33  ;;  %v4284_v47 = vmul.f32 0.5, %v6934_v29 }
 0x33f   :  { %6935 = vtanh.f32 %v4257_v39  ;;  %v3974_v33 = vadd.f32 %v3973_v42, %v3960_v37  ;;  %v4027_v2 = vpop.f32.mrf.mxu0 }
 0x340   :  { %6937 = vtanh.f32 %v4263_v44  ;;  %v4298_v49 = vadd.f32 0.5, %v4284_v47  ;;  %v3985_v61 = vpop.f32.mrf.mxu3 }
 0x341   :  { %v4264_v48 = vmul.f32 0.5, %v3974_v33  ;;  %v4013_v1 = vpop.f32.mrf.mxu2  ;;  %v3986_v3 = vadd.f32 %v3985_v61, %v2700_v0 }
 0x343   :  { %6939 = vtanh.f32 %v4264_v48  ;;  %v4000_v5 = vadd.f32 %v3999_v59, %v3986_v3 }
 0x345   :  { %v6936_v17 = vpop.eup %6935  ;;  %v4014_v9 = vadd.f32 %v4013_v1, %v4000_v5  ;;  %v2703_v1 = vperm.slane %v10233_v54, 5 }
 0x346   :  { %v4285_v46 = vmul.f32 0.5, %v6936_v17  ;;  %v6938_v52 = vpop.eup %6937 }
 0x347   :  { %v4291_v56 = vmul.f32 0.5, %v6938_v52  ;;  %v4029_v12 = vpop.f32.mrf.mxu0  ;;  %v4028_v14 = vadd.f32 %v4027_v2, %v4014_v9 }
 0x348   :  { %v4299_v51 = vadd.f32 0.5, %v4285_v46  ;;  %v3987_v7 = vpop.f32.mrf.mxu3 }
 0x349   :  { %v6940_v57 = vpop.eup %6939  ;;  %v4305_v62 = vadd.f32 0.5, %v4291_v56  ;;  %v4015_v36 = vpop.f32.mrf.mxu2  ;;  %v3988_v10 = vadd.f32 %v3987_v7, %v2700_v0  ;;  %v4258_v19 = vmul.f32 0.5, %v4028_v14 }
 0x34a   :  { %v4312_v53 = vpack.c.bf16 %v4299_v51, %v4298_v49  ;;  %v4292_v58 = vmul.f32 0.5, %v6940_v57  ;;  %v2702_v51 = vperm.slane %v10233_v54, 4 }
 0x34b   :  { %v4002_v15 = vadd.f32 %v4001_v6, %v3988_v10  ;;  %6941 = vtanh.f32 %v4258_v19 }
 0x34c   :  { %4320 = vst [vmem:[%s10347_s10] sm:$0xff] %v4312_v53  ;;  %v4306_v63 = vadd.f32 0.5, %v4292_v58 }
 0x34d   :  { %v4016_v20 = vadd.f32 %v4015_v36, %v4002_v15 }
 0x34e   :  { %v4316_v43 = vpack.c.bf16 %v4306_v63, %v4305_v62 }
 0x34f   :  { %v4030_v8 = vadd.f32 %v4029_v12, %v4016_v20 }
 0x350   :  { %4325 = vst [vmem:[%s10347_s10 + $0x1c] sm:$0xff] %v4316_v43 }
 0x351   :  { %v4265_v30 = vmul.f32 0.5, %v4030_v8  ;;  %v6942_v32 = vpop.eup %6941 }
 0x352   :  { %v4286_v38 = vmul.f32 0.5, %v6942_v32 }
 0x354   :  { %v4055_v16 = vpop.f32.mrf.mxu1  ;;  %v4300_v44 = vadd.f32 0.5, %v4286_v38  ;;  %v2704_v38 = vperm.slane %v10233_v54, 6 }
 0x355   :  { %v4083_v22 = vpop.f32.mrf.mxu0 }
 0x35c   :  { %v4057_v28 = vpop.f32.mrf.mxu1 }
 0x35d   :  { %v4085_v11 = vpop.f32.mrf.mxu0 }
 0x360   :  { %v4041_v50 = vpop.f32.mrf.mxu3 }
 0x361   :  { %v4042_v55 = vadd.f32 %v4041_v50, %v2701_v13  ;;  %v4069_v18 = vpop.f32.mrf.mxu2 }
 0x363   :  { %v4056_v21 = vadd.f32 %v4055_v16, %v4042_v55 }
 0x365   :  { %v4070_v23 = vadd.f32 %v4069_v18, %v4056_v21 }
 0x367   :  { %v4084_v24 = vadd.f32 %v4083_v22, %v4070_v23 }
 0x368   :  { %v4043_v25 = vpop.f32.mrf.mxu3 }
 0x369   :  { %v4259_v26 = vmul.f32 0.5, %v4084_v24  ;;  %v4044_v27 = vadd.f32 %v4043_v25, %v2701_v13  ;;  %v4071_v4 = vpop.f32.mrf.mxu2 }
 0x36b   :  { %6943 = vtanh.f32 %v4259_v26  ;;  %v4058_v31 = vadd.f32 %v4057_v28, %v4044_v27 }
 0x36c   :  { %6945 = vtanh.f32 %v4265_v30 }
 0x36d   :  { %v4072_v34 = vadd.f32 %v4071_v4, %v4058_v31 }
 0x36f   :  { %v4086_v35 = vadd.f32 %v4085_v11, %v4072_v34 }
 0x371   :  { %v6944_v39 = vpop.eup %6943  ;;  %v4266_v40 = vmul.f32 0.5, %v4086_v35 }
 0x372   :  { %v4287_v41 = vmul.f32 0.5, %v6944_v39  ;;  %v6946_v60 = vpop.eup %6945 }
 0x373   :  { %6947 = vtanh.f32 %v4266_v40  ;;  %v4293_v37 = vmul.f32 0.5, %v6946_v60 }
 0x374   :  { %v4301_v45 = vadd.f32 0.5, %v4287_v41  ;;  %v4111_v46 = vpop.f32.mrf.mxu1 }
 0x375   :  { %v4307_v47 = vadd.f32 0.5, %v4293_v37  ;;  %v4139_v53 = vpop.f32.mrf.mxu0 }
 0x376   :  { %v4313_v29 = vpack.c.bf16 %v4301_v45, %v4300_v44 }
 0x378   :  { %4321 = vst [vmem:[%s10347_s10 + $0x8] sm:$0xff] %v4313_v29 }
 0x379   :  { %v6948_v42 = vpop.eup %6947 }
 0x37a   :  { %v4294_v33 = vmul.f32 0.5, %v6948_v42 }
 0x37c   :  { %v4308_v17 = vadd.f32 0.5, %v4294_v33  ;;  %v4113_v58 = vpop.f32.mrf.mxu1 }
 0x37d   :  { %v4141_v0 = vpop.f32.mrf.mxu0 }
 0x37e   :  { %v4317_v48 = vpack.c.bf16 %v4308_v17, %v4307_v47 }
 0x380   :  { %4326 = vst [vmem:[%s10347_s10 + $0x24] sm:$0xff] %v4317_v48  ;;  %v4097_v49 = vpop.f32.mrf.mxu3 }
 0x381   :  { %v4125_v52 = vpop.f32.mrf.mxu2  ;;  %v4098_v56 = vadd.f32 %v4097_v49, %v2702_v51 }
 0x383   :  { %v4112_v57 = vadd.f32 %v4111_v46, %v4098_v56 }
 0x385   :  { %v4126_v62 = vadd.f32 %v4125_v52, %v4112_v57 }
 0x387   :  { %v4140_v43 = vadd.f32 %v4139_v53, %v4126_v62 }
 0x388   :  { %v4099_v59 = vpop.f32.mrf.mxu3 }
 0x389   :  { %v4127_v61 = vpop.f32.mrf.mxu2  ;;  %v4100_v63 = vadd.f32 %v4099_v59, %v2702_v51  ;;  %v4260_v36 = vmul.f32 0.5, %v4140_v43 }
 0x38b   :  { %v4114_v2 = vadd.f32 %v4113_v58, %v4100_v63  ;;  %6949 = vtanh.f32 %v4260_v36 }
 0x38d   :  { %v4128_v9 = vadd.f32 %v4127_v61, %v4114_v2 }
 0x38f   :  { %v4142_v14 = vadd.f32 %v4141_v0, %v4128_v9 }
 0x391   :  { %v4267_v19 = vmul.f32 0.5, %v4142_v14  ;;  %v6950_v22 = vpop.eup %6949 }
 0x392   :  { %v4288_v25 = vmul.f32 0.5, %v6950_v22 }
 0x394   :  { %v4167_v3 = vpop.f32.mrf.mxu1  ;;  %v4302_v30 = vadd.f32 0.5, %v4288_v25 }
 0x395   :  { %v4195_v12 = vpop.f32.mrf.mxu0 }
 0x39c   :  { %v4169_v18 = vpop.f32.mrf.mxu1 }
 0x39d   :  { %v4197_v8 = vpop.f32.mrf.mxu0 }
 0x3a0   :  { %v4153_v5 = vpop.f32.mrf.mxu3 }
 0x3a1   :  { %v4154_v6 = vadd.f32 %v4153_v5, %v2703_v1  ;;  %v4181_v7 = vpop.f32.mrf.mxu2 }
 0x3a3   :  { %v4168_v10 = vadd.f32 %v4167_v3, %v4154_v6 }
 0x3a5   :  { %v4182_v13 = vadd.f32 %v4181_v7, %v4168_v10 }
 0x3a7   :  { %v4196_v15 = vadd.f32 %v4195_v12, %v4182_v13 }
 0x3a8   :  { %v4155_v16 = vpop.f32.mrf.mxu3 }
 0x3a9   :  { %v4261_v50 = vmul.f32 0.5, %v4196_v15  ;;  %v4156_v55 = vadd.f32 %v4155_v16, %v2703_v1  ;;  %v4183_v21 = vpop.f32.mrf.mxu2 }
 0x3ab   :  { %6951 = vtanh.f32 %v4261_v50  ;;  %v4170_v20 = vadd.f32 %v4169_v18, %v4156_v55 }
 0x3ac   :  { %6953 = vtanh.f32 %v4267_v19 }
 0x3ad   :  { %v4184_v23 = vadd.f32 %v4183_v21, %v4170_v20 }
 0x3af   :  { %v4198_v24 = vadd.f32 %v4197_v8, %v4184_v23 }
 0x3b1   :  { %v6952_v26 = vpop.eup %6951  ;;  %v4268_v27 = vmul.f32 0.5, %v4198_v24 }
 0x3b2   :  { %v4289_v28 = vmul.f32 0.5, %v6952_v26  ;;  %v6954_v4 = vpop.eup %6953 }
 0x3b3   :  { %6955 = vtanh.f32 %v4268_v27  ;;  %v4295_v34 = vmul.f32 0.5, %v6954_v4 }
 0x3b4   :  { %v4303_v31 = vadd.f32 0.5, %v4289_v28  ;;  %v4223_v41 = vpop.f32.mrf.mxu1 }
 0x3b5   :  { %v4309_v39 = vadd.f32 0.5, %v4295_v34  ;;  %v4251_v42 = vpop.f32.mrf.mxu0 }
 0x3b6   :  { %v4314_v32 = vpack.c.bf16 %v4303_v31, %v4302_v30 }
 0x3b8   :  { %4322 = vst [vmem:[%s10347_s10 + $0x10] sm:$0xff] %v4314_v32 }
 0x3b9   :  { %v6956_v11 = vpop.eup %6955 }
 0x3ba   :  { %v4296_v35 = vmul.f32 0.5, %v6956_v11 }
 0x3bc   :  { %v4310_v40 = vadd.f32 0.5, %v4296_v35  ;;  %v4225_v49 = vpop.f32.mrf.mxu1 }
 0x3bd   :  { %v4253_v53 = vpop.f32.mrf.mxu0 }
 0x3be   :  { %v4318_v45 = vpack.c.bf16 %v4310_v40, %v4309_v39 }
 0x3c0   :  { %v4209_v44 = vpop.f32.mrf.mxu3  ;;  %4327 = vst [vmem:[%s10347_s10 + $0x2c] sm:$0xff] %v4318_v45 }
 0x3c1   :  { %v4210_v60 = vadd.f32 %v4209_v44, %v2704_v38  ;;  %v4237_v29 = vpop.f32.mrf.mxu2 }
 0x3c3   :  { %v4224_v37 = vadd.f32 %v4223_v41, %v4210_v60 }
 0x3c5   :  { %v4238_v33 = vadd.f32 %v4237_v29, %v4224_v37 }
 0x3c7   :  { %v4252_v47 = vadd.f32 %v4251_v42, %v4238_v33 }
 0x3c8   :  { %v4211_v17 = vpop.f32.mrf.mxu3 }
 0x3c9   :  { %v4262_v48 = vmul.f32 0.5, %v4252_v47  ;;  %v4212_v46 = vadd.f32 %v4211_v17, %v2704_v38  ;;  %v4239_v51 = vpop.f32.mrf.mxu2 }
 0x3cb   :  { %6957 = vtanh.f32 %v4262_v48  ;;  %v4226_v54 = vadd.f32 %v4225_v49, %v4212_v46 }
 0x3cd   :  { %v4240_v52 = vadd.f32 %v4239_v51, %v4226_v54 }
 0x3cf   :  { %v4254_v56 = vadd.f32 %v4253_v53, %v4240_v52 }
 0x3d1   :  { %v6958_v57 = vpop.eup %6957  ;;  %v4269_v58 = vmul.f32 0.5, %v4254_v56 }
 0x3d2   :  { %v4290_v59 = vmul.f32 0.5, %v6958_v57 }
 0x3d3   :  { %6959 = vtanh.f32 %v4269_v58 }
 0x3d4   :  { %v4304_v61 = vadd.f32 0.5, %v4290_v59 }
 0x3d6   :  { %v4315_v62 = vpack.c.bf16 %v4304_v61, %v4304_v61 }
 0x3d8   :  { %4324 = vst.msk [vmem:[%s10347_s10 + $0x18] sm:$0xf] %vm4323_vm1, %v4315_v62 }
 0x3d9   :  { %v6960_v63 = vpop.eup %6959 }
 0x3da   :  { %v4297_v0 = vmul.f32 0.5, %v6960_v63 }
 0x3dc   :  { %v4311_v1 = vadd.f32 0.5, %v4297_v0 }
 0x3de   :  { %v4319_v43 = vpack.c.bf16 %v4311_v1, %v4311_v1 }
 0x3e0   :  { %4328 = vst.msk [vmem:[%s10347_s10 + $0x34] sm:$0xf] %vm4323_vm1, %v4319_v43 }

</bundles_post_ra>
